<compile_context>
chip_gen: v7x
topology: tpu7x:2x2x1
jax: 0.10.0
libtpu: 0.0.40
codegen_flags: <defaults>
</compile_context>

<pallas_src>
import functools
import math

import jax
import jax.numpy as jnp
import numpy as np
from jax import lax
from jax.experimental import pallas as pl
from jax.experimental.pallas import tpu as pltpu

LN_EPS = 1e-6
MASK_NEG = -1e30  # additive-mask value (finite: avoids NaN on fully-masked rows)


# ----------------------------- kernel helpers ------------------------------

def _layer_norm(x, gamma, beta):
    mu = jnp.mean(x, axis=-1, keepdims=True)
    d = x - mu
    var = jnp.mean(d * d, axis=-1, keepdims=True)
    return d * lax.rsqrt(var + LN_EPS) * gamma + beta


def _bf16_dot(x, w):
    # x: f32 activation, w: bf16 weight; f32 accumulation on the MXU.
    return jnp.dot(x.astype(jnp.bfloat16), w, preferred_element_type=jnp.float32)


def _to_heads(x2d, nb, s, nh, hd):
    # (nb*s, nh*hd) -> (nb*nh, s, hd), bf16 (single reshape + transpose).
    x = x2d.astype(jnp.bfloat16).reshape(nb, s, nh, hd)
    return jnp.transpose(x, (0, 2, 1, 3)).reshape(nb * nh, s, hd)


def _from_heads(x, nb, s, nh, hd):
    # (nb*nh, s, hd) -> (nb*s, nh*hd)  (== concat over heads, no lane concat op)
    x = x.reshape(nb, nh, s, hd)
    return jnp.transpose(x, (0, 2, 1, 3)).reshape(nb * s, nh * hd)


def _attention(q2d, k2d, v2d, mask_add, nb, sq, skv, nh, hd):
    # q2d: (nb*sq, E); k2d/v2d: (nb*skv, E); mask_add: (nb, sq, skv) additive.
    qh = _to_heads(q2d, nb, sq, nh, hd)
    kh = _to_heads(k2d, nb, skv, nh, hd)
    vh = _to_heads(v2d, nb, skv, nh, hd)
    s = jnp.einsum('nqd,nkd->nqk', qh, kh, preferred_element_type=jnp.float32)
    s = s.reshape(nb, nh, sq, skv) + mask_add[:, None, :, :]   # bf16 mask promotes
    s = s - jnp.max(s, axis=-1, keepdims=True)
    p = jnp.exp(s)
    p = p * pl.reciprocal(jnp.sum(p, axis=-1, keepdims=True), approx=True)
    p = p.reshape(nb * nh, sq, skv).astype(jnp.bfloat16)
    o = jnp.einsum('nqk,nkd->nqd', p, vh, preferred_element_type=jnp.float32)
    return _from_heads(o, nb, sq, nh, hd)                      # (nb*sq, E) f32


# --------------------- kernel 1: streamed decoder layers ---------------------

def _decoder_layers_kernel(
        x_ref, enc_ref, tmask_ref, smask_ref,
        wqkv_ref, bqkv_ref, wos_ref, bos_ref, gs_ref, bs_ref,
        wqc_ref, bqc_ref, wkvc_ref, bkvc_ref, woc_ref, boc_ref,
        g1_ref, b1_ref, w1_ref, c1_ref, w2_ref, c2_ref, g2_ref, b2_ref,
        o_ref, h_sc, *, num_heads):
    l = pl.program_id(1)
    n_layers = pl.num_programs(1)

    BB, Sq, E = x_ref.shape
    Skv = enc_ref.shape[1]
    H = num_heads
    hd = E // H
    M = BB * Sq

    @pl.when(l == 0)
    def _init():
        h_sc[...] = x_ref[...].reshape(M, E)

    h = h_sc[...]                                   # (M, E) f32 carried state
    enc2d = enc_ref[...].reshape(BB * Skv, E)       # bf16
    tmask = tmask_ref[...]                          # (BB, Sq, Sq)  additive bf16
    smask = smask_ref[...]                          # (BB, Sq, Skv) additive bf16

    # ---- masked self-attention (fused QKV; 1/sqrt(hd) folded into Wq/bq) ----
    qkv = _bf16_dot(h, wqkv_ref[0]) + bqkv_ref[0]                       # (M, 3E)
    a = _attention(qkv[:, :E], qkv[:, E:2 * E], qkv[:, 2 * E:],
                   tmask, BB, Sq, Sq, H, hd)
    a = _bf16_dot(a, wos_ref[0]) + bos_ref[0]                           # full-K out proj
    h = _layer_norm(a + h, gs_ref[0], bs_ref[0])

    # ---- cross-attention over encoder output (fused KV) ----
    qc = _bf16_dot(h, wqc_ref[0]) + bqc_ref[0]                          # (M, E)
    kvc = jnp.dot(enc2d, wkvc_ref[0],
                  preferred_element_type=jnp.float32) + bkvc_ref[0]     # (BB*Skv, 2E)
    c = _attention(qc, kvc[:, :E], kvc[:, E:], smask, BB, Sq, Skv, H, hd)
    c = _bf16_dot(c, woc_ref[0]) + boc_ref[0]
    h = _layer_norm(c + h, g1_ref[0], b1_ref[0])

    # ---- FFN ----
    f = jnp.maximum(_bf16_dot(h, w1_ref[0]) + c1_ref[0], 0.0)
    f = _bf16_dot(f, w2_ref[0]) + c2_ref[0]
    h = _layer_norm(f + h, g2_ref[0], b2_ref[0])

    h_sc[...] = h

    @pl.when(l == n_layers - 1)
    def _write():
        o_ref[...] = h.reshape(BB, Sq, E).astype(o_ref.dtype)


# --------------------- kernel 2: tiled vocab projection ----------------------

def _vocab_proj_kernel(h_ref, w_ref, b_ref, o_ref):
    o_ref[...] = (jnp.dot(h_ref[...], w_ref[...],
                          preferred_element_type=jnp.float32) + b_ref[...])


# ---------------------------------- wrapper ----------------------------------

def _device_kind():
    try:
        return jax.devices()[0].device_kind.lower()
    except Exception:
        return ""


def _vmem_limit_bytes(kind):
    limit = 100 * 1024 * 1024 if ("v5" in kind or "v6" in kind) else 56 * 1024 * 1024
    try:  # clamp to 7/8 of physical VMEM when the query is available
        cap = pltpu.get_tpu_info().vmem_capacity_bytes
        limit = min(limit, int(cap * 7 / 8))
    except Exception:
        pass
    return limit


@functools.partial(jax.jit, static_argnums=(5,))
def decoder_forward(x_ids, encoder_out, src_mask, tgt_mask, params, num_heads):
    # TODO(synk): token/position embedding gather + add stays in plain JAX
    # (data-dependent gather); dropout layers are identity (eval mode).
    tok = jnp.take(params['tok_emb'], x_ids, axis=0)              # (B, Sq, E)
    Sq = x_ids.shape[1]
    h0 = tok + params['pos_emb'][:Sq][None]

    B, _, E = h0.shape
    Skv = encoder_out.shape[1]
    H = num_heads
    hd = E // H
    scale = 1.0 / math.sqrt(hd)
    layers = params['layers']
    L = len(layers)
    V = params['out_w'].shape[1]
    Vpad = ((V + 127) // 128) * 128

    kind = _device_kind()
    vmem_limit = _vmem_limit_bytes(kind)
    # 2-way batch split keeps both TCs busy on v7x; single block (max M) elsewhere.
    nb_blocks = 2 if ("v7" in kind and B % 2 == 0 and B >= 2) else 1
    bb = B // nb_blocks

    bf = lambda w: w.astype(jnp.bfloat16)
    stack = lambda fn: jnp.stack([fn(lyr) for lyr in layers], axis=0)

    # ---- stacked / bf16 / pre-fused weights (trace-time plumbing only) ----
    wqkv_s = stack(lambda l: bf(jnp.concatenate(
        [l['self_attn']['wq'] * scale, l['self_attn']['wk'], l['self_attn']['wv']], axis=1)))
    bqkv_s = stack(lambda l: jnp.concatenate(
        [l['self_attn']['bq'] * scale, l['self_attn']['bk'], l['self_attn']['bv']], axis=1))
    wo_s = stack(lambda l: bf(l['self_attn']['wo']))
    bo_s = stack(lambda l: l['self_attn']['bo'])
    g_s = stack(lambda l: l['ln_self']['gamma'])
    b_s = stack(lambda l: l['ln_self']['beta'])

    wq_c = stack(lambda l: bf(l['cross_attn']['wq'] * scale))
    bq_c = stack(lambda l: l['cross_attn']['bq'] * scale)
    wkv_c = stack(lambda l: bf(jnp.concatenate(
        [l['cross_attn']['wk'], l['cross_attn']['wv']], axis=1)))
    bkv_c = stack(lambda l: jnp.concatenate(
        [l['cross_attn']['bk'], l['cross_attn']['bv']], axis=1))
    wo_c = stack(lambda l: bf(l['cross_attn']['wo']))
    bo_c = stack(lambda l: l['cross_attn']['bo'])
    g1 = stack(lambda l: l['ln1']['gamma'])
    b1 = stack(lambda l: l['ln1']['beta'])

    w1 = stack(lambda l: bf(l['ffn']['w1']))
    c1 = stack(lambda l: l['ffn']['b1'])
    w2 = stack(lambda l: bf(l['ffn']['w2']))
    c2 = stack(lambda l: l['ffn']['b2'])
    g2 = stack(lambda l: l['ln2']['gamma'])
    b2 = stack(lambda l: l['ln2']['beta'])

    # ---- precomputed additive masks (hoisted out of the layer loop) ----
    tmask_add = jnp.where(tgt_mask == 0.0, MASK_NEG, 0.0).astype(jnp.bfloat16)
    smask_add = jnp.where(src_mask == 0.0, MASK_NEG, 0.0).astype(jnp.bfloat16)
    enc_bf = encoder_out.astype(jnp.bfloat16)

    def _wspec(arr):   # per-layer weights: streamed along the layer grid axis
        return pl.BlockSpec((1,) + arr.shape[1:], lambda b, l: (l, 0, 0))

    def _aspec(arr):   # per-batch-block activations / masks
        return pl.BlockSpec((bb,) + arr.shape[1:], lambda b, l: (b, 0, 0))

    h_final = pl.pallas_call(
        functools.partial(_decoder_layers_kernel, num_heads=H),
        out_shape=jax.ShapeDtypeStruct((B, Sq, E), jnp.bfloat16),
        grid=(nb_blocks, L),
        in_specs=[
            _aspec(h0), _aspec(enc_bf), _aspec(tmask_add), _aspec(smask_add),
            _wspec(wqkv_s), _wspec(bqkv_s), _wspec(wo_s), _wspec(bo_s),
            _wspec(g_s), _wspec(b_s),
            _wspec(wq_c), _wspec(bq_c), _wspec(wkv_c), _wspec(bkv_c),
            _wspec(wo_c), _wspec(bo_c), _wspec(g1), _wspec(b1),
            _wspec(w1), _wspec(c1), _wspec(w2), _wspec(c2),
            _wspec(g2), _wspec(b2),
        ],
        out_specs=pl.BlockSpec((bb, Sq, E), lambda b, l: (b, 0, 0)),
        scratch_shapes=[pltpu.VMEM((bb * Sq, E), jnp.float32)],
        compiler_params=pltpu.CompilerParams(
            dimension_semantics=("parallel", "arbitrary"),
            vmem_limit_bytes=vmem_limit),
    )(h0, enc_bf, tmask_add, smask_add,
      wqkv_s, bqkv_s, wo_s, bo_s, g_s, b_s,
      wq_c, bq_c, wkv_c, bkv_c, wo_c, bo_c, g1, b1,
      w1, c1, w2, c2, g2, b2)

    # ---- tiled final vocab projection (lane-dense TN-column slabs) ----
    wout_bf = bf(jnp.pad(params['out_w'], ((0, 0), (0, Vpad - V))))
    bout = jnp.pad(params['out_b'], ((0, 0), (0, Vpad - V)))
    h_flat = h_final.reshape(B * Sq, E)                      # bf16, B folded into M
    TN = max(t for t in (1024, 512, 256, 128) if Vpad % t == 0)

    logits_pad = pl.pallas_call(
        _vocab_proj_kernel,
        out_shape=jax.ShapeDtypeStruct((B * Sq, Vpad), jnp.float32),
        grid=(Vpad // TN,),
        in_specs=[
            pl.BlockSpec((B * Sq, E), lambda v: (0, 0)),
            pl.BlockSpec((E, TN), lambda v: (0, v)),
            pl.BlockSpec((1, TN), lambda v: (0, v)),
        ],
        out_specs=pl.BlockSpec((B * Sq, TN), lambda v: (0, v)),
        compiler_params=pltpu.CompilerParams(
            dimension_semantics=("parallel",),
            vmem_limit_bytes=vmem_limit),
    )(h_flat, wout_bf, bout)

    return logits_pad.reshape(B, Sq, Vpad)[:, :, :V]


# --------------------------- pure-JAX f32 reference ---------------------------

def _mha_ref(q, k, v, mask, p, num_heads):
    B, Sq, E = q.shape
    hd = E // num_heads
    Q = q @ p['wq'] + p['bq'][0]
    K = k @ p['wk'] + p['bk'][0]
    V = v @ p['wv'] + p['bv'][0]

    def split(x):
        return x.reshape(B, -1, num_heads, hd).transpose(0, 2, 1, 3)

    Qh, Kh, Vh = split(Q), split(K), split(V)
    s = jnp.einsum('bhqd,bhkd->bhqk', Qh, Kh) / math.sqrt(hd)
    s = jnp.where(mask[:, None] == 0.0, -jnp.inf, s)
    w = jax.nn.softmax(s, axis=-1)
    o = jnp.einsum('bhqk,bhkd->bhqd', w, Vh).transpose(0, 2, 1, 3).reshape(B, Sq, E)
    return o @ p['wo'] + p['bo'][0]


def _ln_ref(x, p):
    mu = jnp.mean(x, axis=-1, keepdims=True)
    var = jnp.mean((x - mu) ** 2, axis=-1, keepdims=True)
    return (x - mu) / jnp.sqrt(var + LN_EPS) * p['gamma'][0] + p['beta'][0]


def decoder_forward_ref(x_ids, encoder_out, src_mask, tgt_mask, params, num_heads):
    tok = jnp.take(params['tok_emb'], x_ids, axis=0)
    h = tok + params['pos_emb'][:x_ids.shape[1]][None]
    for lyr in params['layers']:
        a = _mha_ref(h, h, h, tgt_mask, lyr['self_attn'], num_heads)
        h1 = _ln_ref(a + h, lyr['ln_self'])
        c = _mha_ref(h1, encoder_out, encoder_out, src_mask, lyr['cross_attn'], num_heads)
        n1 = _ln_ref(c + h1, lyr['ln1'])
        f = jnp.maximum(n1 @ lyr['ffn']['w1'] + lyr['ffn']['b1'][0], 0.0) \
            @ lyr['ffn']['w2'] + lyr['ffn']['b2'][0]
        h = _ln_ref(f + n1, lyr['ln2'])
    return h @ params['out_w'] + params['out_b'][0]


# ------------------------------- param init -----------------------------------

def init_params(key, vocab_size, emb_dim, num_layers, forward_dim, max_len):
    keys = iter(jax.random.split(key, 8 + num_layers * 20))

    def w(shape, scale=0.05):
        return (scale * jax.random.normal(next(keys), shape)).astype(jnp.float32)

    def attn_params():
        return {
            'wq': w((emb_dim, emb_dim)), 'bq': w((1, emb_dim)),
            'wk': w((emb_dim, emb_dim)), 'bk': w((1, emb_dim)),
            'wv': w((emb_dim, emb_dim)), 'bv': w((1, emb_dim)),
            'wo': w((emb_dim, emb_dim)), 'bo': w((1, emb_dim)),
        }

    def ln_params():
        return {'gamma': jnp.ones((1, emb_dim), jnp.float32),
                'beta': jnp.zeros((1, emb_dim), jnp.float32)}

    layers = []
    for _ in range(num_layers):
        layers.append({
            'self_attn': attn_params(),
            'ln_self': ln_params(),
            'cross_attn': attn_params(),
            'ln1': ln_params(),
            'ffn': {'w1': w((emb_dim, forward_dim)), 'b1': w((1, forward_dim)),
                    'w2': w((forward_dim, emb_dim)), 'b2': w((1, emb_dim))},
            'ln2': ln_params(),
        })

    return {
        'tok_emb': w((vocab_size, emb_dim), 0.1),
        'pos_emb': w((max_len, emb_dim), 0.1),
        'layers': layers,
        'out_w': w((emb_dim, vocab_size)),
        'out_b': w((1, vocab_size)),
    }


# ----------------------------------- main --------------------------------------

if __name__ == "__main__":
    vocab_size, emb_dim, num_layers, num_heads = 50, 32, 2, 4
    forward_dim, max_len = 64, 16
    B, S_tgt, S_src = 2, 8, 8

    key = jax.random.PRNGKey(0)
    k_p, k_x, k_enc = jax.random.split(key, 3)

    params = init_params(k_p, vocab_size, emb_dim, num_layers, forward_dim, max_len)

    x_ids = jax.random.randint(k_x, (B, S_tgt), 0, vocab_size, dtype=jnp.int32)
    encoder_out = (0.1 * jax.random.normal(k_enc, (B, S_src, emb_dim))).astype(jnp.float32)

    # tgt_mask: causal (B, S_tgt, S_tgt); src_mask: all-ones (B, S_tgt, S_src)
    tgt_mask = jnp.broadcast_to(
        jnp.tril(jnp.ones((S_tgt, S_tgt), jnp.float32)), (B, S_tgt, S_tgt))
    src_mask = jnp.ones((B, S_tgt, S_src), jnp.float32)

    out = decoder_forward(x_ids, encoder_out, src_mask, tgt_mask, params, num_heads)
    out = jax.block_until_ready(out)

    ref = decoder_forward_ref(x_ids, encoder_out, src_mask, tgt_mask, params, num_heads)
    # bf16 MXU inputs (f32 accumulation) + approx reciprocal -> loosened tolerance.
    np.testing.assert_allclose(np.asarray(out), np.asarray(ref), rtol=3e-2, atol=3e-2)

    assert out.shape == (B, S_tgt, vocab_size)
    print("KERNEL_OK")
</pallas_src>

<mosaic_0001>
module attributes {stable_mosaic.version = 11 : i64} {
  func.func @_vocab_proj_kernel(%arg0: i32, %arg1: memref<16x32xbf16, #tpu.memory_space<vmem>>, %arg2: memref<32x128xbf16, #tpu.memory_space<vmem>>, %arg3: memref<1x128xf32, #tpu.memory_space<vmem>>, %arg4: memref<16x128xf32, #tpu.memory_space<vmem>>) attributes {dimension_semantics = [#tpu.dimension_semantics<parallel>], iteration_bounds = array<i64: 1>, scalar_prefetch = 0 : i64, scratch_operands = 0 : i64, tpu.core_type = #tpu.core_type<tc>, window_params = [{pipeline_mode = #tpu.pipeline_mode<synchronous>, transform_indices = @transform_0, window_bounds = array<i64: 16, 32>}, {transform_indices = @transform_1, window_bounds = array<i64: 32, 128>}, {transform_indices = @transform_2, window_bounds = array<i64: 1, 128>}, {transform_indices = @transform_3, window_bounds = array<i64: 16, 128>}]} {
    %c0 = arith.constant 0 : index
    %c0_0 = arith.constant 0 : index
    %0 = vector.load %arg1[%c0, %c0_0] : memref<16x32xbf16, #tpu.memory_space<vmem>>, vector<16x32xbf16>
    %c0_1 = arith.constant 0 : index
    %c0_2 = arith.constant 0 : index
    %1 = vector.load %arg2[%c0_1, %c0_2] : memref<32x128xbf16, #tpu.memory_space<vmem>>, vector<32x128xbf16>
    %cst = arith.constant dense<0.000000e+00> : vector<16x128xf32>
    %2 = tpu.matmul %0, %1, %cst {dimension_numbers = #tpu.dot_dimension_numbers<[1], [0], [0], [1], [0, 0, 1, 1], [], []>} : vector<16x32xbf16>, vector<32x128xbf16>, vector<16x128xf32> -> vector<16x128xf32>
    %c0_3 = arith.constant 0 : index
    %c0_4 = arith.constant 0 : index
    %3 = vector.load %arg3[%c0_3, %c0_4] : memref<1x128xf32, #tpu.memory_space<vmem>>, vector<1x128xf32>
    %4 = vector.broadcast %3 : vector<1x128xf32> to vector<16x128xf32>
    %5 = arith.addf %2, %4 : vector<16x128xf32>
    %c0_5 = arith.constant 0 : index
    %c0_6 = arith.constant 0 : index
    %6 = vector.load %arg4[%c0_5, %c0_6] : memref<16x128xf32, #tpu.memory_space<vmem>>, vector<16x128xf32>
    tpu.vector_store %arg4[%c0_5, %c0_6], %5 {strides = array<i32>} : memref<16x128xf32, #tpu.memory_space<vmem>>, vector<16x128xf32>,
    return
  }
  func.func @transform_0(%arg0: i32) -> (i32, i32) {
    %c0_i32 = arith.constant 0 : i32
    %c0_i32_0 = arith.constant 0 : i32
    %c0_i32_1 = arith.constant 0 : i32
    return %c0_i32, %c0_i32_0 : i32, i32
  }
  func.func @transform_1(%arg0: i32) -> (i32, i32) {
    %c0_i32 = arith.constant 0 : i32
    %c0_i32_0 = arith.constant 0 : i32
    return %c0_i32, %arg0 : i32, i32
  }
  func.func @transform_2(%arg0: i32) -> (i32, i32) {
    %c0_i32 = arith.constant 0 : i32
    %c0_i32_0 = arith.constant 0 : i32
    return %c0_i32, %arg0 : i32, i32
  }
  func.func @transform_3(%arg0: i32) -> (i32, i32) {
    %c0_i32 = arith.constant 0 : i32
    %c0_i32_0 = arith.constant 0 : i32
    return %c0_i32, %arg0 : i32, i32
  }
}

module attributes {stable_mosaic.version = 11 : i64} {
  func.func @_decoder_layers_kernel(%arg0: i32, %arg1: i32, %arg2: memref<2x8x32xf32, #tpu.memory_space<vmem>>, %arg3: memref<2x8x32xbf16, #tpu.memory_space<vmem>>, %arg4: memref<2x8x8xbf16, #tpu.memory_space<vmem>>, %arg5: memref<2x8x8xbf16, #tpu.memory_space<vmem>>, %arg6: memref<1x32x96xbf16, #tpu.memory_space<vmem>>, %arg7: memref<1x1x96xf32, #tpu.memory_space<vmem>>, %arg8: memref<1x32x32xbf16, #tpu.memory_space<vmem>>, %arg9: memref<1x1x32xf32, #tpu.memory_space<vmem>>, %arg10: memref<1x1x32xf32, #tpu.memory_space<vmem>>, %arg11: memref<1x1x32xf32, #tpu.memory_space<vmem>>, %arg12: memref<1x32x32xbf16, #tpu.memory_space<vmem>>, %arg13: memref<1x1x32xf32, #tpu.memory_space<vmem>>, %arg14: memref<1x32x64xbf16, #tpu.memory_space<vmem>>, %arg15: memref<1x1x64xf32, #tpu.memory_space<vmem>>, %arg16: memref<1x32x32xbf16, #tpu.memory_space<vmem>>, %arg17: memref<1x1x32xf32, #tpu.memory_space<vmem>>, %arg18: memref<1x1x32xf32, #tpu.memory_space<vmem>>, %arg19: memref<1x1x32xf32, #tpu.memory_space<vmem>>, %arg20: memref<1x32x64xbf16, #tpu.memory_space<vmem>>, %arg21: memref<1x1x64xf32, #tpu.memory_space<vmem>>, %arg22: memref<1x64x32xbf16, #tpu.memory_space<vmem>>, %arg23: memref<1x1x32xf32, #tpu.memory_space<vmem>>, %arg24: memref<1x1x32xf32, #tpu.memory_space<vmem>>, %arg25: memref<1x1x32xf32, #tpu.memory_space<vmem>>, %arg26: memref<2x8x32xbf16, #tpu.memory_space<vmem>>, %arg27: memref<16x32xf32, #tpu.memory_space<vmem>>) attributes {dimension_semantics = [#tpu.dimension_semantics<parallel>, #tpu.dimension_semantics<arbitrary>], iteration_bounds = array<i64: 1, 2>, scalar_prefetch = 0 : i64, scratch_operands = 1 : i64, tpu.core_type = #tpu.core_type<tc>, window_params = [{transform_indices = @transform_0, window_bounds = array<i64: 2, 8, 32>}, {transform_indices = @transform_1, window_bounds = array<i64: 2, 8, 32>}, {transform_indices = @transform_2, window_bounds = array<i64: 2, 8, 8>}, {transform_indices = @transform_3, window_bounds = array<i64: 2, 8, 8>}, {transform_indices = @transform_4, window_bounds = array<i64: 1, 32, 96>}, {transform_indices = @transform_5, window_bounds = array<i64: 1, 1, 96>}, {transform_indices = @transform_6, window_bounds = array<i64: 1, 32, 32>}, {transform_indices = @transform_7, window_bounds = array<i64: 1, 1, 32>}, {transform_indices = @transform_8, window_bounds = array<i64: 1, 1, 32>}, {transform_indices = @transform_9, window_bounds = array<i64: 1, 1, 32>}, {transform_indices = @transform_10, window_bounds = array<i64: 1, 32, 32>}, {transform_indices = @transform_11, window_bounds = array<i64: 1, 1, 32>}, {transform_indices = @transform_12, window_bounds = array<i64: 1, 32, 64>}, {transform_indices = @transform_13, window_bounds = array<i64: 1, 1, 64>}, {transform_indices = @transform_14, window_bounds = array<i64: 1, 32, 32>}, {transform_indices = @transform_15, window_bounds = array<i64: 1, 1, 32>}, {transform_indices = @transform_16, window_bounds = array<i64: 1, 1, 32>}, {transform_indices = @transform_17, window_bounds = array<i64: 1, 1, 32>}, {transform_indices = @transform_18, window_bounds = array<i64: 1, 32, 64>}, {transform_indices = @transform_19, window_bounds = array<i64: 1, 1, 64>}, {transform_indices = @transform_20, window_bounds = array<i64: 1, 64, 32>}, {transform_indices = @transform_21, window_bounds = array<i64: 1, 1, 32>}, {transform_indices = @transform_22, window_bounds = array<i64: 1, 1, 32>}, {transform_indices = @transform_23, window_bounds = array<i64: 1, 1, 32>}, {transform_indices = @transform_24, window_bounds = array<i64: 2, 8, 32>}]} {
    %c0_i32 = arith.constant 0 : i32
    %0 = arith.cmpi eq, %arg1, %c0_i32 : i32
    %1 = arith.extui %0 : i1 to i32
    %c0_i32_0 = arith.constant 0 : i32
    %2 = arith.cmpi ne, %1, %c0_i32_0 : i32
    scf.if %2 {
      %c0_104 = arith.constant 0 : index
      %c0_105 = arith.constant 0 : index
      %c0_106 = arith.constant 0 : index
      %217 = vector.load %arg2[%c0_104, %c0_105, %c0_106] : memref<2x8x32xf32, #tpu.memory_space<vmem>>, vector<2x8x32xf32>
      %218 = vector.shape_cast %217 : vector<2x8x32xf32> to vector<16x32xf32>
      %c0_107 = arith.constant 0 : index
      %c0_108 = arith.constant 0 : index
      %219 = vector.load %arg27[%c0_107, %c0_108] : memref<16x32xf32, #tpu.memory_space<vmem>>, vector<16x32xf32>
      tpu.vector_store %arg27[%c0_107, %c0_108], %218 {strides = array<i32>} : memref<16x32xf32, #tpu.memory_space<vmem>>, vector<16x32xf32>,
    } else {
    }
    %c0 = arith.constant 0 : index
    %c0_1 = arith.constant 0 : index
    %3 = vector.load %arg27[%c0, %c0_1] : memref<16x32xf32, #tpu.memory_space<vmem>>, vector<16x32xf32>
    %c0_2 = arith.constant 0 : index
    %c0_3 = arith.constant 0 : index
    %c0_4 = arith.constant 0 : index
    %4 = vector.load %arg3[%c0_2, %c0_3, %c0_4] : memref<2x8x32xbf16, #tpu.memory_space<vmem>>, vector<2x8x32xbf16>
    %5 = vector.shape_cast %4 : vector<2x8x32xbf16> to vector<16x32xbf16>
    %c0_5 = arith.constant 0 : index
    %c0_6 = arith.constant 0 : index
    %c0_7 = arith.constant 0 : index
    %6 = vector.load %arg4[%c0_5, %c0_6, %c0_7] : memref<2x8x8xbf16, #tpu.memory_space<vmem>>, vector<2x8x8xbf16>
    %c0_8 = arith.constant 0 : index
    %c0_9 = arith.constant 0 : index
    %c0_10 = arith.constant 0 : index
    %7 = vector.load %arg5[%c0_8, %c0_9, %c0_10] : memref<2x8x8xbf16, #tpu.memory_space<vmem>>, vector<2x8x8xbf16>
    %c0_11 = arith.constant 0 : index
    %c0_12 = arith.constant 0 : index
    %c0_13 = arith.constant 0 : index
    %8 = vector.load %arg6[%c0_11, %c0_12, %c0_13] : memref<1x32x96xbf16, #tpu.memory_space<vmem>>, vector<1x32x96xbf16>
    %9 = vector.shape_cast %8 : vector<1x32x96xbf16> to vector<32x96xbf16>
    %10 = arith.truncf %3 : vector<16x32xf32> to vector<16x32xbf16>
    %cst = arith.constant dense<0.000000e+00> : vector<16x96xf32>
    %11 = tpu.matmul %10, %9, %cst {dimension_numbers = #tpu.dot_dimension_numbers<[1], [0], [0], [1], [0, 0, 1, 1], [], []>} : vector<16x32xbf16>, vector<32x96xbf16>, vector<16x96xf32> -> vector<16x96xf32>
    %c0_14 = arith.constant 0 : index
    %c0_15 = arith.constant 0 : index
    %c0_16 = arith.constant 0 : index
    %12 = vector.load %arg7[%c0_14, %c0_15, %c0_16] : memref<1x1x96xf32, #tpu.memory_space<vmem>>, vector<1x1x96xf32>
    %13 = vector.shape_cast %12 : vector<1x1x96xf32> to vector<1x96xf32>
    %14 = vector.broadcast %13 : vector<1x96xf32> to vector<16x96xf32>
    %15 = arith.addf %11, %14 : vector<16x96xf32>
    %16 = vector.extract_strided_slice %15 {offsets = [0, 0], sizes = [16, 32], strides = [1, 1]} : vector<16x96xf32> to vector<16x32xf32>
    %17 = vector.extract_strided_slice %15 {offsets = [0, 32], sizes = [16, 32], strides = [1, 1]} : vector<16x96xf32> to vector<16x32xf32>
    %18 = vector.extract_strided_slice %15 {offsets = [0, 64], sizes = [16, 32], strides = [1, 1]} : vector<16x96xf32> to vector<16x32xf32>
    %19 = arith.truncf %16 : vector<16x32xf32> to vector<16x32xbf16>
    %20 = vector.shape_cast %19 : vector<16x32xbf16> to vector<2x8x4x8xbf16>
    %21 = tpu.transpose %20, [0, 2, 1, 3] : vector<2x8x4x8xbf16> -> vector<2x4x8x8xbf16>
    %22 = vector.shape_cast %21 : vector<2x4x8x8xbf16> to vector<8x8x8xbf16>
    %23 = arith.truncf %17 : vector<16x32xf32> to vector<16x32xbf16>
    %24 = vector.shape_cast %23 : vector<16x32xbf16> to vector<2x8x4x8xbf16>
    %25 = tpu.transpose %24, [0, 2, 1, 3] : vector<2x8x4x8xbf16> -> vector<2x4x8x8xbf16>
    %26 = vector.shape_cast %25 : vector<2x4x8x8xbf16> to vector<8x8x8xbf16>
    %27 = arith.truncf %18 : vector<16x32xf32> to vector<16x32xbf16>
    %28 = vector.shape_cast %27 : vector<16x32xbf16> to vector<2x8x4x8xbf16>
    %29 = tpu.transpose %28, [0, 2, 1, 3] : vector<2x8x4x8xbf16> -> vector<2x4x8x8xbf16>
    %30 = vector.shape_cast %29 : vector<2x4x8x8xbf16> to vector<8x8x8xbf16>
    "tpu.trace_start"() <{level = 10 : i32, message = "nqd,nkd->nqk"}> : () -> ()
    %cst_17 = arith.constant dense<0.000000e+00> : vector<8x8x8xf32>
    %31 = tpu.matmul %22, %26, %cst_17 {dimension_numbers = #tpu.dot_dimension_numbers<[2], [2], [1], [1], [0, 0, 0, 1, 1, 1], [0], [0]>} : vector<8x8x8xbf16>, vector<8x8x8xbf16>, vector<8x8x8xf32> -> vector<8x8x8xf32>
    "tpu.trace_stop"() : () -> ()
    %32 = vector.shape_cast %31 : vector<8x8x8xf32> to vector<2x4x8x8xf32>
    %33 = vector.shape_cast %6 : vector<2x8x8xbf16> to vector<2x1x8x8xbf16>
    %34 = arith.extf %33 : vector<2x1x8x8xbf16> to vector<2x1x8x8xf32>
    %35 = vector.broadcast %34 : vector<2x1x8x8xf32> to vector<2x4x8x8xf32>
    %36 = arith.addf %32, %35 : vector<2x4x8x8xf32>
    %cst_18 = arith.constant dense<0xFF800000> : vector<2x4x8xf32>
    %37 = vector.multi_reduction <maximumf>, %36, %cst_18 [3] : vector<2x4x8x8xf32> to vector<2x4x8xf32>
    %38 = vector.shape_cast %37 : vector<2x4x8xf32> to vector<2x4x8x1xf32>
    %39 = vector.broadcast %38 : vector<2x4x8x1xf32> to vector<2x4x8x8xf32>
    %40 = arith.subf %36, %39 : vector<2x4x8x8xf32>
    %41 = math.exp %40 : vector<2x4x8x8xf32>
    %cst_19 = arith.constant dense<0.000000e+00> : vector<2x4x8xf32>
    %42 = vector.multi_reduction <add>, %41, %cst_19 [3] : vector<2x4x8x8xf32> to vector<2x4x8xf32>
    %43 = vector.shape_cast %42 : vector<2x4x8xf32> to vector<2x4x8x1xf32>
    %44 = tpu.reciprocal %43 {approx = true} : vector<2x4x8x1xf32> -> vector<2x4x8x1xf32>
    %45 = vector.broadcast %44 : vector<2x4x8x1xf32> to vector<2x4x8x8xf32>
    %46 = arith.mulf %41, %45 : vector<2x4x8x8xf32>
    %47 = vector.shape_cast %46 : vector<2x4x8x8xf32> to vector<8x8x8xf32>
    %48 = arith.truncf %47 : vector<8x8x8xf32> to vector<8x8x8xbf16>
    "tpu.trace_start"() <{level = 10 : i32, message = "nqk,nkd->nqd"}> : () -> ()
    %cst_20 = arith.constant dense<0.000000e+00> : vector<8x8x8xf32>
    %49 = tpu.matmul %48, %30, %cst_20 {dimension_numbers = #tpu.dot_dimension_numbers<[2], [1], [1], [2], [0, 0, 0, 1, 1, 2], [0], [0]>} : vector<8x8x8xbf16>, vector<8x8x8xbf16>, vector<8x8x8xf32> -> vector<8x8x8xf32>
    "tpu.trace_stop"() : () -> ()
    %50 = vector.shape_cast %49 : vector<8x8x8xf32> to vector<2x4x8x8xf32>
    %51 = tpu.transpose %50, [0, 2, 1, 3] : vector<2x4x8x8xf32> -> vector<2x8x4x8xf32>
    %52 = vector.shape_cast %51 : vector<2x8x4x8xf32> to vector<16x32xf32>
    %c0_21 = arith.constant 0 : index
    %c0_22 = arith.constant 0 : index
    %c0_23 = arith.constant 0 : index
    %53 = vector.load %arg8[%c0_21, %c0_22, %c0_23] : memref<1x32x32xbf16, #tpu.memory_space<vmem>>, vector<1x32x32xbf16>
    %54 = vector.shape_cast %53 : vector<1x32x32xbf16> to vector<32x32xbf16>
    %55 = arith.truncf %52 : vector<16x32xf32> to vector<16x32xbf16>
    %cst_24 = arith.constant dense<0.000000e+00> : vector<16x32xf32>
    %56 = tpu.matmul %55, %54, %cst_24 {dimension_numbers = #tpu.dot_dimension_numbers<[1], [0], [0], [1], [0, 0, 1, 1], [], []>} : vector<16x32xbf16>, vector<32x32xbf16>, vector<16x32xf32> -> vector<16x32xf32>
    %c0_25 = arith.constant 0 : index
    %c0_26 = arith.constant 0 : index
    %c0_27 = arith.constant 0 : index
    %57 = vector.load %arg9[%c0_25, %c0_26, %c0_27] : memref<1x1x32xf32, #tpu.memory_space<vmem>>, vector<1x1x32xf32>
    %58 = vector.shape_cast %57 : vector<1x1x32xf32> to vector<1x32xf32>
    %59 = vector.broadcast %58 : vector<1x32xf32> to vector<16x32xf32>
    %60 = arith.addf %56, %59 : vector<16x32xf32>
    %61 = arith.addf %60, %3 : vector<16x32xf32>
    %c0_28 = arith.constant 0 : index
    %c0_29 = arith.constant 0 : index
    %c0_30 = arith.constant 0 : index
    %62 = vector.load %arg10[%c0_28, %c0_29, %c0_30] : memref<1x1x32xf32, #tpu.memory_space<vmem>>, vector<1x1x32xf32>
    %63 = vector.shape_cast %62 : vector<1x1x32xf32> to vector<1x32xf32>
    %c0_31 = arith.constant 0 : index
    %c0_32 = arith.constant 0 : index
    %c0_33 = arith.constant 0 : index
    %64 = vector.load %arg11[%c0_31, %c0_32, %c0_33] : memref<1x1x32xf32, #tpu.memory_space<vmem>>, vector<1x1x32xf32>
    %65 = vector.shape_cast %64 : vector<1x1x32xf32> to vector<1x32xf32>
    %cst_34 = arith.constant dense<0.000000e+00> : vector<16xf32>
    %66 = vector.multi_reduction <add>, %61, %cst_34 [1] : vector<16x32xf32> to vector<16xf32>
    %67 = vector.shape_cast %66 : vector<16xf32> to vector<16x1xf32>
    %cst_35 = arith.constant 3.200000e+01 : f32
    %68 = vector.broadcast %cst_35 : f32 to vector<16x1xf32>
    %69 = arith.divf %67, %68 : vector<16x1xf32>
    %70 = vector.broadcast %69 : vector<16x1xf32> to vector<16x32xf32>
    %71 = arith.subf %61, %70 : vector<16x32xf32>
    %72 = arith.mulf %71, %71 : vector<16x32xf32>
    %cst_36 = arith.constant dense<0.000000e+00> : vector<16xf32>
    %73 = vector.multi_reduction <add>, %72, %cst_36 [1] : vector<16x32xf32> to vector<16xf32>
    %74 = vector.shape_cast %73 : vector<16xf32> to vector<16x1xf32>
    %cst_37 = arith.constant 3.200000e+01 : f32
    %75 = vector.broadcast %cst_37 : f32 to vector<16x1xf32>
    %76 = arith.divf %74, %75 : vector<16x1xf32>
    %cst_38 = arith.constant 9.99999997E-7 : f32
    %77 = vector.broadcast %cst_38 : f32 to vector<16x1xf32>
    %78 = arith.addf %76, %77 : vector<16x1xf32>
    %79 = math.rsqrt %78 : vector<16x1xf32>
    %80 = vector.broadcast %79 : vector<16x1xf32> to vector<16x32xf32>
    %81 = arith.mulf %71, %80 : vector<16x32xf32>
    %82 = vector.broadcast %63 : vector<1x32xf32> to vector<16x32xf32>
    %83 = arith.mulf %81, %82 : vector<16x32xf32>
    %84 = vector.broadcast %65 : vector<1x32xf32> to vector<16x32xf32>
    %85 = arith.addf %83, %84 : vector<16x32xf32>
    %c0_39 = arith.constant 0 : index
    %c0_40 = arith.constant 0 : index
    %c0_41 = arith.constant 0 : index
    %86 = vector.load %arg12[%c0_39, %c0_40, %c0_41] : memref<1x32x32xbf16, #tpu.memory_space<vmem>>, vector<1x32x32xbf16>
    %87 = vector.shape_cast %86 : vector<1x32x32xbf16> to vector<32x32xbf16>
    %88 = arith.truncf %85 : vector<16x32xf32> to vector<16x32xbf16>
    %cst_42 = arith.constant dense<0.000000e+00> : vector<16x32xf32>
    %89 = tpu.matmul %88, %87, %cst_42 {dimension_numbers = #tpu.dot_dimension_numbers<[1], [0], [0], [1], [0, 0, 1, 1], [], []>} : vector<16x32xbf16>, vector<32x32xbf16>, vector<16x32xf32> -> vector<16x32xf32>
    %c0_43 = arith.constant 0 : index
    %c0_44 = arith.constant 0 : index
    %c0_45 = arith.constant 0 : index
    %90 = vector.load %arg13[%c0_43, %c0_44, %c0_45] : memref<1x1x32xf32, #tpu.memory_space<vmem>>, vector<1x1x32xf32>
    %91 = vector.shape_cast %90 : vector<1x1x32xf32> to vector<1x32xf32>
    %92 = vector.broadcast %91 : vector<1x32xf32> to vector<16x32xf32>
    %93 = arith.addf %89, %92 : vector<16x32xf32>
    %c0_46 = arith.constant 0 : index
    %c0_47 = arith.constant 0 : index
    %c0_48 = arith.constant 0 : index
    %94 = vector.load %arg14[%c0_46, %c0_47, %c0_48] : memref<1x32x64xbf16, #tpu.memory_space<vmem>>, vector<1x32x64xbf16>
    %95 = vector.shape_cast %94 : vector<1x32x64xbf16> to vector<32x64xbf16>
    %cst_49 = arith.constant dense<0.000000e+00> : vector<16x64xf32>
    %96 = tpu.matmul %5, %95, %cst_49 {dimension_numbers = #tpu.dot_dimension_numbers<[1], [0], [0], [1], [0, 0, 1, 1], [], []>} : vector<16x32xbf16>, vector<32x64xbf16>, vector<16x64xf32> -> vector<16x64xf32>
    %c0_50 = arith.constant 0 : index
    %c0_51 = arith.constant 0 : index
    %c0_52 = arith.constant 0 : index
    %97 = vector.load %arg15[%c0_50, %c0_51, %c0_52] : memref<1x1x64xf32, #tpu.memory_space<vmem>>, vector<1x1x64xf32>
    %98 = vector.shape_cast %97 : vector<1x1x64xf32> to vector<1x64xf32>
    %99 = vector.broadcast %98 : vector<1x64xf32> to vector<16x64xf32>
    %100 = arith.addf %96, %99 : vector<16x64xf32>
    %101 = vector.extract_strided_slice %100 {offsets = [0, 0], sizes = [16, 32], strides = [1, 1]} : vector<16x64xf32> to vector<16x32xf32>
    %102 = vector.extract_strided_slice %100 {offsets = [0, 32], sizes = [16, 32], strides = [1, 1]} : vector<16x64xf32> to vector<16x32xf32>
    %103 = arith.truncf %93 : vector<16x32xf32> to vector<16x32xbf16>
    %104 = vector.shape_cast %103 : vector<16x32xbf16> to vector<2x8x4x8xbf16>
    %105 = tpu.transpose %104, [0, 2, 1, 3] : vector<2x8x4x8xbf16> -> vector<2x4x8x8xbf16>
    %106 = vector.shape_cast %105 : vector<2x4x8x8xbf16> to vector<8x8x8xbf16>
    %107 = arith.truncf %101 : vector<16x32xf32> to vector<16x32xbf16>
    %108 = vector.shape_cast %107 : vector<16x32xbf16> to vector<2x8x4x8xbf16>
    %109 = tpu.transpose %108, [0, 2, 1, 3] : vector<2x8x4x8xbf16> -> vector<2x4x8x8xbf16>
    %110 = vector.shape_cast %109 : vector<2x4x8x8xbf16> to vector<8x8x8xbf16>
    %111 = arith.truncf %102 : vector<16x32xf32> to vector<16x32xbf16>
    %112 = vector.shape_cast %111 : vector<16x32xbf16> to vector<2x8x4x8xbf16>
    %113 = tpu.transpose %112, [0, 2, 1, 3] : vector<2x8x4x8xbf16> -> vector<2x4x8x8xbf16>
    %114 = vector.shape_cast %113 : vector<2x4x8x8xbf16> to vector<8x8x8xbf16>
    "tpu.trace_start"() <{level = 10 : i32, message = "nqd,nkd->nqk"}> : () -> ()
    %cst_53 = arith.constant dense<0.000000e+00> : vector<8x8x8xf32>
    %115 = tpu.matmul %106, %110, %cst_53 {dimension_numbers = #tpu.dot_dimension_numbers<[2], [2], [1], [1], [0, 0, 0, 1, 1, 1], [0], [0]>} : vector<8x8x8xbf16>, vector<8x8x8xbf16>, vector<8x8x8xf32> -> vector<8x8x8xf32>
    "tpu.trace_stop"() : () -> ()
    %116 = vector.shape_cast %115 : vector<8x8x8xf32> to vector<2x4x8x8xf32>
    %117 = vector.shape_cast %7 : vector<2x8x8xbf16> to vector<2x1x8x8xbf16>
    %118 = arith.extf %117 : vector<2x1x8x8xbf16> to vector<2x1x8x8xf32>
    %119 = vector.broadcast %118 : vector<2x1x8x8xf32> to vector<2x4x8x8xf32>
    %120 = arith.addf %116, %119 : vector<2x4x8x8xf32>
    %cst_54 = arith.constant dense<0xFF800000> : vector<2x4x8xf32>
    %121 = vector.multi_reduction <maximumf>, %120, %cst_54 [3] : vector<2x4x8x8xf32> to vector<2x4x8xf32>
    %122 = vector.shape_cast %121 : vector<2x4x8xf32> to vector<2x4x8x1xf32>
    %123 = vector.broadcast %122 : vector<2x4x8x1xf32> to vector<2x4x8x8xf32>
    %124 = arith.subf %120, %123 : vector<2x4x8x8xf32>
    %125 = math.exp %124 : vector<2x4x8x8xf32>
    %cst_55 = arith.constant dense<0.000000e+00> : vector<2x4x8xf32>
    %126 = vector.multi_reduction <add>, %125, %cst_55 [3] : vector<2x4x8x8xf32> to vector<2x4x8xf32>
    %127 = vector.shape_cast %126 : vector<2x4x8xf32> to vector<2x4x8x1xf32>
    %128 = tpu.reciprocal %127 {approx = true} : vector<2x4x8x1xf32> -> vector<2x4x8x1xf32>
    %129 = vector.broadcast %128 : vector<2x4x8x1xf32> to vector<2x4x8x8xf32>
    %130 = arith.mulf %125, %129 : vector<2x4x8x8xf32>
    %131 = vector.shape_cast %130 : vector<2x4x8x8xf32> to vector<8x8x8xf32>
    %132 = arith.truncf %131 : vector<8x8x8xf32> to vector<8x8x8xbf16>
    "tpu.trace_start"() <{level = 10 : i32, message = "nqk,nkd->nqd"}> : () -> ()
    %cst_56 = arith.constant dense<0.000000e+00> : vector<8x8x8xf32>
    %133 = tpu.matmul %132, %114, %cst_56 {dimension_numbers = #tpu.dot_dimension_numbers<[2], [1], [1], [2], [0, 0, 0, 1, 1, 2], [0], [0]>} : vector<8x8x8xbf16>, vector<8x8x8xbf16>, vector<8x8x8xf32> -> vector<8x8x8xf32>
    "tpu.trace_stop"() : () -> ()
    %134 = vector.shape_cast %133 : vector<8x8x8xf32> to vector<2x4x8x8xf32>
    %135 = tpu.transpose %134, [0, 2, 1, 3] : vector<2x4x8x8xf32> -> vector<2x8x4x8xf32>
    %136 = vector.shape_cast %135 : vector<2x8x4x8xf32> to vector<16x32xf32>
    %c0_57 = arith.constant 0 : index
    %c0_58 = arith.constant 0 : index
    %c0_59 = arith.constant 0 : index
    %137 = vector.load %arg16[%c0_57, %c0_58, %c0_59] : memref<1x32x32xbf16, #tpu.memory_space<vmem>>, vector<1x32x32xbf16>
    %138 = vector.shape_cast %137 : vector<1x32x32xbf16> to vector<32x32xbf16>
    %139 = arith.truncf %136 : vector<16x32xf32> to vector<16x32xbf16>
    %cst_60 = arith.constant dense<0.000000e+00> : vector<16x32xf32>
    %140 = tpu.matmul %139, %138, %cst_60 {dimension_numbers = #tpu.dot_dimension_numbers<[1], [0], [0], [1], [0, 0, 1, 1], [], []>} : vector<16x32xbf16>, vector<32x32xbf16>, vector<16x32xf32> -> vector<16x32xf32>
    %c0_61 = arith.constant 0 : index
    %c0_62 = arith.constant 0 : index
    %c0_63 = arith.constant 0 : index
    %141 = vector.load %arg17[%c0_61, %c0_62, %c0_63] : memref<1x1x32xf32, #tpu.memory_space<vmem>>, vector<1x1x32xf32>
    %142 = vector.shape_cast %141 : vector<1x1x32xf32> to vector<1x32xf32>
    %143 = vector.broadcast %142 : vector<1x32xf32> to vector<16x32xf32>
    %144 = arith.addf %140, %143 : vector<16x32xf32>
    %145 = arith.addf %144, %85 : vector<16x32xf32>
    %c0_64 = arith.constant 0 : index
    %c0_65 = arith.constant 0 : index
    %c0_66 = arith.constant 0 : index
    %146 = vector.load %arg18[%c0_64, %c0_65, %c0_66] : memref<1x1x32xf32, #tpu.memory_space<vmem>>, vector<1x1x32xf32>
    %147 = vector.shape_cast %146 : vector<1x1x32xf32> to vector<1x32xf32>
    %c0_67 = arith.constant 0 : index
    %c0_68 = arith.constant 0 : index
    %c0_69 = arith.constant 0 : index
    %148 = vector.load %arg19[%c0_67, %c0_68, %c0_69] : memref<1x1x32xf32, #tpu.memory_space<vmem>>, vector<1x1x32xf32>
    %149 = vector.shape_cast %148 : vector<1x1x32xf32> to vector<1x32xf32>
    %cst_70 = arith.constant dense<0.000000e+00> : vector<16xf32>
    %150 = vector.multi_reduction <add>, %145, %cst_70 [1] : vector<16x32xf32> to vector<16xf32>
    %151 = vector.shape_cast %150 : vector<16xf32> to vector<16x1xf32>
    %cst_71 = arith.constant 3.200000e+01 : f32
    %152 = vector.broadcast %cst_71 : f32 to vector<16x1xf32>
    %153 = arith.divf %151, %152 : vector<16x1xf32>
    %154 = vector.broadcast %153 : vector<16x1xf32> to vector<16x32xf32>
    %155 = arith.subf %145, %154 : vector<16x32xf32>
    %156 = arith.mulf %155, %155 : vector<16x32xf32>
    %cst_72 = arith.constant dense<0.000000e+00> : vector<16xf32>
    %157 = vector.multi_reduction <add>, %156, %cst_72 [1] : vector<16x32xf32> to vector<16xf32>
    %158 = vector.shape_cast %157 : vector<16xf32> to vector<16x1xf32>
    %cst_73 = arith.constant 3.200000e+01 : f32
    %159 = vector.broadcast %cst_73 : f32 to vector<16x1xf32>
    %160 = arith.divf %158, %159 : vector<16x1xf32>
    %cst_74 = arith.constant 9.99999997E-7 : f32
    %161 = vector.broadcast %cst_74 : f32 to vector<16x1xf32>
    %162 = arith.addf %160, %161 : vector<16x1xf32>
    %163 = math.rsqrt %162 : vector<16x1xf32>
    %164 = vector.broadcast %163 : vector<16x1xf32> to vector<16x32xf32>
    %165 = arith.mulf %155, %164 : vector<16x32xf32>
    %166 = vector.broadcast %147 : vector<1x32xf32> to vector<16x32xf32>
    %167 = arith.mulf %165, %166 : vector<16x32xf32>
    %168 = vector.broadcast %149 : vector<1x32xf32> to vector<16x32xf32>
    %169 = arith.addf %167, %168 : vector<16x32xf32>
    %c0_75 = arith.constant 0 : index
    %c0_76 = arith.constant 0 : index
    %c0_77 = arith.constant 0 : index
    %170 = vector.load %arg20[%c0_75, %c0_76, %c0_77] : memref<1x32x64xbf16, #tpu.memory_space<vmem>>, vector<1x32x64xbf16>
    %171 = vector.shape_cast %170 : vector<1x32x64xbf16> to vector<32x64xbf16>
    %172 = arith.truncf %169 : vector<16x32xf32> to vector<16x32xbf16>
    %cst_78 = arith.constant dense<0.000000e+00> : vector<16x64xf32>
    %173 = tpu.matmul %172, %171, %cst_78 {dimension_numbers = #tpu.dot_dimension_numbers<[1], [0], [0], [1], [0, 0, 1, 1], [], []>} : vector<16x32xbf16>, vector<32x64xbf16>, vector<16x64xf32> -> vector<16x64xf32>
    %c0_79 = arith.constant 0 : index
    %c0_80 = arith.constant 0 : index
    %c0_81 = arith.constant 0 : index
    %174 = vector.load %arg21[%c0_79, %c0_80, %c0_81] : memref<1x1x64xf32, #tpu.memory_space<vmem>>, vector<1x1x64xf32>
    %175 = vector.shape_cast %174 : vector<1x1x64xf32> to vector<1x64xf32>
    %176 = vector.broadcast %175 : vector<1x64xf32> to vector<16x64xf32>
    %177 = arith.addf %173, %176 : vector<16x64xf32>
    %cst_82 = arith.constant 0.000000e+00 : f32
    %178 = vector.broadcast %cst_82 : f32 to vector<16x64xf32>
    %179 = arith.maximumf %177, %178 : vector<16x64xf32>
    %c0_83 = arith.constant 0 : index
    %c0_84 = arith.constant 0 : index
    %c0_85 = arith.constant 0 : index
    %180 = vector.load %arg22[%c0_83, %c0_84, %c0_85] : memref<1x64x32xbf16, #tpu.memory_space<vmem>>, vector<1x64x32xbf16>
    %181 = vector.shape_cast %180 : vector<1x64x32xbf16> to vector<64x32xbf16>
    %182 = arith.truncf %179 : vector<16x64xf32> to vector<16x64xbf16>
    %cst_86 = arith.constant dense<0.000000e+00> : vector<16x32xf32>
    %183 = tpu.matmul %182, %181, %cst_86 {dimension_numbers = #tpu.dot_dimension_numbers<[1], [0], [0], [1], [0, 0, 1, 1], [], []>} : vector<16x64xbf16>, vector<64x32xbf16>, vector<16x32xf32> -> vector<16x32xf32>
    %c0_87 = arith.constant 0 : index
    %c0_88 = arith.constant 0 : index
    %c0_89 = arith.constant 0 : index
    %184 = vector.load %arg23[%c0_87, %c0_88, %c0_89] : memref<1x1x32xf32, #tpu.memory_space<vmem>>, vector<1x1x32xf32>
    %185 = vector.shape_cast %184 : vector<1x1x32xf32> to vector<1x32xf32>
    %186 = vector.broadcast %185 : vector<1x32xf32> to vector<16x32xf32>
    %187 = arith.addf %183, %186 : vector<16x32xf32>
    %188 = arith.addf %187, %169 : vector<16x32xf32>
    %c0_90 = arith.constant 0 : index
    %c0_91 = arith.constant 0 : index
    %c0_92 = arith.constant 0 : index
    %189 = vector.load %arg24[%c0_90, %c0_91, %c0_92] : memref<1x1x32xf32, #tpu.memory_space<vmem>>, vector<1x1x32xf32>
    %190 = vector.shape_cast %189 : vector<1x1x32xf32> to vector<1x32xf32>
    %c0_93 = arith.constant 0 : index
    %c0_94 = arith.constant 0 : index
    %c0_95 = arith.constant 0 : index
    %191 = vector.load %arg25[%c0_93, %c0_94, %c0_95] : memref<1x1x32xf32, #tpu.memory_space<vmem>>, vector<1x1x32xf32>
    %192 = vector.shape_cast %191 : vector<1x1x32xf32> to vector<1x32xf32>
    %cst_96 = arith.constant dense<0.000000e+00> : vector<16xf32>
    %193 = vector.multi_reduction <add>, %188, %cst_96 [1] : vector<16x32xf32> to vector<16xf32>
    %194 = vector.shape_cast %193 : vector<16xf32> to vector<16x1xf32>
    %cst_97 = arith.constant 3.200000e+01 : f32
    %195 = vector.broadcast %cst_97 : f32 to vector<16x1xf32>
    %196 = arith.divf %194, %195 : vector<16x1xf32>
    %197 = vector.broadcast %196 : vector<16x1xf32> to vector<16x32xf32>
    %198 = arith.subf %188, %197 : vector<16x32xf32>
    %199 = arith.mulf %198, %198 : vector<16x32xf32>
    %cst_98 = arith.constant dense<0.000000e+00> : vector<16xf32>
    %200 = vector.multi_reduction <add>, %199, %cst_98 [1] : vector<16x32xf32> to vector<16xf32>
    %201 = vector.shape_cast %200 : vector<16xf32> to vector<16x1xf32>
    %cst_99 = arith.constant 3.200000e+01 : f32
    %202 = vector.broadcast %cst_99 : f32 to vector<16x1xf32>
    %203 = arith.divf %201, %202 : vector<16x1xf32>
    %cst_100 = arith.constant 9.99999997E-7 : f32
    %204 = vector.broadcast %cst_100 : f32 to vector<16x1xf32>
    %205 = arith.addf %203, %204 : vector<16x1xf32>
    %206 = math.rsqrt %205 : vector<16x1xf32>
    %207 = vector.broadcast %206 : vector<16x1xf32> to vector<16x32xf32>
    %208 = arith.mulf %198, %207 : vector<16x32xf32>
    %209 = vector.broadcast %190 : vector<1x32xf32> to vector<16x32xf32>
    %210 = arith.mulf %208, %209 : vector<16x32xf32>
    %211 = vector.broadcast %192 : vector<1x32xf32> to vector<16x32xf32>
    %212 = arith.addf %210, %211 : vector<16x32xf32>
    %c0_101 = arith.constant 0 : index
    %c0_102 = arith.constant 0 : index
    %213 = vector.load %arg27[%c0_101, %c0_102] : memref<16x32xf32, #tpu.memory_space<vmem>>, vector<16x32xf32>
    tpu.vector_store %arg27[%c0_101, %c0_102], %212 {strides = array<i32>} : memref<16x32xf32, #tpu.memory_space<vmem>>, vector<16x32xf32>,
    %c1_i32 = arith.constant 1 : i32
    %214 = arith.cmpi eq, %arg1, %c1_i32 : i32
    %215 = arith.extui %214 : i1 to i32
    %c0_i32_103 = arith.constant 0 : i32
    %216 = arith.cmpi ne, %215, %c0_i32_103 : i32
    scf.if %216 {
      %217 = vector.shape_cast %212 : vector<16x32xf32> to vector<2x8x32xf32>
      %218 = arith.truncf %217 : vector<2x8x32xf32> to vector<2x8x32xbf16>
      %c0_104 = arith.constant 0 : index
      %c0_105 = arith.constant 0 : index
      %c0_106 = arith.constant 0 : index
      %219 = vector.load %arg26[%c0_104, %c0_105, %c0_106] : memref<2x8x32xbf16, #tpu.memory_space<vmem>>, vector<2x8x32xbf16>
      tpu.vector_store %arg26[%c0_104, %c0_105, %c0_106], %218 {strides = array<i32>} : memref<2x8x32xbf16, #tpu.memory_space<vmem>>, vector<2x8x32xbf16>,
    } else {
    }
    return
  }
  func.func @transform_0(%arg0: i32, %arg1: i32) -> (i32, i32, i32) {
    %c0_i32 = arith.constant 0 : i32
    %c0_i32_0 = arith.constant 0 : i32
    %c0_i32_1 = arith.constant 0 : i32
    return %arg0, %c0_i32, %c0_i32_0 : i32, i32, i32
  }
  func.func @transform_1(%arg0: i32, %arg1: i32) -> (i32, i32, i32) {
    %c0_i32 = arith.constant 0 : i32
    %c0_i32_0 = arith.constant 0 : i32
    %c0_i32_1 = arith.constant 0 : i32
    return %arg0, %c0_i32, %c0_i32_0 : i32, i32, i32
  }
  func.func @transform_2(%arg0: i32, %arg1: i32) -> (i32, i32, i32) {
    %c0_i32 = arith.constant 0 : i32
    %c0_i32_0 = arith.constant 0 : i32
    %c0_i32_1 = arith.constant 0 : i32
    return %arg0, %c0_i32, %c0_i32_0 : i32, i32, i32
  }
  func.func @transform_3(%arg0: i32, %arg1: i32) -> (i32, i32, i32) {
    %c0_i32 = arith.constant 0 : i32
    %c0_i32_0 = arith.constant 0 : i32
    %c0_i32_1 = arith.constant 0 : i32
    return %arg0, %c0_i32, %c0_i32_0 : i32, i32, i32
  }
  func.func @transform_4(%arg0: i32, %arg1: i32) -> (i32, i32, i32) {
    %c0_i32 = arith.constant 0 : i32
    %c0_i32_0 = arith.constant 0 : i32
    %c0_i32_1 = arith.constant 0 : i32
    return %arg1, %c0_i32, %c0_i32_0 : i32, i32, i32
  }
  func.func @transform_5(%arg0: i32, %arg1: i32) -> (i32, i32, i32) {
    %c0_i32 = arith.constant 0 : i32
    %c0_i32_0 = arith.constant 0 : i32
    %c0_i32_1 = arith.constant 0 : i32
    return %arg1, %c0_i32, %c0_i32_0 : i32, i32, i32
  }
  func.func @transform_6(%arg0: i32, %arg1: i32) -> (i32, i32, i32) {
    %c0_i32 = arith.constant 0 : i32
    %c0_i32_0 = arith.constant 0 : i32
    %c0_i32_1 = arith.constant 0 : i32
    return %arg1, %c0_i32, %c0_i32_0 : i32, i32, i32
  }
  func.func @transform_7(%arg0: i32, %arg1: i32) -> (i32, i32, i32) {
    %c0_i32 = arith.constant 0 : i32
    %c0_i32_0 = arith.constant 0 : i32
    %c0_i32_1 = arith.constant 0 : i32
    return %arg1, %c0_i32, %c0_i32_0 : i32, i32, i32
  }
  func.func @transform_8(%arg0: i32, %arg1: i32) -> (i32, i32, i32) {
    %c0_i32 = arith.constant 0 : i32
    %c0_i32_0 = arith.constant 0 : i32
    %c0_i32_1 = arith.constant 0 : i32
    return %arg1, %c0_i32, %c0_i32_0 : i32, i32, i32
  }
  func.func @transform_9(%arg0: i32, %arg1: i32) -> (i32, i32, i32) {
    %c0_i32 = arith.constant 0 : i32
    %c0_i32_0 = arith.constant 0 : i32
    %c0_i32_1 = arith.constant 0 : i32
    return %arg1, %c0_i32, %c0_i32_0 : i32, i32, i32
  }
  func.func @transform_10(%arg0: i32, %arg1: i32) -> (i32, i32, i32) {
    %c0_i32 = arith.constant 0 : i32
    %c0_i32_0 = arith.constant 0 : i32
    %c0_i32_1 = arith.constant 0 : i32
    return %arg1, %c0_i32, %c0_i32_0 : i32, i32, i32
  }
  func.func @transform_11(%arg0: i32, %arg1: i32) -> (i32, i32, i32) {
    %c0_i32 = arith.constant 0 : i32
    %c0_i32_0 = arith.constant 0 : i32
    %c0_i32_1 = arith.constant 0 : i32
    return %arg1, %c0_i32, %c0_i32_0 : i32, i32, i32
  }
  func.func @transform_12(%arg0: i32, %arg1: i32) -> (i32, i32, i32) {
    %c0_i32 = arith.constant 0 : i32
    %c0_i32_0 = arith.constant 0 : i32
    %c0_i32_1 = arith.constant 0 : i32
    return %arg1, %c0_i32, %c0_i32_0 : i32, i32, i32
  }
  func.func @transform_13(%arg0: i32, %arg1: i32) -> (i32, i32, i32) {
    %c0_i32 = arith.constant 0 : i32
    %c0_i32_0 = arith.constant 0 : i32
    %c0_i32_1 = arith.constant 0 : i32
    return %arg1, %c0_i32, %c0_i32_0 : i32, i32, i32
  }
  func.func @transform_14(%arg0: i32, %arg1: i32) -> (i32, i32, i32) {
    %c0_i32 = arith.constant 0 : i32
    %c0_i32_0 = arith.constant 0 : i32
    %c0_i32_1 = arith.constant 0 : i32
    return %arg1, %c0_i32, %c0_i32_0 : i32, i32, i32
  }
  func.func @transform_15(%arg0: i32, %arg1: i32) -> (i32, i32, i32) {
    %c0_i32 = arith.constant 0 : i32
    %c0_i32_0 = arith.constant 0 : i32
    %c0_i32_1 = arith.constant 0 : i32
    return %arg1, %c0_i32, %c0_i32_0 : i32, i32, i32
  }
  func.func @transform_16(%arg0: i32, %arg1: i32) -> (i32, i32, i32) {
    %c0_i32 = arith.constant 0 : i32
    %c0_i32_0 = arith.constant 0 : i32
    %c0_i32_1 = arith.constant 0 : i32
    return %arg1, %c0_i32, %c0_i32_0 : i32, i32, i32
  }
  func.func @transform_17(%arg0: i32, %arg1: i32) -> (i32, i32, i32) {
    %c0_i32 = arith.constant 0 : i32
    %c0_i32_0 = arith.constant 0 : i32
    %c0_i32_1 = arith.constant 0 : i32
    return %arg1, %c0_i32, %c0_i32_0 : i32, i32, i32
  }
  func.func @transform_18(%arg0: i32, %arg1: i32) -> (i32, i32, i32) {
    %c0_i32 = arith.constant 0 : i32
    %c0_i32_0 = arith.constant 0 : i32
    %c0_i32_1 = arith.constant 0 : i32
    return %arg1, %c0_i32, %c0_i32_0 : i32, i32, i32
  }
  func.func @transform_19(%arg0: i32, %arg1: i32) -> (i32, i32, i32) {
    %c0_i32 = arith.constant 0 : i32
    %c0_i32_0 = arith.constant 0 : i32
    %c0_i32_1 = arith.constant 0 : i32
    return %arg1, %c0_i32, %c0_i32_0 : i32, i32, i32
  }
  func.func @transform_20(%arg0: i32, %arg1: i32) -> (i32, i32, i32) {
    %c0_i32 = arith.constant 0 : i32
    %c0_i32_0 = arith.constant 0 : i32
    %c0_i32_1 = arith.constant 0 : i32
    return %arg1, %c0_i32, %c0_i32_0 : i32, i32, i32
  }
  func.func @transform_21(%arg0: i32, %arg1: i32) -> (i32, i32, i32) {
    %c0_i32 = arith.constant 0 : i32
    %c0_i32_0 = arith.constant 0 : i32
    %c0_i32_1 = arith.constant 0 : i32
    return %arg1, %c0_i32, %c0_i32_0 : i32, i32, i32
  }
  func.func @transform_22(%arg0: i32, %arg1: i32) -> (i32, i32, i32) {
    %c0_i32 = arith.constant 0 : i32
    %c0_i32_0 = arith.constant 0 : i32
    %c0_i32_1 = arith.constant 0 : i32
    return %arg1, %c0_i32, %c0_i32_0 : i32, i32, i32
  }
  func.func @transform_23(%arg0: i32, %arg1: i32) -> (i32, i32, i32) {
    %c0_i32 = arith.constant 0 : i32
    %c0_i32_0 = arith.constant 0 : i32
    %c0_i32_1 = arith.constant 0 : i32
    return %arg1, %c0_i32, %c0_i32_0 : i32, i32, i32
  }
  func.func @transform_24(%arg0: i32, %arg1: i32) -> (i32, i32, i32) {
    %c0_i32 = arith.constant 0 : i32
    %c0_i32_0 = arith.constant 0 : i32
    %c0_i32_1 = arith.constant 0 : i32
    return %arg0, %c0_i32, %c0_i32_0 : i32, i32, i32
  }
}

</mosaic_0001>

<bundles_post_ra>
// kernel: decoder_forward.3
= control target key start
LH: loop header
LB: loop body
LE: loop exit
PB: predicated region body
PF: predicated region fallthrough
CT: control target
= control target key end

     0   :  { %v157_v1 = vmov 0.0   ;;  %vm158_vm0 = vmmov 0   ;;  %s206_s0 = inlined_call_operand.vmem [shape: bf16[16,32], index: 0, kind: input, shape index: {}]   ;;  %s207_s1 = inlined_call_operand.vmem [shape: bf16[32,128], index: 1, kind: input, shape index: {}]   ;;  %s208_s2 = inlined_call_operand.vmem [shape: f32[1,128], index: 2, kind: input, shape index: {}]   ;;  %s209_s3 = inlined_call_operand.hbm [shape: f32[16,128], index: 3, kind: output, shape index: {}]  }
   0x1   :  { %v130_v0 = vld [vmem:[%s207_s1] sm:$0xff]   ;;  %117 = vmatprep.subr.bf16.mxu0 %v157_v1  ;;  %v131_v2 = vld [vmem:[%s207_s1 + $0x8] sm:$0xff]   ;;  %121 = vmatprep.mubr.msk.bf16.mxu0 %vm158_vm0, %v157_v1 }
   0x2   :  { %118 = vmatpush3.bf16.msra.mxu0 %v130_v0 }
   0x3   :  { %119 = vmatprep.subr.bf16.mxu0 %v157_v1 }
   0x4   :  { %8 = vsyncpa [#allocation3], 0  ;;  %v132_v3 = vld [vmem:[%s206_s0] sm:$0xff]   ;;  %vm46_vm1 = vcmask 261120   ;;  %s159_s20 = smov [#allocation2]  }
   0x5   :  { %v109_v4 = vld [vmem:[%s208_s2] ss:$0 sm:$0xff]  ;;  %s98_s21 = sshll.u32 %s159_s20, 4  ;;  %s99_s21 = int_to_ptr.vmem [resolvable:$true] %s98_s21 }
   0x6   :  { %120 = vmatpush3.bf16.msra.mxu0 %v131_v2  ;;  %s133_s1 = scalar_lea.vmem %s99_s21, 256  ;;  %p138_p1 = scmp.lt.s32.totalorder %s99_s21, %s99_s21 }
   0x7   :  { %p134_p0 = scmp.ne.s32.totalorder %s99_s21, %s133_s1  ;;  %p139_p2 = scmp.lt.s32.totalorder %s133_s1, %s133_s1 }
   0x9   :  { %122 = vmatmul.mubr.msk.bf16.vlgmr.msra.gmra.mrb[0].mxu0 %vm46_vm1, %v132_v3  ;;  %p140_p3 = por %p139_p2, %p138_p1 }
   0xb   :  { %p141_p4 = pnand %p140_p3, %p134_p0 }
  0xdc   :  { %v84_v5 = vpop.f32.mrb[0].mxu0 }
  0xdd   :  { %v85_v6 = vadd.f32 %v109_v4, %v84_v5  ;;  %v123_v7 = vpop.f32.mrb[1].mxu0 }
  0xde   :  { %v87_v8 = vpop.f32.mrb[2].mxu0 }
  0xdf   :  { %91 = vst [vmem:[#allocation2] sm:$0xff] %v85_v6  ;;  %v88_v9 = vadd.f32 %v109_v4, %v87_v8  ;;  %v124_v10 = vpop.f32.mrb[3].mxu0 }
  0xe1   :  { %92 = vst [vmem:[#allocation2 + $0x8] sm:$0xff] %v88_v9 }
  0xe2   :  { %144 = shalt.err (!%p141_p4)
}
  0xe3   :  { %s145_s22 = scalar_lea.hbm %s209_s3, 256 }
  0xe4   :  { %p146_p5 = scmp.ne.s32.totalorder %s209_s3, %s145_s22  ;;  %p149_p6 = scmp.lt.u32.totalorder %s145_s22, %s209_s3 }
  0xe6   :  { %p151_p7 = pnand %p149_p6, %p146_p5 }
  0xe8   :  { %154 = shalt.err (!%p151_p7)
}
  0xe9   :  { %s160_s27 = smov 128   ;;  %s161_s28 = smov 8  }
  0xea   :  { %104 = dma.vmem_to_hbm [thread:$0]  %s99_s21, 256, %s209_s3, [#allocation3], %s160_s27, %s160_s27, %s161_s28  }
  0xeb   :  { %155 = dma.done.wait [#allocation3], 256  }
  0xec   :  { %156 = vsyncadd [#allocation3], 4294967040 }
  0xed   :  { %108 = vsyncpa [#allocation3], 1 }

// kernel: decoder_forward.2
= control target key start
LH: loop header
LB: loop body
LE: loop exit
PB: predicated region body
PF: predicated region fallthrough
CT: control target
= control target key end

     0   :  { %s6907_s26 = smov 0   ;;  %s6909_s27 = smov 0   ;;  %s7934_s0 = inlined_call_operand.vmem [shape: f32[2,8,32], index: 0, kind: input, shape index: {}]   ;;  %s7935_s1 = inlined_call_operand.vmem [shape: bf16[2,8,32], index: 1, kind: input, shape index: {}]   ;;  %s7936_s2 = inlined_call_operand.vmem [shape: bf16[2,8,8], index: 2, kind: input, shape index: {}]   ;;  %s7937_s3 = inlined_call_operand.vmem [shape: bf16[2,8,8], index: 3, kind: input, shape index: {}]   ;;  %s7938_s4 = inlined_call_operand.vmem [shape: bf16[2,32,96], index: 4, kind: input, shape index: {}]   ;;  %s7939_s5 = inlined_call_operand.vmem [shape: f32[2,1,96], index: 5, kind: input, shape index: {}]   ;;  %s7940_s6 = inlined_call_operand.vmem [shape: bf16[2,32,32], index: 6, kind: input, shape index: {}]   ;;  %s7941_s7 = inlined_call_operand.vmem [shape: f32[2,1,32], index: 7, kind: input, shape index: {}]   ;;  %s7942_s8 = inlined_call_operand.vmem [shape: f32[2,1,32], index: 8, kind: input, shape index: {}]   ;;  %s7943_s9 = inlined_call_operand.vmem [shape: f32[2,1,32], index: 9, kind: input, shape index: {}]   ;;  %s7944_s10 = inlined_call_operand.vmem [shape: bf16[2,32,32], index: 10, kind: input, shape index: {}]   ;;  %s7945_s11 = inlined_call_operand.vmem [shape: f32[2,1,32], index: 11, kind: input, shape index: {}]   ;;  %s7946_s12 = inlined_call_operand.vmem [shape: bf16[2,32,64], index: 12, kind: input, shape index: {}]   ;;  %s7947_s13 = inlined_call_operand.vmem [shape: f32[2,1,64], index: 13, kind: input, shape index: {}]   ;;  %s7948_s14 = inlined_call_operand.vmem [shape: bf16[2,32,32], index: 14, kind: input, shape index: {}]   ;;  %s7949_s15 = inlined_call_operand.vmem [shape: f32[2,1,32], index: 15, kind: input, shape index: {}]   ;;  %s7950_s16 = inlined_call_operand.vmem [shape: f32[2,1,32], index: 16, kind: input, shape index: {}]   ;;  %s7951_s17 = inlined_call_operand.vmem [shape: f32[2,1,32], index: 17, kind: input, shape index: {}]   ;;  %s7952_s18 = inlined_call_operand.vmem [shape: bf16[2,32,64], index: 18, kind: input, shape index: {}]   ;;  %s7953_s19 = inlined_call_operand.vmem [shape: f32[2,1,64], index: 19, kind: input, shape index: {}]   ;;  %s7954_s20 = inlined_call_operand.vmem [shape: bf16[2,64,32], index: 20, kind: input, shape index: {}]   ;;  %s7955_s21 = inlined_call_operand.vmem [shape: f32[2,1,32], index: 21, kind: input, shape index: {}]   ;;  %s7956_s22 = inlined_call_operand.vmem [shape: f32[2,1,32], index: 22, kind: input, shape index: {}]   ;;  %s7957_s23 = inlined_call_operand.vmem [shape: f32[2,1,32], index: 23, kind: input, shape index: {}]   ;;  %s7958_s24 = inlined_call_operand.vmem [shape: bf16[2,8,32], index: 24, kind: output, shape index: {}]  }
   0x1   :  { %7965 = sst [smem:[#allocation8_spill]] %s7934_s0 }
   0x2   :  { %7966 = sst [smem:[#allocation9_spill]] %s7935_s1 }
   0x3   :  { %7967 = sst [smem:[#allocation10_spill]] %s7936_s2 }
   0x4   :  { %7968 = sst [smem:[#allocation11_spill]] %s7937_s3 }
   0x5   :  { %7969 = sst [smem:[#allocation12_spill]] %s7938_s4 }
   0x6   :  { %7970 = sst [smem:[#allocation13_spill]] %s7939_s5  ;;  %s6905_s5 = smov 0  }
   0x7   :  { %7971 = sst [smem:[#allocation14_spill]] %s7940_s6 }
   0x8   :  { %7972 = sst [smem:[#allocation15_spill]] %s7941_s7 }
   0x9   :  { %7973 = sst [smem:[#allocation16_spill]] %s7942_s8 }
   0xa   :  { %7974 = sst [smem:[#allocation17_spill]] %s7944_s10 }
   0xb   :  { %7975 = sst [smem:[#allocation18_spill]] %s7946_s12 }
   0xc   :  { %7976 = sst [smem:[#allocation19_spill]] %s7948_s14 }
   0xd   :  { %7977 = sst [smem:[#allocation20_spill]] %s7950_s16 }
   0xe   :  { %7978 = sst [smem:[#allocation21_spill]] %s7951_s17 }
   0xf   :  { %7979 = sst [smem:[#allocation22_spill]] %s7952_s18 }
  0x10   :  { %7980 = sst [smem:[#allocation23_spill]] %s7955_s21 }
  0x11   :  { %7981 = sst [smem:[#allocation24_spill]] %s7956_s22 }
  0x12   :  { %7982 = sst [smem:[#allocation25_spill]] %s7957_s23 }
  0x13   :  { %7983 = sst [smem:[#allocation26_spill]] %s7958_s24 }
  0x14 LB: > { %7984 = sst [smem:[#allocation3_spill]] %s6757_s5  ;;  %s43_s28 = sadd.s32 1, %s6761_s26  ;;  %s6765_s27 = sphi %s6909_s27, %s34_s27   ;;  %s6761_s26 = sphi %s6907_s26, %s8031_s26   ;;  %s6757_s5 = sphi %s6905_s5, %s8030_s5  }
  0x15   : > { %7985 = sst [smem:[#allocation4_spill]] %s6761_s26  ;;  %p6105_p0 = scmp.ge.s32.totalorder %s6765_s27, 1 }
  0x16   : > { %7986 = sst [smem:[#allocation5_spill]] %s6765_s27  ;;  %p44_p1 = scmp.ge.s32.totalorder %s43_s28, 2 }
  0x17   : > { %p882_p2 = scmp.lt.s32.totalorder %s6765_s27, 3 }
  0x18   : > { %s8033_s28 = smov (%p44_p1, %s43_s28), 0 }
  0x19   : > { %7987 = sst [smem:[#allocation6_spill]] %s8033_s28  ;;  %p883_p3 = pnand %p6105_p0, %p882_p2 }
  0x1b   : > { %886 = sbr.rel (%p883_p3) target bundleno = 4647 (0x1227), region = 116 }
  0x22   : > { %p1061_p4 = scmp.lt.s32.totalorder %s6757_s5, 1  ;;  %s7989_s8 = sld [smem:[#allocation12_spill]] }
  0x23   : > { %s7991_s26 = sld [smem:[#allocation14_spill]]  ;;  %s7994_s10 = sld [smem:[#allocation17_spill]] }
  0x24   : > { %s6927_s6 = scalar_select %p1061_p4, %s6757_s5, 1 }
  0x25   : > { %s7995_s12 = sld [smem:[#allocation18_spill]]  ;;  %s7996_s14 = sld [smem:[#allocation19_spill]] }
  0x26   : > { %s6227_s2 = sshll.u32 %s6927_s6, 4  ;;  %s7999_s18 = sld [smem:[#allocation22_spill]] }
  0x27   : > { %s8000_s24 = sld [smem:[#allocation23_spill]]  ;;  %s8001_s17 = sld [smem:[#allocation24_spill]] }
  0x28   : > { %s6937_s4 = scalar_lea.vmem %s7989_s8, %s6227_s2  ;;  %s8003_s25 = sld [smem:[#allocation3_spill]] }
  0x29   : > { %7990 = sst [smem:[#allocation7_spill]] %s6937_s4  ;;  %s6942_s27 = scalar_lea.vmem %s7991_s26, %s6227_s2 }
  0x2a   : > { %s6959_s26 = scalar_lea.vmem %s7994_s10, %s6227_s2 }
  0x2b   : > { %s6968_s21 = scalar_lea.vmem %s7995_s12, %s6227_s2  ;;  %s6977_s7 = scalar_lea.vmem %s7996_s14, %s6227_s2 }
  0x2c   : > { %s6994_s0 = scalar_lea.vmem %s7999_s18, %s6227_s2  ;;  %s6233_s14 = sshll.u32 %s6927_s6, 5 }
  0x2d   : > { %s7004_s22 = scalar_lea.vmem %s7954_s20, %s6233_s14  ;;  %s1128_s23 = scalar_lea.vmem %s8000_s24, %s6927_s6 }
  0x2e   : > { %s1131_s12 = scalar_lea.vmem %s8001_s17, %s6927_s6  ;;  %s8002_s18 = sld [smem:[#allocation25_spill]] }
  0x2f   : > { %p6120_p5 = scmp.ne.s32.totalorder %s8003_s25, 0 }
  0x30   : > { %s8004_s4 = sld [smem:[#allocation8_spill]] (!%p6120_p5)  ;;  %vm1148_vm0 = vcmask (!%p6120_p5), 261120  }
  0x31   : > { %1145 = sbr.rel (%p6120_p5) target bundleno = 56 (0x38), region = 120 }
  0x34   : > { %s1134_s16 = scalar_lea.vmem %s8002_s18, %s6927_s6 }
  0x36   : > { %v1146_v0 = vld [vmem:[%s8004_s4] sm:$0xff] (!%p6120_p5)  ;;  %v1147_v1 = vld [vmem:[%s8004_s4 + $0x8] sm:$0xff] (!%p6120_p5) }
  0x37   : > { %1149 = vst.msk [vmem:[#allocation2] sm:$0xff] (!%p6120_p5), %vm1148_vm0, %v1146_v0  ;;  %1150 = vst.msk [vmem:[#allocation2 + $0x8] sm:$0xff] (!%p6120_p5), %vm1148_vm0, %v1147_v1 }
  0x38 PF: > { %s8005_s10 = sld [smem:[#allocation7_spill]]  ;;  %v6767_v3 = vmov 0.0   ;;  %vm6768_vm1 = vmmov 0   ;;  %vm1183_vm2 = vcmask 261120   ;;  %s8006_s24 = sld [smem:[#allocation13_spill]]  ;;  %v1262_v21 = vlaneseq }
  0x39   : > { %6329 = vmatprep.subr.bf16.mxu1 %v6767_v3  ;;  %6343 = vmatprep.subr.bf16.mxu0 %v6767_v3  ;;  %s6769_s28 = smov 104   ;;  %s6770_s1 = smov 120   ;;  %v6773_v19 = vmov 1983009808   ;;  %v6774_v27 = vmov 1934713408  }
  0x3a   : > { %6333 = vmatprep.mubr.msk.bf16.mxu1 %vm6768_vm1, %v6767_v3  ;;  %6345 = vmatprep.mubr.msk.bf16.mxu0 %vm6768_vm1, %v6767_v3  ;;  %s6771_s5 = smov 96   ;;  %s6772_s2 = smov 112   ;;  %v1260_v20 = vunpack.c.l.s4 %v6773_v19  ;;  %v1263_v24 = vshrl.u32 %v1262_v21, 7  ;;  %v1291_v28 = vunpack.c.l.s4 %v6774_v27  ;;  %v6775_v43 = vmov 0  }
  0x3b   : > { %v7090_v44 = vpack.i.b16 %v6775_v43, %v6775_v43  ;;  %vm2074_vm3 = vcmask 64512   ;;  %s8008_s3 = sld [smem:[#allocation10_spill]]  ;;  %s6776_s14 = smov 64   ;;  %vm2552_vm4 = vcmask 1043456   ;;  %vm3216_vm5 = vcmask 130048  }
  0x3c   : > { %v1261_v23 = vunpack.c.0.s8 %v1260_v20  ;;  %v1292_v35 = vunpack.c.0.s8 %v1291_v28  ;;  %s6777_s8 = smov 16   ;;  %s6779_s17 = smov 24   ;;  %vm3219_vm6 = vcmask 195584   ;;  %vm5685_vm7 = vcmask 523264  }
  0x3e   : > { %v6648_v2 = vld [vmem:[%s8005_s10] sm:$0xff]   ;;  %v6649_v4 = vld [vmem:[%s8005_s10 + $0x8] sm:$0xff]   ;;  %s8007_s30 = scalar_lea.vmem %s8006_s24, %s6927_s6  ;;  %v7073_v32 = vsub.s32 %v1261_v23, %v1263_v24  ;;  %v7092_v46 = vsub.s32 %v1292_v35, %v1263_v24  ;;  %s6778_s10 = smov 8  }
  0x3f   : > { %6330 = vmatpush3.bf16.msra.mxu1 %v6648_v2  ;;  %v1151_v5 = vld [vmem:[#allocation2] sm:$0xff]  ;;  %v1152_v6 = vld [vmem:[#allocation2 + $0x8] sm:$0xff]  ;;  %s8009_s24 = sld [smem:[#allocation15_spill]] }
  0x40   : > { %6331 = vmatprep.subr.bf16.mxu1 %v6767_v3  ;;  %v1163_v7 = vpack.c.bf16 %v1152_v6, %v1151_v5  ;;  %v6121_v8 = vld [vmem:[%s8007_s30] ss:$0 sm:$0xff] }
  0x43   : > { %6332 = vmatpush3.bf16.msra.mxu1 %v6649_v4 }
  0x44   : > { %6337 = vmatprep.subr.bf16.mxu1 %v6767_v3 }
  0x45   : > { %s8010_s30 = scalar_lea.vmem %s8009_s24, %s6927_s6  ;;  %s8013_s24 = sld [smem:[#allocation16_spill]] }
  0x46   : > { %6334 = vmatmul.mubr.msk.bf16.vlgmr.msra.gmra.mrb[0].mxu1 %vm1183_vm2, %v1163_v7 }
  0x47   : > { %6339 = vmatprep.mubr.msk.bf16.mxu1 %vm6768_vm1, %v6767_v3 }
 0x119   : > { %v1221_v9 = vpop.f32.mrb[0].mxu1 }
 0x11a   : > { %v6335_v10 = vpop.f32.mrb[1].mxu1  ;;  %v1222_v12 = vadd.f32 %v6121_v8, %v1221_v9 }
 0x11b   : > { %v1224_v11 = vpop.f32.mrb[2].mxu1 }
 0x11c   : > { %v1225_v13 = vadd.f32 %v6121_v8, %v1224_v11  ;;  %v6336_v14 = vpop.f32.mrb[3].mxu1 }
 0x11e   : > { %v7043_v15 = vpack.c.bf16 %v1225_v13, %v1222_v12 }
 0x120   : > { %1234 = vrot.lane.b32.xlu1 %v7043_v15, %s6769_s28  ;;  %1230 = vrot.lane.b32.xlu0 %v7043_v15, %s6770_s1  ;;  %v1240_v30 = vshrl.u32 %v7043_v15, 16 }
 0x124   : > { %1514 = vrot.lane.b32.xlu1 %v7043_v15, %s6771_s5  ;;  %1232 = vrot.lane.b32.xlu0 %v7043_v15, %s6772_s2 }
 0x192   : > { %v7053_v16 = vpop.permute.xlu0 %1230  ;;  %v7057_v17 = vpop.permute.xlu1 %1234 }
 0x193   : > { %1516 = vrot.lane.b32.xlu0 %v7053_v16, %s6771_s5  ;;  %v1249_v25 = vshrl.u32 %v7057_v17, 16  ;;  %v1241_v26 = vshrl.u32 %v7053_v16, 16  ;;  %v7077_v33 = vpack.i.b16 %v7053_v16, %v7043_v15 }
 0x195   : > { %v7079_v34 = vpack.i.b16 %v1241_v26, %v1240_v30  ;;  %v1265_v39 = vrot.slane %v7077_v33, %v7073_v32  ;;  %v1258_v57 = vcombine.high %v7077_v33, %v7090_v44 }
 0x196   : > { %v7059_v18 = vpop.permute.xlu0 %1232  ;;  %v1515_v37 = vpop.permute.xlu1 %1514 }
 0x197   : > { %1520 = vrot.lane.b32.xlu0 %v7057_v17, %s6771_s5  ;;  %1518 = vrot.lane.b32.xlu1 %v7059_v18, %s6771_s5  ;;  %v1248_v22 = vshrl.u32 %v7059_v18, 16  ;;  %v7070_v29 = vpack.i.b16 %v7057_v17, %v7059_v18  ;;  %v1331_v41 = vrot.slane %v7079_v34, %v7073_v32  ;;  %v1526_v45 = vshrl.u32 %v1515_v37, 16 }
 0x198   : > { %v1324_v6 = vcombine.high %v7079_v34, %v7090_v44 }
 0x199   : > { %v1250_v31 = vpack.i.b16 %v1249_v25, %v1248_v22  ;;  %v1280_v36 = vrot.slane %v7070_v29, %v7073_v32  ;;  %v1273_v7 = vcombine.high %v7070_v29, %v7090_v44 }
 0x19b   : > { %v1346_v38 = vrot.slane %v1250_v31, %v7073_v32  ;;  %v1288_v47 = vcombine.low %v1265_v39, %v1280_v36  ;;  %v1289_v48 = vcombine.high %v1265_v39, %v1280_v36  ;;  %v1339_v54 = vcombine.high %v1250_v31, %v7090_v44 }
 0x19d   : > { %v1354_v49 = vcombine.low %v1331_v41, %v1346_v38  ;;  %v1355_v50 = vcombine.high %v1331_v41, %v1346_v38  ;;  %v1296_v58 = vrot.slane %v1288_v47, %v7092_v46  ;;  %v1303_v61 = vrot.slane %v1289_v48, %v7092_v46 }
 0x19e   : > { %v7110_v8 = vrot.slane %v1339_v54, %v7073_v32  ;;  %v1338_v54 = vrot.slane %v1324_v6, %v7073_v32 }
 0x19f   : > { %v1362_v62 = vrot.slane %v1354_v49, %v7092_v46  ;;  %v1369_v63 = vrot.slane %v1355_v50, %v7092_v46  ;;  %v1390_v14 = vcombine.low %v1296_v58, %v1303_v61  ;;  %v6125_v39 = vcombine.high %v1296_v58, %v1303_v61 }
 0x1a1   : > { %v1415_v19 = vcombine.low %v1362_v62, %v1369_v63  ;;  %v6126_v22 = vcombine.high %v1362_v62, %v1369_v63  ;;  %v1272_v63 = vrot.slane %v1258_v57, %v7073_v32 }
 0x1a3   : > { %v1430_v50 = vrot.slane %v6126_v22, %v7073_v32 }
 0x205   : > { %v1517_v40 = vpop.permute.xlu0 %1516 }
 0x206   : > { %v1527_v42 = vshrl.u32 %v1517_v40, 16  ;;  %v1524_v51 = vpack.i.b16 %v1517_v40, %v1515_v37  ;;  %v1422_v40 = vrot.slane %v1415_v19, %v7073_v32 }
 0x208   : > { %v1528_v55 = vpack.i.b16 %v1527_v42, %v1526_v45  ;;  %v1538_v0 = vcombine.high %v1524_v51, %v7090_v44  ;;  %v1545_v1 = vrot.slane %v1524_v51, %v7073_v32  ;;  %v1431_v6 = vcombine.low %v1422_v40, %v1430_v50 }
 0x209   : > { %v1519_v52 = vpop.permute.xlu1 %1518  ;;  %v1521_v53 = vpop.permute.xlu0 %1520 }
 0x20a   : > { %v1534_v56 = vshrl.u32 %v1519_v52, 16  ;;  %v1532_v59 = vpack.i.b16 %v1521_v53, %v1519_v52  ;;  %v1535_v60 = vshrl.u32 %v1521_v53, 16  ;;  %v1604_v9 = vcombine.high %v1528_v55, %v7090_v44 }
 0x20b   : > { %v1611_v20 = vrot.slane %v1528_v55, %v7073_v32  ;;  %v1552_v23 = vrot.slane %v1538_v0, %v7073_v32  ;;  %v1287_v55 = vrot.slane %v1273_v7, %v7073_v32 }
 0x20c   : > { %v1536_v2 = vpack.i.b16 %v1535_v60, %v1534_v56  ;;  %v1553_v4 = vcombine.high %v1532_v59, %v7090_v44  ;;  %v1560_v5 = vrot.slane %v1532_v59, %v7073_v32  ;;  %v1618_v26 = vrot.slane %v1604_v9, %v7073_v32 }
 0x20d   : > { %v1397_v59 = vrot.slane %v1390_v14, %v7073_v32  ;;  %v1405_v60 = vrot.slane %v6125_v39, %v7073_v32  ;;  %v1304_v7 = vcombine.low %v1272_v63, %v1287_v55  ;;  %v1305_v9 = vcombine.high %v1272_v63, %v1287_v55 }
 0x20e   : > { %v1567_v10 = vrot.slane %v1553_v4, %v7073_v32  ;;  %v1568_v11 = vcombine.low %v1545_v1, %v1560_v5  ;;  %v1569_v12 = vcombine.high %v1545_v1, %v1560_v5  ;;  %v1619_v13 = vcombine.high %v1536_v2, %v7090_v44 }
 0x20f   : > { %v1626_v21 = vrot.slane %v1536_v2, %v7073_v32  ;;  %v1370_v2 = vcombine.low %v1338_v54, %v7110_v8  ;;  %v1371_v4 = vcombine.high %v1338_v54, %v7110_v8 }
 0x210   : > { %v1576_v24 = vrot.slane %v1568_v11, %v7092_v46  ;;  %v1583_v25 = vrot.slane %v1569_v12, %v7092_v46  ;;  %v1633_v27 = vrot.slane %v1619_v13, %v7073_v32  ;;  %v1584_v30 = vcombine.low %v1552_v23, %v1567_v10 }
 0x211   : > { %v1634_v28 = vcombine.low %v1611_v20, %v1626_v21  ;;  %v1635_v29 = vcombine.high %v1611_v20, %v1626_v21  ;;  %v1585_v31 = vcombine.high %v1552_v23, %v1567_v10  ;;  %v1406_v12 = vcombine.low %v1397_v59, %v1405_v60 }
 0x212   : > { %v1670_v33 = vcombine.low %v1576_v24, %v1583_v25  ;;  %v6129_v34 = vcombine.high %v1576_v24, %v1583_v25  ;;  %v1650_v37 = vcombine.low %v1618_v26, %v1633_v27  ;;  %v1651_v38 = vcombine.high %v1618_v26, %v1633_v27 }
 0x213   : > { %v1642_v35 = vrot.slane %v1634_v28, %v7092_v46  ;;  %v1649_v36 = vrot.slane %v1635_v29, %v7092_v46  ;;  %v1592_v51 = vrot.slane %v1584_v30, %v7092_v46  ;;  %v1599_v52 = vrot.slane %v1585_v31, %v7092_v46 }
 0x214   : > { %v1677_v41 = vrot.slane %v1670_v33, %v7073_v32  ;;  %v1685_v42 = vrot.slane %v6129_v34, %v7073_v32  ;;  %v1658_v45 = vrot.slane %v1650_v37, %v7092_v46  ;;  %v1665_v47 = vrot.slane %v1651_v38, %v7092_v46 }
 0x215   : > { %v1695_v48 = vcombine.low %v1642_v35, %v1649_v36  ;;  %v6130_v49 = vcombine.high %v1642_v35, %v1649_v36  ;;  %v1720_v5 = vcombine.low %v1592_v51, %v1599_v52  ;;  %v6131_v10 = vcombine.high %v1592_v51, %v1599_v52 }
 0x216   : > { %v1686_v53 = vcombine.low %v1677_v41, %v1685_v42  ;;  %v1745_v61 = vcombine.low %v1658_v45, %v1665_v47  ;;  %v6132_v62 = vcombine.high %v1658_v45, %v1665_v47  ;;  %v1378_v8 = vrot.slane %v1370_v2, %v7092_v46 }
 0x217   : > { %v1702_v56 = vrot.slane %v1695_v48, %v7073_v32  ;;  %v1710_v58 = vrot.slane %v6130_v49, %v7073_v32  ;;  %v1385_v22 = vrot.slane %v1371_v4, %v7092_v46  ;;  %v1727_v23 = vrot.slane %v1720_v5, %v7073_v32 }
 0x218   : > { %v1693_v0 = vrot.slane %v1686_v53, %v7092_v46  ;;  %v1752_v13 = vrot.slane %v1745_v61, %v7073_v32  ;;  %v1760_v57 = vrot.slane %v6132_v62, %v7073_v32  ;;  %v1438_v24 = vrot.slane %v1431_v6, %v7092_v46 }
 0x219   : > { %v1711_v1 = vcombine.low %v1702_v56, %v1710_v58  ;;  %v1735_v25 = vrot.slane %v6131_v10, %v7073_v32  ;;  %v1312_v29 = vrot.slane %v1304_v7, %v7092_v46  ;;  %v1319_v30 = vrot.slane %v1305_v9, %v7092_v46 }
 0x21a   : > { %v1773_v19 = vshrl.u32 %v1693_v0, 16  ;;  %v1694_v28 = vcombine.high %v1693_v0, %v6775_v43  ;;  %v1413_v33 = vrot.slane %v1406_v12, %v7092_v46  ;;  %v1761_v35 = vcombine.low %v1752_v13, %v1760_v57 }
 0x21b   : > { %v1718_v11 = vrot.slane %v1711_v1, %v7092_v46  ;;  %v1465_v36 = vcombine.low %v1378_v8, %v1385_v22  ;;  %v6128_v37 = vcombine.high %v1378_v8, %v1385_v22  ;;  %v1494_v39 = vshrl.u32 %v1438_v24, 16 }
 0x21c   : > { %v1779_v40 = vshrl.u32 %v1694_v28, 16  ;;  %v1736_v41 = vcombine.low %v1727_v23, %v1735_v25  ;;  %v1440_v42 = vcombine.low %v1312_v29, %v1319_v30  ;;  %v6127_v45 = vcombine.high %v1312_v29, %v1319_v30 }
 0x21d   : > { %v1772_v14 = vpack.i.b16 %v1718_v11, %v1693_v0  ;;  %v1774_v20 = vshrl.u32 %v1718_v11, 16  ;;  %v1719_v21 = vcombine.high %v1718_v11, %v6775_v43  ;;  %v1492_v47 = vpack.i.b16 %v1438_v24, %v1413_v33 }
 0x21e   : > { %v1493_v48 = vshrl.u32 %v1413_v33, 16  ;;  %v1768_v50 = vrot.slane %v1761_v35, %v7092_v46  ;;  %v1472_v51 = vrot.slane %v1465_v36, %v7073_v32  ;;  %v1480_v52 = vrot.slane %v6128_v37, %v7073_v32  ;;  %v6235_v35 = vld [vmem:[%s8008_s3] sm:$0xff]   ;;  %s8011_s3 = sld [smem:[#allocation9_spill]] }
 0x21f   : > { %v2079_v26 = vsel %vm2074_vm3, %v1772_v14, 0  ;;  %v1775_v27 = vpack.i.b16 %v1774_v20, %v1773_v19  ;;  %v1780_v34 = vshrl.u32 %v1719_v21, 16  ;;  %v1778_v38 = vpack.i.b16 %v1719_v21, %v1694_v28 }
 0x220   : > { %6338 = vmatpush3.bf16.xpose.msra.mxu1 %v2079_v26  ;;  %v1495_v54 = vpack.i.b16 %v1494_v39, %v1493_v48  ;;  %v1439_v55 = vcombine.high %v1438_v24, %v6775_v43  ;;  %v1743_v56 = vrot.slane %v1736_v41, %v7092_v46  ;;  %v1447_v58 = vrot.slane %v1440_v42, %v7073_v32 }
 0x221   : > { %v2125_v31 = vsel %vm2074_vm3, %v1775_v27, 0  ;;  %6349 = vmatprep.subr.bf16.mxu1 %v6767_v3  ;;  %v1781_v49 = vpack.i.b16 %v1780_v34, %v1779_v40  ;;  %v2171_v53 = vsel %vm2074_vm3, %v1778_v38, 0  ;;  %v1455_v59 = vrot.slane %v6127_v45, %v7073_v32 }
 0x222   : > { %6344 = vmatpush3.bf16.xpose.msra.mxu0 %v2125_v31  ;;  %v1414_v61 = vcombine.high %v1413_v33, %v6775_v43  ;;  %v1786_v62 = vshrl.u32 %v1768_v50, 16  ;;  %v1784_v63 = vpack.i.b16 %v1768_v50, %v1743_v56  ;;  %v1500_v0 = vshrl.u32 %v1439_v55, 16 }
 0x223   : > { %6355 = vmatprep.subr.bf16.mxu0 %v6767_v3  ;;  %v2217_v60 = vsel %vm2074_vm3, %v1781_v49, 0  ;;  %v1785_v1 = vshrl.u32 %v1743_v56, 16  ;;  %v1481_v2 = vcombine.low %v1472_v51, %v1480_v52  ;;  %v1456_v4 = vcombine.low %v1447_v58, %v1455_v59 }
 0x224   : > { %v1498_v5 = vpack.i.b16 %v1439_v55, %v1414_v61  ;;  %v1499_v6 = vshrl.u32 %v1414_v61, 16  ;;  %v1769_v9 = vcombine.high %v1768_v50, %v6775_v43  ;;  %v2263_v10 = vsel %vm2074_vm3, %v1784_v63, 0 }
 0x225   : > { %v1787_v7 = vpack.i.b16 %v1786_v62, %v1785_v1  ;;  %v1488_v12 = vrot.slane %v1481_v2, %v7092_v46  ;;  %v1744_v13 = vcombine.high %v1743_v56, %v6775_v43  ;;  %v1463_v14 = vrot.slane %v1456_v4, %v7092_v46 }
 0x226   : > { %v1501_v11 = vpack.i.b16 %v1500_v0, %v1499_v6  ;;  %v1792_v19 = vshrl.u32 %v1769_v9, 16  ;;  %v6236_v36 = vunpack.c.l.bf16 %v6235_v35  ;;  %v6237_v1 = vunpack.c.h.bf16 %v6235_v35 }
 0x227   : > { %6340 = vmatmul.mubr.msk.bf16.vlgmr.msra.gmra.mrb[4].mxu1 %vm2074_vm3, %v1492_v47  ;;  %v2309_v57 = vsel %vm2074_vm3, %v1787_v7, 0  ;;  %v1790_v20 = vpack.i.b16 %v1769_v9, %v1744_v13  ;;  %v1506_v21 = vshrl.u32 %v1488_v12, 16  ;;  %v1791_v8 = vshrl.u32 %v1744_v13, 16 }
 0x228   : > { %6350 = vmatpush3.bf16.xpose.msra.mxu1 %v2171_v53  ;;  %6351 = vmatprep.mubr.msk.bf16.mxu1 %vm6768_vm1, %v6767_v3  ;;  %v1504_v22 = vpack.i.b16 %v1488_v12, %v1463_v14  ;;  %v1505_v23 = vshrl.u32 %v1463_v14, 16  ;;  %v1489_v27 = vcombine.high %v1488_v12, %v6775_v43  ;;  %v1464_v29 = vcombine.high %v1463_v14, %v6775_v43 }
 0x229   : > { %6346 = vmatmul.mubr.msk.bf16.vlgmr.msra.gmra.mrb[0].mxu0 %vm2074_vm3, %v1495_v54  ;;  %6361 = vmatprep.subr.bf16.mxu1 %v6767_v3  ;;  %v1793_v24 = vpack.i.b16 %v1792_v19, %v1791_v8  ;;  %v2355_v25 = vsel %vm2074_vm3, %v1790_v20, 0 }
 0x22a   : > { %6356 = vmatpush3.bf16.xpose.msra.mxu0 %v2217_v60  ;;  %6357 = vmatprep.mubr.msk.bf16.mxu0 %vm6768_vm1, %v6767_v3  ;;  %v1507_v26 = vpack.i.b16 %v1506_v21, %v1505_v23  ;;  %v1512_v30 = vshrl.u32 %v1489_v27, 16  ;;  %v1510_v31 = vpack.i.b16 %v1489_v27, %v1464_v29  ;;  %v1511_v33 = vshrl.u32 %v1464_v29, 16 }
 0x22b   : > { %6367 = vmatprep.subr.bf16.mxu0 %v6767_v3  ;;  %v2401_v28 = vsel %vm2074_vm3, %v1793_v24, 0 }
 0x22c   : > { %v1513_v34 = vpack.i.b16 %v1512_v30, %v1511_v33 }
 0x22f   : > { %6352 = vmatmul.mubr.msk.bf16.vlgmr.msra.gmra.mrb[8].mxu1 %vm2074_vm3, %v1498_v5 }
 0x230   : > { %6362 = vmatpush3.bf16.xpose.msra.mxu1 %v2263_v10  ;;  %6363 = vmatprep.mubr.msk.bf16.mxu1 %vm6768_vm1, %v6767_v3 }
 0x231   : > { %6358 = vmatmul.mubr.msk.bf16.vlgmr.msra.gmra.mrb[4].mxu0 %vm2074_vm3, %v1501_v11  ;;  %6373 = vmatprep.subr.bf16.mxu1 %v6767_v3 }
 0x232   : > { %6368 = vmatpush3.bf16.xpose.msra.mxu0 %v2309_v57  ;;  %6369 = vmatprep.mubr.msk.bf16.mxu0 %vm6768_vm1, %v6767_v3 }
 0x233   : > { %6379 = vmatprep.subr.bf16.mxu0 %v6767_v3 }
 0x237   : > { %6364 = vmatmul.mubr.msk.bf16.vlgmr.msra.gmra.mrb[12].mxu1 %vm2074_vm3, %v1504_v22 }
 0x238   : > { %6374 = vmatpush3.bf16.xpose.msra.mxu1 %v2355_v25  ;;  %6375 = vmatprep.mubr.msk.bf16.mxu1 %vm6768_vm1, %v6767_v3 }
 0x239   : > { %6370 = vmatmul.mubr.msk.bf16.vlgmr.msra.gmra.mrb[8].mxu0 %vm2074_vm3, %v1507_v26  ;;  %6385 = vmatprep.subr.bf16.mxu1 %v6767_v3 }
 0x23a   : > { %6380 = vmatpush3.bf16.xpose.msra.mxu0 %v2401_v28  ;;  %6381 = vmatprep.mubr.msk.bf16.mxu0 %vm6768_vm1, %v6767_v3 }
 0x23b   : > { %6391 = vmatprep.subr.bf16.mxu0 %v6767_v3 }
 0x23f   : > { %6376 = vmatmul.mubr.msk.bf16.vlgmr.msra.gmra.mrb[16].mxu1 %vm2074_vm3, %v1510_v31 }
 0x240   : > { %6387 = vmatprep.mubr.msk.bf16.mxu1 %vm6768_vm1, %v6767_v3 }
 0x241   : > { %6382 = vmatmul.mubr.msk.bf16.vlgmr.msra.gmra.mrb[12].mxu0 %vm2074_vm3, %v1513_v34 }
 0x242   : > { %6393 = vmatprep.mubr.msk.bf16.mxu0 %vm6768_vm1, %v6767_v3 }
 0x2fa   : > { %v2115_v37 = vpop.f32.mrb[4].mxu1 }
 0x2fb   : > { %v2445_v38 = vadd.f32 %v6236_v36, %v2115_v37  ;;  %v6341_v39 = vpop.f32.mrb[5].mxu1 }
 0x2fc   : > { %v2118_v40 = vpop.f32.mrb[6].mxu1  ;;  %v2161_v41 = vpop.f32.mrb[0].mxu0 }
 0x2fd   : > { %v2446_v42 = vadd.f32 %v6236_v36, %v2161_v41  ;;  %v6342_v45 = vpop.f32.mrb[7].mxu1  ;;  %v6347_v47 = vpop.f32.mrb[1].mxu0  ;;  %v2453_v48 = vsel %vm2074_vm3, %v2445_v38, -inf }
 0x2fe   : > { %v2164_v49 = vpop.f32.mrb[2].mxu0  ;;  %2454 = vmax.xlane.f32.xlu1 %v2453_v48 }
 0x2ff   : > { %v6348_v50 = vpop.f32.mrb[3].mxu0  ;;  %v2456_v51 = vsel %vm2074_vm3, %v2446_v42, -inf }
 0x300   : > { %2457 = vmax.xlane.f32.xlu0 %v2456_v51 }
 0x302   : > { %v2207_v52 = vpop.f32.mrb[8].mxu1 }
 0x303   : > { %v7214_v53 = vadd.f32 %v6236_v36, %v2207_v52  ;;  %v6353_v54 = vpop.f32.mrb[9].mxu1 }
 0x304   : > { %v2210_v55 = vpop.f32.mrb[10].mxu1  ;;  %v2253_v56 = vpop.f32.mrb[4].mxu0 }
 0x305   : > { %v7216_v58 = vadd.f32 %v6236_v36, %v2253_v56  ;;  %v6354_v59 = vpop.f32.mrb[11].mxu1  ;;  %v6359_v60 = vpop.f32.mrb[5].mxu0  ;;  %v2459_v61 = vsel %vm2074_vm3, %v7214_v53, -inf }
 0x306   : > { %v2256_v62 = vpop.f32.mrb[6].mxu0  ;;  %2460 = vmax.xlane.f32.xlu0 %v2459_v61 }
 0x307   : > { %v6360_v63 = vpop.f32.mrb[7].mxu0  ;;  %v2462_v0 = vsel %vm2074_vm3, %v7216_v58, -inf }
 0x308   : > { %2463 = vmax.xlane.f32.xlu1 %v2462_v0 }
 0x30a   : > { %v2299_v2 = vpop.f32.mrb[12].mxu1 }
 0x30b   : > { %v2449_v4 = vadd.f32 %v6237_v1, %v2299_v2  ;;  %v6365_v5 = vpop.f32.mrb[13].mxu1 }
 0x30c   : > { %v2302_v6 = vpop.f32.mrb[14].mxu1  ;;  %v2345_v7 = vpop.f32.mrb[8].mxu0 }
 0x30d   : > { %v2450_v9 = vadd.f32 %v6237_v1, %v2345_v7  ;;  %v6366_v10 = vpop.f32.mrb[15].mxu1  ;;  %v6371_v11 = vpop.f32.mrb[9].mxu0  ;;  %v2465_v12 = vsel %vm2074_vm3, %v2449_v4, -inf }
 0x30e   : > { %v2348_v13 = vpop.f32.mrb[10].mxu0  ;;  %2466 = vmax.xlane.f32.xlu0 %v2465_v12 }
 0x30f   : > { %v6372_v57 = vpop.f32.mrb[11].mxu0  ;;  %v2468_v14 = vsel %vm2074_vm3, %v2450_v9, -inf }
 0x310   : > { %2469 = vmax.xlane.f32.xlu1 %v2468_v14 }
 0x312   : > { %v2391_v19 = vpop.f32.mrb[16].mxu1 }
 0x313   : > { %v2451_v20 = vadd.f32 %v6237_v1, %v2391_v19  ;;  %v6377_v21 = vpop.f32.mrb[17].mxu1 }
 0x314   : > { %v2394_v8 = vpop.f32.mrb[18].mxu1  ;;  %v2437_v22 = vpop.f32.mrb[12].mxu0 }
 0x315   : > { %v2452_v23 = vadd.f32 %v6237_v1, %v2437_v22  ;;  %v6378_v24 = vpop.f32.mrb[19].mxu1  ;;  %v6383_v25 = vpop.f32.mrb[13].mxu0  ;;  %v2471_v26 = vsel %vm2074_vm3, %v2451_v20, -inf }
 0x316   : > { %v2440_v27 = vpop.f32.mrb[14].mxu0  ;;  %2472 = vmax.xlane.f32.xlu0 %v2471_v26 }
 0x317   : > { %v6384_v28 = vpop.f32.mrb[15].mxu0  ;;  %v2474_v29 = vsel %vm2074_vm3, %v2452_v23, -inf }
 0x318   : > { %2475 = vmax.xlane.f32.xlu1 %v2474_v29 }
 0x329   : > { %1796 = vrot.lane.b32.xlu1 %v7053_v16, %s6776_s14 }
 0x32c   : > { %1794 = vrot.lane.b32.xlu0 %v7043_v15, %s6776_s14 }
 0x38b   : > { %v2455_v30 = vpop.xlane.xlu1 %2454 }
 0x38c   : > { %v2477_v31 = vsub.f32 %v2445_v38, %v2455_v30 }
 0x38d   : > { %v2458_v33 = vpop.xlane.xlu0 %2457 }
 0x38e   : > { %v2485_v34 = vmul.f32 1.442695, %v2477_v31  ;;  %v2478_v35 = vsub.f32 %v2446_v42, %v2458_v33 }
 0x390   : > { %6665 = vpow2.f32 %v2485_v34  ;;  %v2487_v36 = vmul.f32 1.442695, %v2478_v35 }
 0x392   : > { %6667 = vpow2.f32 %v2487_v36 }
 0x393   : > { %v2461_v15 = vpop.xlane.xlu0 %2460 }
 0x394   : > { %v2479_v45 = vsub.f32 %v7214_v53, %v2461_v15 }
 0x395   : > { %v2464_v38 = vpop.xlane.xlu1 %2463 }
 0x396   : > { %v2480_v41 = vsub.f32 %v7216_v58, %v2464_v38  ;;  %v2489_v51 = vmul.f32 1.442695, %v2479_v45 }
 0x398   : > { %v2491_v48 = vmul.f32 1.442695, %v2480_v41 }
 0x39a   : > { %v7228_v37 = vpop.eup %6665  ;;  %6669 = vpow2.f32 %v2491_v48 }
 0x39b   : > { %v2501_v39 = vsel %vm2074_vm3, %v7228_v37, 0.0  ;;  %v2467_v42 = vpop.xlane.xlu0 %2466  ;;  %6671 = vpow2.f32 %v2489_v51 }
 0x39c   : > { %v7232_v40 = vpop.eup %6667  ;;  %2502 = vadd.xlane.f32.xlu0 %v2501_v39  ;;  %v2481_v49 = vsub.f32 %v2449_v4, %v2467_v42 }
 0x39d   : > { %v2504_v16 = vsel %vm2074_vm3, %v7232_v40, 0.0  ;;  %v2470_v47 = vpop.xlane.xlu1 %2469 }
 0x39e   : > { %2505 = vadd.xlane.f32.xlu1 %v2504_v16  ;;  %v2482_v52 = vsub.f32 %v2450_v9, %v2470_v47  ;;  %v2493_v55 = vmul.f32 1.442695, %v2481_v49 }
 0x3a0   : > { %6673 = vpow2.f32 %v2493_v55 }
 0x3a3   : > { %v2473_v50 = vpop.xlane.xlu0 %2472 }
 0x3a4   : > { %v2483_v56 = vsub.f32 %v2451_v20, %v2473_v50  ;;  %v7240_v60 = vpop.eup %6669 }
 0x3a5   : > { %v2476_v54 = vpop.xlane.xlu1 %2475  ;;  %v7242_v53 = vpop.eup %6671  ;;  %v2510_v61 = vsel %vm2074_vm3, %v7240_v60, 0.0 }
 0x3a6   : > { %v2497_v59 = vmul.f32 1.442695, %v2483_v56  ;;  %v2507_v63 = vsel %vm2074_vm3, %v7242_v53, 0.0 }
 0x3a7   : > { %v1795_v9 = vpop.permute.xlu0 %1794 }
 0x3a8   : > { %v1806_v19 = vshrl.u32 %v1795_v9, 16 }
 0x3a9   : > { %v1797_v10 = vpop.permute.xlu1 %1796 }
 0x3aa   : > { %v7246_v62 = vpop.eup %6673  ;;  %v1807_v13 = vshrl.u32 %v1797_v10, 16  ;;  %v7264_v14 = vpack.i.b16 %v1797_v10, %v1795_v9 }
 0x3ab   : > { %v2513_v1 = vsel %vm2074_vm3, %v7246_v62, 0.0 }
 0x3ac   : > { %v1825_v24 = vrot.slane %v7264_v14, %v7073_v32 }
 0x3af   : > { %1798 = vrot.lane.b32.xlu1 %v7059_v18, %s6776_s14  ;;  %v2495_v18 = vmul.f32 1.442695, %v2482_v52 }
 0x3b1   : > { %6675 = vpow2.f32 %v2495_v18 }
 0x3b2   : > { %1800 = vrot.lane.b32.xlu0 %v7057_v17, %s6776_s14  ;;  %v2484_v17 = vsub.f32 %v2452_v23, %v2476_v54  ;;  %6677 = vpow2.f32 %v2497_v59  ;;  %v7268_v23 = vpack.i.b16 %v1807_v13, %v1806_v19 }
 0x3b4   : > { %v2499_v58 = vmul.f32 1.442695, %v2484_v17  ;;  %v1891_v29 = vrot.slane %v7268_v23, %v7073_v32  ;;  %v1884_v13 = vcombine.high %v7268_v23, %v7090_v44 }
 0x3b6   : > { %6679 = vpow2.f32 %v2499_v58 }
 0x3bb   : > { %v7250_v0 = vpop.eup %6675 }
 0x3bc   : > { %v7254_v2 = vpop.eup %6677  ;;  %v2516_v4 = vsel %vm2074_vm3, %v7250_v0, 0.0 }
 0x3bd   : > { %v2519_v6 = vsel %vm2074_vm3, %v7254_v2, 0.0 }
 0x3c0   : > { %v7258_v5 = vpop.eup %6679 }
 0x3c1   : > { %v2522_v7 = vsel %vm2074_vm3, %v7258_v5, 0.0 }
 0x3d1   : > { %2511 = vadd.xlane.f32.xlu0 %v2510_v61 }
 0x3d3   : > { %2508 = vadd.xlane.f32.xlu1 %v2507_v63 }
 0x3d5   : > { %2514 = vadd.xlane.f32.xlu0 %v2513_v1 }
 0x3d7   : > { %2517 = vadd.xlane.f32.xlu1 %v2516_v4 }
 0x3d9   : > { %2520 = vadd.xlane.f32.xlu0 %v2519_v6 }
 0x3db   : > { %2523 = vadd.xlane.f32.xlu1 %v2522_v7 }
 0x429   : > { %v2503_v11 = vpop.xlane.xlu0 %2502 }
 0x42a   : > { %6681 = vrcp.f32 %v2503_v11 }
 0x42b   : > { %v2506_v12 = vpop.xlane.xlu1 %2505 }
 0x42c   : > { %6683 = vrcp.f32 %v2506_v12 }
 0x42d   : > { %v1801_v57 = vpop.permute.xlu0 %1800 }
 0x42e   : > { %v1815_v21 = vshrl.u32 %v1801_v57, 16 }
 0x42f   : > { %v1799_v20 = vpop.permute.xlu1 %1798 }
 0x430   : > { %v7266_v8 = vpack.i.b16 %v1801_v57, %v1799_v20  ;;  %v1814_v22 = vshrl.u32 %v1799_v20, 16  ;;  %v1818_v20 = vcombine.high %v7264_v14, %v7090_v44 }
 0x432   : > { %v1816_v25 = vpack.i.b16 %v1815_v21, %v1814_v22  ;;  %v1840_v26 = vrot.slane %v7266_v8, %v7073_v32  ;;  %v1898_v22 = vrot.slane %v1884_v13, %v7073_v32  ;;  %v1832_v14 = vrot.slane %v1818_v20, %v7073_v32 }
 0x434   : > { %v1848_v27 = vcombine.low %v1825_v24, %v1840_v26  ;;  %v1849_v28 = vcombine.high %v1825_v24, %v1840_v26  ;;  %v1906_v30 = vrot.slane %v1816_v25, %v7073_v32  ;;  %v6682_v51 = vpop.eup %6681  ;;  %v1899_v10 = vcombine.high %v1816_v25, %v7090_v44 }
 0x435   : > { %v2533_v18 = vmul.f32 %v6682_v51, %v7228_v37 }
 0x436   : > { %v1856_v31 = vrot.slane %v1848_v27, %v7092_v46  ;;  %v1863_v33 = vrot.slane %v1849_v28, %v7092_v46  ;;  %v1914_v34 = vcombine.low %v1891_v29, %v1906_v30  ;;  %v1915_v35 = vcombine.high %v1891_v29, %v1906_v30  ;;  %v6684_v55 = vpop.eup %6683 }
 0x437   : > { %v2534_v63 = vmul.f32 %v6684_v55, %v7232_v40  ;;  %v2541_v37 = vpack.c.bf16 %v2533_v18, %v2533_v18  ;;  %v1833_v40 = vcombine.high %v7266_v8, %v7090_v44  ;;  %v1913_v21 = vrot.slane %v1899_v10, %v7073_v32 }
 0x438   : > { %v1950_v36 = vcombine.low %v1856_v31, %v1863_v33  ;;  %v6133_v39 = vcombine.high %v1856_v31, %v1863_v33  ;;  %v1922_v16 = vrot.slane %v1914_v34, %v7092_v46  ;;  %v1929_v15 = vrot.slane %v1915_v35, %v7092_v46 }
 0x439   : > { %v2542_v19 = vpack.c.bf16 %v2534_v63, %v2534_v63  ;;  %v1847_v23 = vrot.slane %v1833_v40, %v7073_v32  ;;  %v1930_v24 = vcombine.low %v1898_v22, %v1913_v21  ;;  %v1931_v25 = vcombine.high %v1898_v22, %v1913_v21 }
 0x43a   : > { %v1957_v38 = vrot.slane %v1950_v36, %v7073_v32  ;;  %v1965_v41 = vrot.slane %v6133_v39, %v7073_v32  ;;  %v1975_v42 = vcombine.low %v1922_v16, %v1929_v15  ;;  %v6134_v45 = vcombine.high %v1922_v16, %v1929_v15 }
 0x43b   : > { %v1864_v26 = vcombine.low %v1832_v14, %v1847_v23  ;;  %v1865_v27 = vcombine.high %v1832_v14, %v1847_v23  ;;  %v1938_v28 = vrot.slane %v1930_v24, %v7092_v46  ;;  %v1945_v29 = vrot.slane %v1931_v25, %v7092_v46 }
 0x43c   : > { %v1966_v47 = vcombine.low %v1957_v38, %v1965_v41  ;;  %v1982_v48 = vrot.slane %v1975_v42, %v7073_v32  ;;  %v1990_v49 = vrot.slane %v6134_v45, %v7073_v32 }
 0x43d   : > { %v1872_v30 = vrot.slane %v1864_v26, %v7092_v46  ;;  %v1879_v31 = vrot.slane %v1865_v27, %v7092_v46  ;;  %v2025_v33 = vcombine.low %v1938_v28, %v1945_v29  ;;  %v6136_v34 = vcombine.high %v1938_v28, %v1945_v29 }
 0x43e   : > { %v1973_v50 = vrot.slane %v1966_v47, %v7092_v46  ;;  %v1991_v52 = vcombine.low %v1982_v48, %v1990_v49 }
 0x43f   : > { %v2000_v35 = vcombine.low %v1872_v30, %v1879_v31  ;;  %v6135_v36 = vcombine.high %v1872_v30, %v1879_v31  ;;  %v2032_v39 = vrot.slane %v2025_v33, %v7073_v32  ;;  %v2040_v16 = vrot.slane %v6136_v34, %v7073_v32 }
 0x440   : > { %v1974_v54 = vcombine.high %v1973_v50, %v6775_v43  ;;  %v1998_v56 = vrot.slane %v1991_v52, %v7092_v46  ;;  %v2053_v59 = vshrl.u32 %v1973_v50, 16 }
 0x441   : > { %v2007_v15 = vrot.slane %v2000_v35, %v7073_v32  ;;  %v2015_v38 = vrot.slane %v6135_v36, %v7073_v32  ;;  %v2041_v42 = vcombine.low %v2032_v39, %v2040_v16 }
 0x442   : > { %v2052_v17 = vpack.i.b16 %v1998_v56, %v1973_v50  ;;  %v2054_v58 = vshrl.u32 %v1998_v56, 16  ;;  %v1999_v61 = vcombine.high %v1998_v56, %v6775_v43  ;;  %v2059_v1 = vshrl.u32 %v1974_v54, 16 }
 0x443   : > { %v2016_v47 = vcombine.low %v2007_v15, %v2015_v38  ;;  %v2048_v49 = vrot.slane %v2041_v42, %v7092_v46 }
 0x444   : > { %v2554_v4 = vsel %vm2552_vm4, %v2052_v17, 0  ;;  %v2055_v6 = vpack.i.b16 %v2054_v58, %v2053_v59  ;;  %v2058_v7 = vpack.i.b16 %v1999_v61, %v1974_v54  ;;  %v2060_v9 = vshrl.u32 %v1999_v61, 16 }
 0x445   : > { %6386 = vmatpush3.bf16.msra.mxu1 %v2554_v4  ;;  %v2023_v51 = vrot.slane %v2016_v47, %v7092_v46  ;;  %v2066_v52 = vshrl.u32 %v2048_v49, 16  ;;  %v2049_v58 = vcombine.high %v2048_v49, %v6775_v43 }
 0x446   : > { %v2600_v11 = vsel %vm2552_vm4, %v2055_v6, 0  ;;  %6397 = vmatprep.subr.bf16.mxu1 %v6767_v3  ;;  %v2061_v12 = vpack.i.b16 %v2060_v9, %v2059_v1  ;;  %v2646_v57 = vsel %vm2552_vm4, %v2058_v7, 0 }
 0x447   : > { %6392 = vmatpush3.bf16.msra.mxu0 %v2600_v11  ;;  %v2065_v55 = vshrl.u32 %v2023_v51, 16  ;;  %v2064_v4 = vpack.i.b16 %v2048_v49, %v2023_v51  ;;  %v2024_v6 = vcombine.high %v2023_v51, %v6775_v43 }
 0x448   : > { %6388 = vmatmul.mubr.msk.bf16.vlgmr.msra.gmra.mrb[20].mxu1 %vm2074_vm3, %v2541_v37  ;;  %6403 = vmatprep.subr.bf16.mxu0 %v6767_v3  ;;  %v2692_v8 = vsel %vm2552_vm4, %v2061_v12, 0 }
 0x449   : > { %6398 = vmatpush3.bf16.msra.mxu1 %v2646_v57  ;;  %6399 = vmatprep.mubr.msk.bf16.mxu1 %vm6768_vm1, %v6767_v3  ;;  %v2067_v59 = vpack.i.b16 %v2066_v52, %v2065_v55  ;;  %v2071_v12 = vshrl.u32 %v2024_v6, 16 }
 0x44a   : > { %6394 = vmatmul.mubr.msk.bf16.vlgmr.msra.gmra.mrb[16].mxu0 %vm2074_vm3, %v2542_v19  ;;  %6409 = vmatprep.subr.bf16.mxu1 %v6767_v3  ;;  %v2070_v19 = vpack.i.b16 %v2049_v58, %v2024_v6 }
 0x44b   : > { %6404 = vmatpush3.bf16.msra.mxu0 %v2692_v8  ;;  %6405 = vmatprep.mubr.msk.bf16.mxu0 %vm6768_vm1, %v6767_v3  ;;  %v2784_v9 = vsel %vm2552_vm4, %v2067_v59, 0 }
 0x44c   : > { %6415 = vmatprep.subr.bf16.mxu0 %v6767_v3 }
 0x45e   : > { %v2512_v41 = vpop.xlane.xlu0 %2511 }
 0x45f   : > { %6685 = vrcp.f32 %v2512_v41 }
 0x460   : > { %v2509_v45 = vpop.xlane.xlu1 %2508 }
 0x461   : > { %6687 = vrcp.f32 %v2509_v45 }
 0x462   : > { %v2515_v48 = vpop.xlane.xlu0 %2514 }
 0x463   : > { %6689 = vrcp.f32 %v2515_v48 }
 0x464   : > { %v2518_v50 = vpop.xlane.xlu1 %2517 }
 0x465   : > { %6691 = vrcp.f32 %v2518_v50 }
 0x466   : > { %v2521_v17 = vpop.xlane.xlu0 %2520 }
 0x468   : > { %v2524_v54 = vpop.xlane.xlu1 %2523 }
 0x469   : > { %v6686_v56 = vpop.eup %6685  ;;  %6693 = vrcp.f32 %v2524_v54 }
 0x46a   : > { %v2536_v18 = vmul.f32 %v6686_v56, %v7240_v60  ;;  %6695 = vrcp.f32 %v2521_v17  ;;  %v2072_v60 = vshrl.u32 %v2049_v58, 16 }
 0x46b   : > { %v6688_v61 = vpop.eup %6687 }
 0x46c   : > { %v2535_v63 = vmul.f32 %v6688_v61, %v7242_v53  ;;  %v2544_v1 = vpack.c.bf16 %v2536_v18, %v2536_v18  ;;  %v2738_v53 = vsel %vm2552_vm4, %v2064_v4, 0  ;;  %v2073_v40 = vpack.i.b16 %v2072_v60, %v2071_v12 }
 0x46d   : > { %v6690_v7 = vpop.eup %6689 }
 0x46e   : > { %6406 = vmatmul.mubr.msk.bf16.vlgmr.msra.gmra.mrb[20].mxu0 %vm2074_vm3, %v2544_v1  ;;  %v2543_v10 = vpack.c.bf16 %v2535_v63, %v2535_v63  ;;  %v2537_v13 = vmul.f32 %v6690_v7, %v7246_v62  ;;  %v2830_v62 = vsel %vm2552_vm4, %v2070_v19, 0 }
 0x46f   : > { %v6692_v11 = vpop.eup %6691  ;;  %6416 = vmatpush3.bf16.msra.mxu0 %v2784_v9  ;;  %6417 = vmatprep.mubr.msk.bf16.mxu0 %vm6768_vm1, %v6767_v3 }
 0x470   : > { %v2538_v37 = vmul.f32 %v6692_v11, %v7250_v0  ;;  %6400 = vmatmul.mubr.msk.bf16.vlgmr.msra.gmra.mrb[24].mxu1 %vm2074_vm3, %v2543_v10  ;;  %6427 = vmatprep.subr.bf16.mxu0 %v6767_v3  ;;  %v2876_v0 = vsel %vm2552_vm4, %v2073_v40, 0  ;;  %v2545_v21 = vpack.c.bf16 %v2537_v13, %v2537_v13 }
 0x471   : > { %6410 = vmatpush3.bf16.msra.mxu1 %v2738_v53  ;;  %6411 = vmatprep.mubr.msk.bf16.mxu1 %vm6768_vm1, %v6767_v3 }
 0x472   : > { %6421 = vmatprep.subr.bf16.mxu1 %v6767_v3  ;;  %v2546_v57 = vpack.c.bf16 %v2538_v37, %v2538_v37 }
 0x473   : > { %v6694_v20 = vpop.eup %6693 }
 0x474   : > { %v6696_v8 = vpop.eup %6695  ;;  %v2540_v22 = vmul.f32 %v6694_v20, %v7258_v5 }
 0x475   : > { %v2539_v23 = vmul.f32 %v6696_v8, %v7254_v2 }
 0x476   : > { %6418 = vmatmul.mubr.msk.bf16.vlgmr.msra.gmra.mrb[24].mxu0 %vm2074_vm3, %v2546_v57  ;;  %v2548_v14 = vpack.c.bf16 %v2540_v22, %v2540_v22 }
 0x477   : > { %6428 = vmatpush3.bf16.msra.mxu0 %v2876_v0  ;;  %6429 = vmatprep.mubr.msk.bf16.mxu0 %vm6768_vm1, %v6767_v3  ;;  %v2547_v24 = vpack.c.bf16 %v2539_v23, %v2539_v23 }
 0x478   : > { %6412 = vmatmul.mubr.msk.bf16.vlgmr.msra.gmra.mrb[28].mxu1 %vm2074_vm3, %v2545_v21  ;;  %6441 = vmatprep.subr.bf16.mxu0 %v6767_v3 }
 0x479   : > { %6422 = vmatpush3.bf16.msra.mxu1 %v2830_v62  ;;  %6423 = vmatprep.mubr.msk.bf16.mxu1 %vm6768_vm1, %v6767_v3 }
 0x47a   : > { %6433 = vmatprep.subr.bf16.mxu1 %v6767_v3 }
 0x47e   : > { %6430 = vmatmul.mubr.msk.bf16.vlgmr.msra.gmra.mrb[28].mxu0 %vm2074_vm3, %v2548_v14 }
 0x47f   : > { %6445 = vmatprep.mubr.msk.bf16.mxu0 %vm6768_vm1, %v6767_v3 }
 0x480   : > { %6424 = vmatmul.mubr.msk.bf16.vlgmr.msra.gmra.mrb[32].mxu1 %vm2074_vm3, %v2547_v24 }
 0x481   : > { %6437 = vmatprep.mubr.msk.bf16.mxu1 %vm6768_vm1, %v6767_v3 }
 0x51b   : > { %v2590_v5 = vpop.f32.mrb[20].mxu1 }
 0x51c   : > { %v6389_v25 = vpop.f32.mrb[21].mxu1 }
 0x51d   : > { %v2593_v26 = vpop.f32.mrb[22].mxu1  ;;  %v2636_v27 = vpop.f32.mrb[16].mxu0 }
 0x51e   : > { %v6390_v28 = vpop.f32.mrb[23].mxu1  ;;  %v6395_v2 = vpop.f32.mrb[17].mxu0 }
 0x51f   : > { %v2639_v29 = vpop.f32.mrb[18].mxu0 }
 0x520   : > { %v6396_v30 = vpop.f32.mrb[19].mxu0 }
 0x541   : > { %v2728_v31 = vpop.f32.mrb[20].mxu0 }
 0x542   : > { %v2934_v33 = vcombine.low %v2636_v27, %v2728_v31  ;;  %v2935_v34 = vcombine.high %v2636_v27, %v2728_v31  ;;  %v6407_v35 = vpop.f32.mrb[21].mxu0 }
 0x543   : > { %v2682_v36 = vpop.f32.mrb[24].mxu1  ;;  %v2731_v39 = vpop.f32.mrb[22].mxu0 }
 0x544   : > { %v2918_v16 = vcombine.low %v2590_v5, %v2682_v36  ;;  %v2919_v15 = vcombine.high %v2590_v5, %v2682_v36  ;;  %v6401_v38 = vpop.f32.mrb[25].mxu1  ;;  %v6408_v41 = vpop.f32.mrb[23].mxu0  ;;  %v2942_v45 = vrot.slane %v2934_v33, %v7073_v32  ;;  %v2949_v47 = vrot.slane %v2935_v34, %v7073_v32 }
 0x545   : > { %v2685_v42 = vpop.f32.mrb[26].mxu1 }
 0x546   : > { %v2926_v48 = vrot.slane %v2918_v16, %v7073_v32  ;;  %v2933_v49 = vrot.slane %v2919_v15, %v7073_v32  ;;  %v6402_v50 = vpop.f32.mrb[27].mxu1 }
 0x548   : > { %v2950_v51 = vcombine.low %v2926_v48, %v2942_v45  ;;  %v2951_v52 = vcombine.high %v2926_v48, %v2942_v45  ;;  %v2966_v54 = vcombine.low %v2933_v49, %v2949_v47  ;;  %v2967_v55 = vcombine.high %v2933_v49, %v2949_v47 }
 0x549   : > { %v2820_v56 = vpop.f32.mrb[24].mxu0 }
 0x54a   : > { %v2958_v18 = vrot.slane %v2950_v51, %v7092_v46  ;;  %v2965_v17 = vrot.slane %v2951_v52, %v7092_v46  ;;  %v2974_v59 = vrot.slane %v2966_v54, %v7092_v46  ;;  %v2981_v58 = vrot.slane %v2967_v55, %v7092_v46  ;;  %v6419_v61 = vpop.f32.mrb[25].mxu0 }
 0x54b   : > { %v2774_v63 = vpop.f32.mrb[28].mxu1  ;;  %v2823_v1 = vpop.f32.mrb[26].mxu0 }
 0x54c   : > { %v3054_v4 = vcombine.low %v2958_v18, %v2965_v17  ;;  %v6153_v6 = vcombine.high %v2958_v18, %v2965_v17  ;;  %v3070_v7 = vcombine.low %v2974_v59, %v2981_v58  ;;  %v6154_v9 = vcombine.high %v2974_v59, %v2981_v58  ;;  %v6413_v10 = vpop.f32.mrb[29].mxu1  ;;  %v6420_v60 = vpop.f32.mrb[27].mxu0  ;;  %v6650_v18 = vld [vmem:[%s6942_s27] sm:$0xff]  }
 0x54d   : > { %v2777_v11 = vpop.f32.mrb[30].mxu1  ;;  %6434 = vmatpush3.bf16.msra.mxu1 %v6650_v18 }
 0x54e   : > { %v3061_v37 = vrot.slane %v3054_v4, %v7073_v32  ;;  %v3069_v53 = vrot.slane %v6153_v6, %v7073_v32  ;;  %v3077_v12 = vrot.slane %v3070_v7, %v7073_v32  ;;  %v3085_v13 = vrot.slane %v6154_v9, %v7073_v32  ;;  %v6414_v40 = vpop.f32.mrb[31].mxu1  ;;  %6435 = vmatprep.subr.bf16.mxu1 %v6767_v3  ;;  %v6651_v11 = vld [vmem:[%s6942_s27 + $0x8] sm:$0xff]   ;;  %s8012_s27 = scalar_lea.vmem %s7947_s13, %s6927_s6 }
 0x550   : > { %v3087_v57 = vcombine.high %v3061_v37, %v3069_v53  ;;  %v3103_v19 = vcombine.high %v3077_v12, %v3085_v13  ;;  %v3086_v20 = vcombine.low %v3061_v37, %v3069_v53  ;;  %v3102_v0 = vcombine.low %v3077_v12, %v3085_v13 }
 0x551   : > { %v2912_v21 = vpop.f32.mrb[28].mxu0  ;;  %6436 = vmatpush3.bf16.msra.mxu1 %v6651_v11 }
 0x552   : > { %v3002_v8 = vcombine.low %v2820_v56, %v2912_v21  ;;  %v3003_v22 = vcombine.high %v2820_v56, %v2912_v21  ;;  %v6431_v62 = vpop.f32.mrb[29].mxu0  ;;  %v3101_v23 = vrot.slane %v3087_v57, %v7092_v46  ;;  %v3117_v14 = vrot.slane %v3103_v19, %v7092_v46  ;;  %6449 = vmatprep.subr.bf16.mxu1 %v6767_v3 }
 0x553   : > { %v2866_v24 = vpop.f32.mrb[32].mxu1  ;;  %v2915_v5 = vpop.f32.mrb[30].mxu0  ;;  %v7375_v25 = vrot.slane %v3086_v20, %v7092_v46  ;;  %v7378_v26 = vrot.slane %v3102_v0, %v7092_v46 }
 0x554   : > { %v2986_v27 = vcombine.low %v2774_v63, %v2866_v24  ;;  %v2987_v28 = vcombine.high %v2774_v63, %v2866_v24  ;;  %v6425_v2 = vpop.f32.mrb[33].mxu1  ;;  %v6432_v29 = vpop.f32.mrb[31].mxu0  ;;  %v3120_v31 = vcombine.low %v3101_v23, %v3117_v14  ;;  %v3121_v35 = vcombine.high %v3101_v23, %v3117_v14 }
 0x555   : > { %v2869_v30 = vpop.f32.mrb[34].mxu1  ;;  %v3118_v33 = vcombine.low %v7375_v25, %v7378_v26  ;;  %v3119_v34 = vcombine.high %v7375_v25, %v7378_v26  ;;  %v3010_v36 = vrot.slane %v3002_v8, %v7073_v32  ;;  %v3017_v39 = vrot.slane %v3003_v22, %v7073_v32 }
 0x556   : > { %v2994_v16 = vrot.slane %v2986_v27, %v7073_v32  ;;  %v3001_v15 = vrot.slane %v2987_v28, %v7073_v32  ;;  %v6426_v38 = vpop.f32.mrb[35].mxu1  ;;  %v6157_v30 = vld [vmem:[%s8010_s30] ss:$0 sm:$0xff]  ;;  %s8014_s30 = scalar_lea.vmem %s8013_s24, %s6927_s6 }
 0x558   : > { %v3018_v41 = vcombine.low %v2994_v16, %v3010_v36  ;;  %v3019_v42 = vcombine.high %v2994_v16, %v3010_v36  ;;  %v3034_v45 = vcombine.low %v3001_v15, %v3017_v39  ;;  %v3035_v47 = vcombine.high %v3001_v15, %v3017_v39  ;;  %v6741_v16 = vld [vmem:[#allocation2] sm:$0xff] }
 0x55a   : > { %v3026_v48 = vrot.slane %v3018_v41, %v7092_v46  ;;  %v3033_v49 = vrot.slane %v3019_v42, %v7092_v46  ;;  %v3042_v50 = vrot.slane %v3034_v45, %v7092_v46  ;;  %v3049_v51 = vrot.slane %v3035_v47, %v7092_v46  ;;  %v6742_v41 = vld [vmem:[#allocation2 + $0x8] sm:$0xff]  ;;  %v6652_v47 = vld [vmem:[%s6968_s21] sm:$0xff]  }
 0x55c   : > { %v3122_v52 = vcombine.low %v3026_v48, %v3033_v49  ;;  %v6155_v54 = vcombine.high %v3026_v48, %v3033_v49  ;;  %v3138_v55 = vcombine.low %v3042_v50, %v3049_v51  ;;  %v6156_v56 = vcombine.high %v3042_v50, %v3049_v51  ;;  %v6653_v48 = vld [vmem:[%s6968_s21 + $0x8] sm:$0xff]   ;;  %v6654_v49 = vld [vmem:[%s8011_s3] sm:$0xff]   ;;  %s8015_s3 = scalar_lea.vmem %s7943_s9, %s6927_s6  ;;  %s8023_s21 = scalar_lea.vmem %s7953_s19, %s6927_s6 }
 0x55e   : > { %v3129_v17 = vrot.slane %v3122_v52, %v7073_v32  ;;  %v3137_v59 = vrot.slane %v6155_v54, %v7073_v32  ;;  %v3145_v58 = vrot.slane %v3138_v55, %v7073_v32  ;;  %v3153_v61 = vrot.slane %v6156_v56, %v7073_v32 }
 0x560   : > { %v3155_v63 = vcombine.high %v3129_v17, %v3137_v59  ;;  %v3171_v1 = vcombine.high %v3145_v58, %v3153_v61  ;;  %v3154_v4 = vcombine.low %v3129_v17, %v3137_v59  ;;  %v3170_v6 = vcombine.low %v3145_v58, %v3153_v61  ;;  %v6655_v61 = vld [vmem:[%s6959_s26] sm:$0xff]  }
 0x561   : > { %6442 = vmatpush3.bf16.msra.mxu0 %v6655_v61 }
 0x562   : > { %v3169_v7 = vrot.slane %v3155_v63, %v7092_v46  ;;  %v3185_v9 = vrot.slane %v3171_v1, %v7092_v46  ;;  %v3162_v10 = vrot.slane %v3154_v4, %v7092_v46  ;;  %v3178_v60 = vrot.slane %v3170_v6, %v7092_v46  ;;  %v6656_v63 = vld [vmem:[%s6959_s26 + $0x8] sm:$0xff]   ;;  %6443 = vmatprep.subr.bf16.mxu0 %v6767_v3  ;;  %v6167_v1 = vld [vmem:[%s8012_s27] ss:$0 sm:$0xff]  ;;  %s8016_s27 = scalar_lea.vmem %s7945_s11, %s6927_s6 }
 0x564   : > { %v3188_v37 = vcombine.low %v3169_v7, %v3185_v9  ;;  %v3187_v53 = vcombine.high %v3162_v10, %v3178_v60  ;;  %v3186_v12 = vcombine.low %v3162_v10, %v3178_v60  ;;  %v3189_v13 = vcombine.high %v3169_v7, %v3185_v9 }
 0x565   : > { %6444 = vmatpush3.bf16.msra.mxu0 %v6656_v63 }
 0x566   : > { %v6623_v40 = vpack.i.bf16 %v3188_v37, %v3120_v31  ;;  %v6618_v57 = vpack.i.bf16 %v3187_v53, %v3119_v34  ;;  %v6628_v19 = vpack.i.bf16 %v3189_v13, %v3121_v35  ;;  %6457 = vmatprep.subr.bf16.mxu0 %v6767_v3 }
 0x568   : > { %6624 = vrot.lane.b32.xlu1 %v6623_v40, %s6777_s8  ;;  %6619 = vrot.lane.b32.xlu0 %v6618_v57, %s6778_s10 }
 0x56c   : > { %6629 = vrot.lane.b32.xlu1 %v6628_v19, %s6779_s17 }
 0x5da   : > { %v6625_v20 = vpop.permute.xlu1 %6624  ;;  %v6620_v0 = vpop.permute.xlu0 %6619 }
 0x5db   : > { %v6622_v21 = vunpack.i.h.bf16 %v6620_v0  ;;  %v6621_v8 = vunpack.i.l.bf16 %v6620_v0  ;;  %v6627_v22 = vunpack.i.h.bf16 %v6625_v20  ;;  %v6626_v62 = vunpack.i.l.bf16 %v6625_v20  ;;  %v6161_v0 = vld [vmem:[%s8014_s30] ss:$0 sm:$0xff]  ;;  %s8021_s30 = sld [smem:[#allocation21_spill]] }
 0x5dd   : > { %v3214_v23 = vsel %vm2074_vm3, %v3118_v33, %v6621_v8  ;;  %v3215_v14 = vsel %vm2074_vm3, %v3186_v12, %v6622_v21 }
 0x5de   : > { %v6630_v24 = vpop.permute.xlu1 %6629  ;;  %v3217_v26 = vsel %vm3216_vm5, %v3214_v23, %v6626_v62  ;;  %v3218_v27 = vsel %vm3216_vm5, %v3215_v14, %v6627_v22  ;;  %v6162_v62 = vld [vmem:[%s8015_s3] ss:$0 sm:$0xff] }
 0x5df   : > { %v6632_v5 = vunpack.i.h.bf16 %v6630_v24  ;;  %v6631_v25 = vunpack.i.l.bf16 %v6630_v24 }
 0x5e1   : > { %v3220_v28 = vsel %vm3219_vm6, %v3217_v26, %v6631_v25  ;;  %v3221_v2 = vsel %vm3219_vm6, %v3218_v27, %v6632_v5  ;;  %s8022_s29 = scalar_lea.vmem %s8021_s30, %s6927_s6 }
 0x5e2   : > { %v3226_v29 = vpack.c.bf16 %v3221_v2, %v3220_v28 }
 0x5e4   : > { %6438 = vmatmul.mubr.msk.bf16.vlgmr.msra.gmra.mrb[36].mxu1 %vm1183_vm2, %v3226_v29 }
 0x5e5   : > { %6453 = vmatprep.mubr.msk.bf16.mxu1 %vm6768_vm1, %v6767_v3  ;;  %6450 = vmatpush3.bf16.msra.mxu1 %v6652_v47 }
 0x5e6   : > { %6451 = vmatprep.subr.bf16.mxu1 %v6767_v3 }
 0x5e9   : > { %6452 = vmatpush3.bf16.msra.mxu1 %v6653_v48 }
 0x5ea   : > { %6463 = vmatprep.subr.bf16.mxu1 %v6767_v3 }
 0x5ec   : > { %6454 = vmatmul.mubr.msk.bf16.vlgmr.msra.gmra.mrb[40].mxu1 %vm1183_vm2, %v6654_v49 }
 0x5ed   : > { %6465 = vmatprep.mubr.msk.bf16.mxu1 %vm6768_vm1, %v6767_v3 }
 0x6b7   : > { %v3283_v31 = vpop.f32.mrb[36].mxu1 }
 0x6b8   : > { %v3284_v33 = vadd.f32 %v6157_v30, %v3283_v31  ;;  %v6439_v34 = vpop.f32.mrb[37].mxu1 }
 0x6b9   : > { %v3286_v35 = vpop.f32.mrb[38].mxu1 }
 0x6ba   : > { %v3287_v36 = vadd.f32 %v6157_v30, %v3286_v35  ;;  %v6440_v39 = vpop.f32.mrb[39].mxu1  ;;  %v3290_v15 = vadd.f32 %v6741_v16, %v3284_v33 }
 0x6bc   : > { %v3294_v38 = vsel %vm1183_vm2, %v3290_v15, 0.0  ;;  %v3291_v42 = vadd.f32 %v6742_v41, %v3287_v36 }
 0x6bd   : > { %3295 = vadd.xlane.f32.xlu0 %v3294_v38 }
 0x6be   : > { %v3297_v45 = vsel %vm1183_vm2, %v3291_v42, 0.0 }
 0x6bf   : > { %3298 = vadd.xlane.f32.xlu1 %v3297_v45  ;;  %v3470_v4 = vpop.f32.mrb[40].mxu1 }
 0x6c0   : > { %v3471_v6 = vadd.f32 %v6167_v1, %v3470_v4  ;;  %v6455_v7 = vpop.f32.mrb[41].mxu1 }
 0x6c1   : > { %v3473_v9 = vpop.f32.mrb[42].mxu1 }
 0x6c2   : > { %v3474_v10 = vadd.f32 %v6167_v1, %v3473_v9  ;;  %v6456_v60 = vpop.f32.mrb[43].mxu1 }
 0x6c4   : > { %v7444_v11 = vpack.c.bf16 %v3474_v10, %v3471_v6 }
 0x6c6   : > { %v3769_v25 = vshrl.u32 %v7444_v11, 16 }
 0x6d0   : > { %3759 = vrot.lane.b32.xlu1 %v7444_v11, %s6770_s1 }
 0x6d4   : > { %3763 = vrot.lane.b32.xlu1 %v7444_v11, %s6769_s28 }
 0x74a   : > { %v3296_v50 = vpop.xlane.xlu0 %3295 }
 0x74b   : > { %v3301_v51 = vmul.f32 0.03125, %v3296_v50 }
 0x74c   : > { %v3299_v52 = vpop.xlane.xlu1 %3298 }
 0x74d   : > { %v3303_v54 = vsub.f32 %v3290_v15, %v3301_v51  ;;  %v3302_v55 = vmul.f32 0.03125, %v3299_v52 }
 0x74f   : > { %v3304_v56 = vsub.f32 %v3291_v42, %v3302_v55  ;;  %v3305_v18 = vmul.f32 %v3303_v54, %v3303_v54 }
 0x750   : > { %v7472_v26 = vpop.permute.xlu1 %3759 }
 0x751   : > { %v3307_v17 = vsel %vm1183_vm2, %v3305_v18, 0.0  ;;  %v3306_v59 = vmul.f32 %v3304_v56, %v3304_v56  ;;  %v3767_v27 = vpack.i.b16 %v7472_v26, %v7444_v11  ;;  %v3770_v28 = vshrl.u32 %v7472_v26, 16 }
 0x752   : > { %3308 = vadd.xlane.f32.xlu0 %v3307_v17 }
 0x753   : > { %v3310_v58 = vsel %vm1183_vm2, %v3306_v59, 0.0  ;;  %v3771_v29 = vpack.i.b16 %v3770_v28, %v3769_v25  ;;  %v3781_v30 = vcombine.high %v3767_v27, %v7090_v44 }
 0x754   : > { %v7481_v33 = vpop.permute.xlu1 %3763 }
 0x755   : > { %v3847_v35 = vcombine.high %v3771_v29, %v7090_v44  ;;  %v3778_v36 = vshrl.u32 %v7481_v33, 16  ;;  %v3795_v39 = vrot.slane %v3781_v30, %v7073_v32  ;;  %v3854_v63 = vrot.slane %v3771_v29, %v7073_v32 }
 0x756   : > { %3311 = vadd.xlane.f32.xlu0 %v3310_v58  ;;  %v3788_v58 = vrot.slane %v3767_v27, %v7073_v32 }
 0x757   : > { %v3861_v41 = vrot.slane %v3847_v35, %v7073_v32 }
 0x76c   : > { %3761 = vrot.lane.b32.xlu0 %v7444_v11, %s6772_s2 }
 0x7df   : > { %v3309_v37 = vpop.xlane.xlu0 %3308 }
 0x7e0   : > { %v3313_v53 = vmul.f32 0.03125, %v3309_v37 }
 0x7e2   : > { %v3315_v12 = vadd.f32 1e-06, %v3313_v53 }
 0x7e3   : > { %v3312_v13 = vpop.xlane.xlu0 %3311 }
 0x7e4   : > { %6697 = vrsqrt.f32 %v3315_v12  ;;  %v3314_v40 = vmul.f32 0.03125, %v3312_v13 }
 0x7e6   : > { %v3316_v57 = vadd.f32 1e-06, %v3314_v40 }
 0x7e7   : > { %v7477_v2 = vpop.permute.xlu0 %3761 }
 0x7e8   : > { %6699 = vrsqrt.f32 %v3316_v57  ;;  %v3777_v31 = vshrl.u32 %v7477_v2, 16  ;;  %v3775_v34 = vpack.i.b16 %v7481_v33, %v7477_v2 }
 0x7ea   : > { %v3796_v16 = vcombine.high %v3775_v34, %v7090_v44  ;;  %v3779_v15 = vpack.i.b16 %v3778_v36, %v3777_v31  ;;  %v3803_v61 = vrot.slane %v3775_v34, %v7073_v32 }
 0x7ec   : > { %v3810_v38 = vrot.slane %v3796_v16, %v7073_v32  ;;  %v3862_v42 = vcombine.high %v3779_v15, %v7090_v44  ;;  %v3811_v1 = vcombine.low %v3788_v58, %v3803_v61  ;;  %v3812_v4 = vcombine.high %v3788_v58, %v3803_v61  ;;  %v6163_v61 = vld [vmem:[%s8016_s27] ss:$0 sm:$0xff] }
 0x7ed   : > { %v3869_v6 = vrot.slane %v3779_v15, %v7073_v32 }
 0x7ee   : > { %v6698_v19 = vpop.eup %6697  ;;  %v3827_v45 = vcombine.low %v3795_v39, %v3810_v38  ;;  %v3828_v47 = vcombine.high %v3795_v39, %v3810_v38  ;;  %v3876_v48 = vrot.slane %v3862_v42, %v7073_v32  ;;  %v3819_v7 = vrot.slane %v3811_v1, %v7092_v46 }
 0x7ef   : > { %v3319_v20 = vmul.f32 %v6698_v19, %v3303_v54  ;;  %v3826_v9 = vrot.slane %v3812_v4, %v7092_v46  ;;  %v3877_v10 = vcombine.low %v3854_v63, %v3869_v6  ;;  %v3878_v60 = vcombine.high %v3854_v63, %v3869_v6 }
 0x7f0   : > { %v3835_v49 = vrot.slane %v3827_v45, %v7092_v46  ;;  %v3842_v50 = vrot.slane %v3828_v47, %v7092_v46  ;;  %v3893_v51 = vcombine.low %v3861_v41, %v3876_v48  ;;  %v3894_v52 = vcombine.high %v3861_v41, %v3876_v48 }
 0x7f1   : > { %v3327_v8 = vmul.f32 %v6161_v0, %v3319_v20  ;;  %v3885_v37 = vrot.slane %v3877_v10, %v7092_v46  ;;  %v3892_v53 = vrot.slane %v3878_v60, %v7092_v46  ;;  %v3913_v12 = vcombine.low %v3819_v7, %v3826_v9 }
 0x7f2   : > { %v6700_v21 = vpop.eup %6699  ;;  %v3963_v54 = vcombine.low %v3835_v49, %v3842_v50  ;;  %v6178_v55 = vcombine.high %v3835_v49, %v3842_v50  ;;  %v3908_v18 = vrot.slane %v3894_v52, %v7092_v46  ;;  %v6176_v13 = vcombine.high %v3819_v7, %v3826_v9 }
 0x7f3   : > { %v3320_v22 = vmul.f32 %v6700_v21, %v3304_v56  ;;  %v7462_v14 = vadd.f32 %v6162_v62, %v3327_v8  ;;  %v3901_v56 = vrot.slane %v3893_v51, %v7092_v46  ;;  %v3920_v40 = vrot.slane %v3913_v12, %v7073_v32 }
 0x7f4   : > { %v3928_v57 = vrot.slane %v6176_v13, %v7073_v32  ;;  %v3938_v19 = vcombine.low %v3885_v37, %v3892_v53  ;;  %v6177_v20 = vcombine.high %v3885_v37, %v3892_v53 }
 0x7f5   : > { %v3328_v23 = vmul.f32 %v6161_v0, %v3320_v22  ;;  %v3988_v17 = vcombine.low %v3901_v56, %v3908_v18  ;;  %v6179_v59 = vcombine.high %v3901_v56, %v3908_v18 }
 0x7f6   : > { %v3929_v0 = vcombine.low %v3920_v40, %v3928_v57  ;;  %v3945_v21 = vrot.slane %v3938_v19, %v7073_v32  ;;  %v3953_v8 = vrot.slane %v6177_v20, %v7073_v32 }
 0x7f7   : > { %v7464_v24 = vadd.f32 %v6162_v62, %v3328_v23  ;;  %v3970_v23 = vrot.slane %v3963_v54, %v7073_v32  ;;  %v3995_v25 = vrot.slane %v3988_v17, %v7073_v32  ;;  %v4003_v27 = vrot.slane %v6179_v59, %v7073_v32 }
 0x7f8   : > { %v3936_v22 = vrot.slane %v3929_v0, %v7092_v46  ;;  %v3954_v62 = vcombine.low %v3945_v21, %v3953_v8 }
 0x7f9   : > { %v3341_v5 = vpack.c.bf16 %v7464_v24, %v7462_v14  ;;  %v4004_v31 = vcombine.low %v3995_v25, %v4003_v27 }
 0x7fa   : > { %v3961_v28 = vrot.slane %v3954_v62, %v7092_v46  ;;  %v4016_v29 = vshrl.u32 %v3936_v22, 16  ;;  %v7516_v36 = vcombine.high %v3936_v22, %v6775_v43 }
 0x7fb   : > { %6446 = vmatmul.mubr.msk.bf16.vlgmr.msra.gmra.mrb[32].mxu0 %vm1183_vm2, %v3341_v5  ;;  %v3978_v5 = vrot.slane %v6178_v55, %v7073_v32  ;;  %v7525_v15 = vrot.slane %v4004_v31, %v7092_v46 }
 0x7fc   : > { %6459 = vmatprep.mubr.msk.bf16.mxu0 %vm6768_vm1, %v6767_v3  ;;  %v4015_v34 = vpack.i.b16 %v3961_v28, %v3936_v22  ;;  %v4017_v35 = vshrl.u32 %v3961_v28, 16  ;;  %v7519_v39 = vcombine.high %v3961_v28, %v6775_v43  ;;  %v4022_v45 = vshrl.u32 %v7516_v36, 16 }
 0x7fd   : > { %v3979_v30 = vcombine.low %v3970_v23, %v3978_v5  ;;  %v4029_v51 = vshrl.u32 %v7525_v15, 16  ;;  %v7546_v55 = vcombine.high %v7525_v15, %v6775_v43 }
 0x7fe   : > { %v4321_v38 = vsel %vm2074_vm3, %v4015_v34, 0  ;;  %v4018_v41 = vpack.i.b16 %v4017_v35, %v4016_v29  ;;  %v4021_v42 = vpack.i.b16 %v7519_v39, %v7516_v36  ;;  %v4023_v47 = vshrl.u32 %v7519_v39, 16 }
 0x7ff   : > { %v7522_v16 = vrot.slane %v3979_v30, %v7092_v46  ;;  %6458 = vmatpush3.bf16.xpose.msra.mxu0 %v4321_v38  ;;  %v4035_v59 = vshrl.u32 %v7546_v55, 16 }
 0x800   : > { %v4367_v49 = vsel %vm2074_vm3, %v4018_v41, 0  ;;  %6469 = vmatprep.subr.bf16.mxu0 %v6767_v3  ;;  %v7542_v54 = vpack.i.b16 %v4023_v47, %v4022_v45 }
 0x801   : > { %v4027_v48 = vpack.i.b16 %v7525_v15, %v7522_v16  ;;  %v4028_v50 = vshrl.u32 %v7522_v16, 16  ;;  %v7540_v52 = vcombine.high %v7522_v16, %v6775_v43  ;;  %6464 = vmatpush3.bf16.xpose.msra.mxu1 %v4367_v49 }
 0x802   : > { %6475 = vmatprep.subr.bf16.mxu1 %v6767_v3  ;;  %v4459_v36 = vsel %vm2074_vm3, %v7542_v54, 0 }
 0x803   : > { %v7549_v56 = vpack.i.b16 %v4029_v51, %v4028_v50  ;;  %v4034_v18 = vshrl.u32 %v7540_v52, 16  ;;  %v4033_v17 = vpack.i.b16 %v7546_v55, %v7540_v52  ;;  %v4505_v54 = vsel %vm2074_vm3, %v4027_v48, 0 }
 0x805   : > { %v7555_v58 = vpack.i.b16 %v4035_v59, %v4034_v18 }
 0x8ce   : > { %v3398_v63 = vpop.f32.mrb[32].mxu0 }
 0x8cf   : > { %v6447_v1 = vpop.f32.mrb[33].mxu0  ;;  %v3399_v6 = vadd.f32 %v6163_v61, %v3398_v63 }
 0x8d0   : > { %v3401_v4 = vpop.f32.mrb[34].mxu0 }
 0x8d1   : > { %v3402_v7 = vadd.f32 %v6163_v61, %v3401_v4  ;;  %v6448_v9 = vpop.f32.mrb[35].mxu0 }
 0x8d3   : > { %v3477_v10 = vpack.c.bf16 %v3402_v7, %v3399_v6 }
 0x8d5   : > { %3481 = vrot.lane.b32.xlu0 %v3477_v10, %s6772_s2  ;;  %3479 = vrot.lane.b32.xlu1 %v3477_v10, %s6770_s1  ;;  %v3489_v53 = vshrl.u32 %v3477_v10, 16  ;;  %s8017_s2 = sld [smem:[#allocation11_spill]] }
 0x8d9   : > { %3483 = vrot.lane.b32.xlu1 %v3477_v10, %s6769_s28 }
 0x947   : > { %v3480_v60 = vpop.permute.xlu1 %3479  ;;  %v3482_v12 = vpop.permute.xlu0 %3481 }
 0x948   : > { %v3490_v37 = vshrl.u32 %v3480_v60, 16  ;;  %v3487_v13 = vpack.i.b16 %v3480_v60, %v3477_v10  ;;  %v3497_v20 = vshrl.u32 %v3482_v12, 16 }
 0x94a   : > { %v3491_v40 = vpack.i.b16 %v3490_v37, %v3489_v53  ;;  %v3508_v21 = vrot.slane %v3487_v13, %v7073_v32  ;;  %v3501_v5 = vcombine.high %v3487_v13, %v7090_v44 }
 0x94b   : > { %v3484_v57 = vpop.permute.xlu1 %3483 }
 0x94c   : > { %v3495_v19 = vpack.i.b16 %v3484_v57, %v3482_v12  ;;  %v3498_v0 = vshrl.u32 %v3484_v57, 16  ;;  %v3567_v62 = vcombine.high %v3491_v40, %v7090_v44  ;;  %v3574_v28 = vrot.slane %v3491_v40, %v7073_v32 }
 0x94d   : > { %v3515_v49 = vrot.slane %v3501_v5, %v7073_v32 }
 0x94e   : > { %v3516_v8 = vcombine.high %v3495_v19, %v7090_v44  ;;  %v3523_v22 = vrot.slane %v3495_v19, %v7073_v32  ;;  %v3499_v23 = vpack.i.b16 %v3498_v0, %v3497_v20  ;;  %v3581_v38 = vrot.slane %v3567_v62, %v7073_v32 }
 0x950   : > { %v3531_v25 = vcombine.low %v3508_v21, %v3523_v22  ;;  %v3532_v27 = vcombine.high %v3508_v21, %v3523_v22  ;;  %v3582_v29 = vcombine.high %v3499_v23, %v7090_v44  ;;  %v3589_v30 = vrot.slane %v3499_v23, %v7073_v32 }
 0x951   : > { %v3530_v31 = vrot.slane %v3516_v8, %v7073_v32 }
 0x952   : > { %v3539_v34 = vrot.slane %v3531_v25, %v7092_v46  ;;  %v3546_v35 = vrot.slane %v3532_v27, %v7092_v46  ;;  %v3596_v41 = vrot.slane %v3582_v29, %v7073_v32  ;;  %v3597_v45 = vcombine.low %v3574_v28, %v3589_v30 }
 0x953   : > { %v3598_v47 = vcombine.high %v3574_v28, %v3589_v30  ;;  %v3547_v1 = vcombine.low %v3515_v49, %v3530_v31  ;;  %v3548_v4 = vcombine.high %v3515_v49, %v3530_v31  ;;  %v4413_v27 = vsel %vm2074_vm3, %v4021_v42, 0 }
 0x954   : > { %v3633_v50 = vcombine.low %v3539_v34, %v3546_v35  ;;  %v6172_v51 = vcombine.high %v3539_v34, %v3546_v35  ;;  %v3605_v18 = vrot.slane %v3597_v45, %v7092_v46  ;;  %v3613_v61 = vcombine.low %v3581_v38, %v3596_v41 }
 0x955   : > { %v3612_v59 = vrot.slane %v3598_v47, %v7092_v46  ;;  %v3614_v63 = vcombine.high %v3581_v38, %v3596_v41  ;;  %v3555_v40 = vrot.slane %v3547_v1, %v7092_v46  ;;  %v3562_v57 = vrot.slane %v3548_v4, %v7092_v46 }
 0x956   : > { %v3640_v6 = vrot.slane %v3633_v50, %v7073_v32  ;;  %v3648_v7 = vrot.slane %v6172_v51, %v7073_v32  ;;  %v3621_v37 = vrot.slane %v3613_v61, %v7092_v46  ;;  %v4551_v51 = vsel %vm2074_vm3, %v7549_v56, 0 }
 0x957   : > { %v3658_v9 = vcombine.low %v3605_v18, %v3612_v59  ;;  %v6173_v10 = vcombine.high %v3605_v18, %v3612_v59  ;;  %v3628_v53 = vrot.slane %v3614_v63, %v7092_v46  ;;  %v3683_v22 = vcombine.low %v3555_v40, %v3562_v57 }
 0x958   : > { %v3649_v60 = vcombine.low %v3640_v6, %v3648_v7  ;;  %v6174_v62 = vcombine.high %v3555_v40, %v3562_v57  ;;  %v4597_v56 = vsel %vm2074_vm3, %v4033_v17, 0  ;;  %v4643_v63 = vsel %vm2074_vm3, %v7555_v58, 0  ;;  %v6239_v58 = vld [vmem:[%s8017_s2] sm:$0xff]  }
 0x959   : > { %v3665_v12 = vrot.slane %v3658_v9, %v7073_v32  ;;  %v3673_v13 = vrot.slane %v6173_v10, %v7073_v32  ;;  %v3708_v0 = vcombine.low %v3621_v37, %v3628_v53  ;;  %v6175_v21 = vcombine.high %v3621_v37, %v3628_v53 }
 0x95a   : > { %v3656_v19 = vrot.slane %v3649_v60, %v7092_v46  ;;  %v3690_v34 = vrot.slane %v3683_v22, %v7073_v32  ;;  %v3698_v35 = vrot.slane %v6174_v62, %v7073_v32  ;;  %v6240_v6 = vunpack.c.l.bf16 %v6239_v58 }
 0x95b   : > { %v3674_v20 = vcombine.low %v3665_v12, %v3673_v13  ;;  %v3715_v28 = vrot.slane %v3708_v0, %v7073_v32  ;;  %v3723_v29 = vrot.slane %v6175_v21, %v7073_v32 }
 0x95c   : > { %v3736_v5 = vshrl.u32 %v3656_v19, 16  ;;  %v3657_v39 = vcombine.high %v3656_v19, %v6775_v43  ;;  %v3699_v41 = vcombine.low %v3690_v34, %v3698_v35 }
 0x95d   : > { %v3681_v8 = vrot.slane %v3674_v20, %v7092_v46  ;;  %v3724_v42 = vcombine.low %v3715_v28, %v3723_v29 }
 0x95e   : > { %v3742_v47 = vshrl.u32 %v3657_v39, 16  ;;  %v3706_v18 = vrot.slane %v3699_v41, %v7092_v46 }
 0x95f   : > { %v3735_v23 = vpack.i.b16 %v3681_v8, %v3656_v19  ;;  %v3737_v25 = vshrl.u32 %v3681_v8, 16  ;;  %v3682_v31 = vcombine.high %v3681_v8, %v6775_v43  ;;  %v3731_v50 = vrot.slane %v3724_v42, %v7092_v46 }
 0x960   : > { %v3748_v48 = vshrl.u32 %v3706_v18, 16  ;;  %v3707_v1 = vcombine.high %v3706_v18, %v6775_v43 }
 0x961   : > { %6460 = vmatmul.mubr.msk.bf16.vlgmr.msra.gmra.mrb[36].mxu0 %vm2074_vm3, %v3735_v23  ;;  %v3738_v30 = vpack.i.b16 %v3737_v25, %v3736_v5  ;;  %v3743_v38 = vshrl.u32 %v3682_v31, 16  ;;  %v3741_v45 = vpack.i.b16 %v3682_v31, %v3657_v39  ;;  %v3749_v16 = vshrl.u32 %v3731_v50, 16 }
 0x962   : > { %6470 = vmatpush3.bf16.xpose.msra.mxu0 %v4413_v27  ;;  %6471 = vmatprep.mubr.msk.bf16.mxu0 %vm6768_vm1, %v6767_v3  ;;  %v3747_v15 = vpack.i.b16 %v3731_v50, %v3706_v18  ;;  %v3732_v61 = vcombine.high %v3731_v50, %v6775_v43  ;;  %v3754_v17 = vshrl.u32 %v3707_v1, 16 }
 0x963   : > { %6466 = vmatmul.mubr.msk.bf16.vlgmr.msra.gmra.mrb[44].mxu1 %vm2074_vm3, %v3738_v30  ;;  %6481 = vmatprep.subr.bf16.mxu0 %v6767_v3  ;;  %v3744_v49 = vpack.i.b16 %v3743_v38, %v3742_v47  ;;  %v3750_v59 = vpack.i.b16 %v3749_v16, %v3748_v48  ;;  %v6241_v30 = vunpack.c.h.bf16 %v6239_v58 }
 0x964   : > { %6476 = vmatpush3.bf16.xpose.msra.mxu1 %v4459_v36  ;;  %6477 = vmatprep.mubr.msk.bf16.mxu1 %vm6768_vm1, %v6767_v3  ;;  %v3755_v52 = vshrl.u32 %v3732_v61, 16  ;;  %v3753_v55 = vpack.i.b16 %v3732_v61, %v3707_v1 }
 0x965   : > { %6487 = vmatprep.subr.bf16.mxu1 %v6767_v3 }
 0x966   : > { %v3756_v4 = vpack.i.b16 %v3755_v52, %v3754_v17 }
 0x969   : > { %6472 = vmatmul.mubr.msk.bf16.vlgmr.msra.gmra.mrb[40].mxu0 %vm2074_vm3, %v3741_v45 }
 0x96a   : > { %6482 = vmatpush3.bf16.xpose.msra.mxu0 %v4505_v54  ;;  %6483 = vmatprep.mubr.msk.bf16.mxu0 %vm6768_vm1, %v6767_v3 }
 0x96b   : > { %6478 = vmatmul.mubr.msk.bf16.vlgmr.msra.gmra.mrb[48].mxu1 %vm2074_vm3, %v3744_v49  ;;  %6493 = vmatprep.subr.bf16.mxu0 %v6767_v3 }
 0x96c   : > { %6488 = vmatpush3.bf16.xpose.msra.mxu1 %v4551_v51  ;;  %6489 = vmatprep.mubr.msk.bf16.mxu1 %vm6768_vm1, %v6767_v3 }
 0x96d   : > { %6499 = vmatprep.subr.bf16.mxu1 %v6767_v3 }
 0x971   : > { %6484 = vmatmul.mubr.msk.bf16.vlgmr.msra.gmra.mrb[44].mxu0 %vm2074_vm3, %v3747_v15 }
 0x972   : > { %6494 = vmatpush3.bf16.xpose.msra.mxu0 %v4597_v56  ;;  %6495 = vmatprep.mubr.msk.bf16.mxu0 %vm6768_vm1, %v6767_v3 }
 0x973   : > { %6490 = vmatmul.mubr.msk.bf16.vlgmr.msra.gmra.mrb[52].mxu1 %vm2074_vm3, %v3750_v59  ;;  %6505 = vmatprep.subr.bf16.mxu0 %v6767_v3 }
 0x974   : > { %6500 = vmatpush3.bf16.xpose.msra.mxu1 %v4643_v63  ;;  %6501 = vmatprep.mubr.msk.bf16.mxu1 %vm6768_vm1, %v6767_v3 }
 0x975   : > { %6511 = vmatprep.subr.bf16.mxu1 %v6767_v3 }
 0x979   : > { %6496 = vmatmul.mubr.msk.bf16.vlgmr.msra.gmra.mrb[48].mxu0 %vm2074_vm3, %v3753_v55 }
 0x97a   : > { %6507 = vmatprep.mubr.msk.bf16.mxu0 %vm6768_vm1, %v6767_v3 }
 0x97b   : > { %6502 = vmatmul.mubr.msk.bf16.vlgmr.msra.gmra.mrb[56].mxu1 %vm2074_vm3, %v3756_v4 }
 0x97c   : > { %6513 = vmatprep.mubr.msk.bf16.mxu1 %vm6768_vm1, %v6767_v3 }
 0xa34   : > { %v4357_v7 = vpop.f32.mrb[36].mxu0 }
 0xa35   : > { %v4687_v9 = vadd.f32 %v6240_v6, %v4357_v7  ;;  %v6461_v10 = vpop.f32.mrb[37].mxu0 }
 0xa36   : > { %v4360_v60 = vpop.f32.mrb[38].mxu0  ;;  %v4403_v37 = vpop.f32.mrb[44].mxu1 }
 0xa37   : > { %v4688_v53 = vadd.f32 %v6240_v6, %v4403_v37  ;;  %v6462_v12 = vpop.f32.mrb[39].mxu0  ;;  %v6467_v13 = vpop.f32.mrb[45].mxu1  ;;  %v4695_v40 = vsel %vm2074_vm3, %v4687_v9, -inf }
 0xa38   : > { %4696 = vmax.xlane.f32.xlu0 %v4695_v40  ;;  %v4406_v57 = vpop.f32.mrb[46].mxu1 }
 0xa39   : > { %v6468_v19 = vpop.f32.mrb[47].mxu1  ;;  %v4698_v20 = vsel %vm2074_vm3, %v4688_v53, -inf }
 0xa3a   : > { %4699 = vmax.xlane.f32.xlu1 %v4698_v20 }
 0xa3c   : > { %v4449_v0 = vpop.f32.mrb[40].mxu0 }
 0xa3d   : > { %v7654_v21 = vadd.f32 %v6240_v6, %v4449_v0  ;;  %v6473_v8 = vpop.f32.mrb[41].mxu0 }
 0xa3e   : > { %v4452_v22 = vpop.f32.mrb[42].mxu0  ;;  %v4495_v62 = vpop.f32.mrb[48].mxu1 }
 0xa3f   : > { %v7656_v23 = vadd.f32 %v6240_v6, %v4495_v62  ;;  %v6474_v5 = vpop.f32.mrb[43].mxu0  ;;  %v6479_v25 = vpop.f32.mrb[49].mxu1  ;;  %v4701_v27 = vsel %vm2074_vm3, %v7654_v21, -inf }
 0xa40   : > { %4702 = vmax.xlane.f32.xlu0 %v4701_v27  ;;  %v4498_v28 = vpop.f32.mrb[50].mxu1 }
 0xa41   : > { %v6480_v29 = vpop.f32.mrb[51].mxu1  ;;  %v4704_v31 = vsel %vm2074_vm3, %v7656_v23, -inf }
 0xa44   : > { %v4541_v34 = vpop.f32.mrb[44].mxu0  ;;  %4705 = vmax.xlane.f32.xlu0 %v4704_v31 }
 0xa45   : > { %v4691_v35 = vadd.f32 %v6241_v30, %v4541_v34  ;;  %v6485_v36 = vpop.f32.mrb[45].mxu0 }
 0xa46   : > { %v4544_v39 = vpop.f32.mrb[46].mxu0  ;;  %v4587_v42 = vpop.f32.mrb[52].mxu1 }
 0xa47   : > { %v4692_v38 = vadd.f32 %v6241_v30, %v4587_v42  ;;  %v6486_v41 = vpop.f32.mrb[47].mxu0  ;;  %v6491_v45 = vpop.f32.mrb[53].mxu1  ;;  %v4707_v47 = vsel %vm2074_vm3, %v4691_v35, -inf }
 0xa48   : > { %4708 = vmax.xlane.f32.xlu1 %v4707_v47  ;;  %v4590_v54 = vpop.f32.mrb[54].mxu1 }
 0xa49   : > { %v6492_v49 = vpop.f32.mrb[55].mxu1  ;;  %v4710_v50 = vsel %vm2074_vm3, %v4692_v38, -inf }
 0xa4a   : > { %4711 = vmax.xlane.f32.xlu0 %v4710_v50 }
 0xa4c   : > { %v4633_v51 = vpop.f32.mrb[48].mxu0 }
 0xa4d   : > { %v4693_v18 = vadd.f32 %v6241_v30, %v4633_v51  ;;  %v6497_v16 = vpop.f32.mrb[49].mxu0 }
 0xa4e   : > { %v4636_v15 = vpop.f32.mrb[50].mxu0  ;;  %v4679_v48 = vpop.f32.mrb[56].mxu1 }
 0xa4f   : > { %v4694_v56 = vadd.f32 %v6241_v30, %v4679_v48  ;;  %v6498_v59 = vpop.f32.mrb[51].mxu0  ;;  %v6503_v61 = vpop.f32.mrb[57].mxu1  ;;  %v4713_v63 = vsel %vm2074_vm3, %v4693_v18, -inf }
 0xa50   : > { %4714 = vmax.xlane.f32.xlu1 %v4713_v63  ;;  %v4682_v1 = vpop.f32.mrb[58].mxu1 }
 0xa51   : > { %v6504_v52 = vpop.f32.mrb[59].mxu1  ;;  %v4716_v55 = vsel %vm2074_vm3, %v4694_v56, -inf }
 0xa52   : > { %4717 = vmax.xlane.f32.xlu0 %v4716_v55 }
 0xa61   : > { %4037 = vrot.lane.b32.xlu1 %v7444_v11, %s6771_s5 }
 0xac5   : > { %v4697_v17 = vpop.xlane.xlu0 %4696 }
 0xac6   : > { %v4719_v4 = vsub.f32 %v4687_v9, %v4697_v17 }
 0xac7   : > { %v4700_v58 = vpop.xlane.xlu1 %4699 }
 0xac8   : > { %v4727_v6 = vmul.f32 1.442695, %v4719_v4  ;;  %v4720_v7 = vsub.f32 %v4688_v53, %v4700_v58 }
 0xaca   : > { %6701 = vpow2.f32 %v4727_v6  ;;  %v4729_v10 = vmul.f32 1.442695, %v4720_v7 }
 0xacc   : > { %6703 = vpow2.f32 %v4729_v10 }
 0xacd   : > { %v4703_v11 = vpop.xlane.xlu0 %4702 }
 0xace   : > { %v4721_v40 = vsub.f32 %v7654_v21, %v4703_v11 }
 0xad0   : > { %v4731_v20 = vmul.f32 1.442695, %v4721_v40 }
 0xad1   : > { %v4706_v9 = vpop.xlane.xlu0 %4705 }
 0xad2   : > { %v4722_v57 = vsub.f32 %v7656_v23, %v4706_v9  ;;  %6705 = vpow2.f32 %v4731_v20 }
 0xad4   : > { %v7668_v60 = vpop.eup %6701  ;;  %v4733_v22 = vmul.f32 1.442695, %v4722_v57 }
 0xad5   : > { %v4743_v37 = vsel %vm2074_vm3, %v7668_v60, 0.0  ;;  %v4709_v53 = vpop.xlane.xlu1 %4708 }
 0xad6   : > { %v7672_v12 = vpop.eup %6703  ;;  %4744 = vadd.xlane.f32.xlu1 %v4743_v37  ;;  %v4723_v0 = vsub.f32 %v4691_v35, %v4709_v53  ;;  %6707 = vpow2.f32 %v4733_v22 }
 0xad7   : > { %v4746_v13 = vsel %vm2074_vm3, %v7672_v12, 0.0  ;;  %v4712_v8 = vpop.xlane.xlu0 %4711 }
 0xad8   : > { %4747 = vadd.xlane.f32.xlu0 %v4746_v13  ;;  %v4724_v5 = vsub.f32 %v4692_v38, %v4712_v8 }
 0xadc   : > { %v7684_v28 = vpop.eup %6705 }
 0xadd   : > { %v4715_v19 = vpop.xlane.xlu1 %4714  ;;  %v4749_v29 = vsel %vm2074_vm3, %v7684_v28, 0.0 }
 0xade   : > { %v4725_v62 = vsub.f32 %v4693_v18, %v4715_v19 }
 0xae0   : > { %v4739_v25 = vmul.f32 1.442695, %v4725_v62  ;;  %v7686_v23 = vpop.eup %6707 }
 0xae1   : > { %v4752_v31 = vsel %vm2074_vm3, %v7686_v23, 0.0  ;;  %v4038_v45 = vpop.permute.xlu1 %4037 }
 0xae2   : > { %v4049_v15 = vshrl.u32 %v4038_v45, 16 }
 0xae7   : > { %4041 = vrot.lane.b32.xlu1 %v7477_v2, %s6771_s5  ;;  %v4735_v2 = vmul.f32 1.442695, %v4723_v0 }
 0xae9   : > { %6709 = vpow2.f32 %v4735_v2 }
 0xaea   : > { %6711 = vpow2.f32 %v4739_v25 }
 0xaeb   : > { %4043 = vrot.lane.b32.xlu1 %v7481_v33, %s6771_s5  ;;  %v4718_v33 = vpop.xlane.xlu0 %4717 }
 0xaec   : > { %v4726_v27 = vsub.f32 %v4694_v56, %v4718_v33 }
 0xaee   : > { %4039 = vrot.lane.b32.xlu0 %v7472_v26, %s6771_s5  ;;  %v4737_v26 = vmul.f32 1.442695, %v4724_v5  ;;  %v4741_v21 = vmul.f32 1.442695, %v4726_v27 }
 0xaf0   : > { %6713 = vpow2.f32 %v4737_v26 }
 0xaf1   : > { %6715 = vpow2.f32 %v4741_v21 }
 0xaf3   : > { %v7690_v30 = vpop.eup %6709 }
 0xaf4   : > { %v7694_v34 = vpop.eup %6711  ;;  %v4755_v35 = vsel %vm2074_vm3, %v7690_v30, 0.0 }
 0xaf5   : > { %v4761_v39 = vsel %vm2074_vm3, %v7694_v34, 0.0 }
 0xafa   : > { %v7698_v36 = vpop.eup %6713 }
 0xafb   : > { %v4758_v42 = vsel %vm2074_vm3, %v7698_v36, 0.0  ;;  %v7704_v38 = vpop.eup %6715 }
 0xafc   : > { %v4764_v41 = vsel %vm2074_vm3, %v7704_v38, 0.0 }
 0xb0d   : > { %4750 = vadd.xlane.f32.xlu0 %v4749_v29 }
 0xb0f   : > { %4753 = vadd.xlane.f32.xlu1 %v4752_v31 }
 0xb11   : > { %4756 = vadd.xlane.f32.xlu0 %v4755_v35 }
 0xb13   : > { %4762 = vadd.xlane.f32.xlu1 %v4761_v39 }
 0xb15   : > { %4759 = vadd.xlane.f32.xlu0 %v4758_v42 }
 0xb19   : > { %4765 = vadd.xlane.f32.xlu0 %v4764_v41 }
 0xb63   : > { %v4745_v47 = vpop.xlane.xlu1 %4744 }
 0xb64   : > { %6717 = vrcp.f32 %v4745_v47 }
 0xb65   : > { %v4748_v54 = vpop.xlane.xlu0 %4747 }
 0xb66   : > { %6719 = vrcp.f32 %v4748_v54 }
 0xb67   : > { %v4042_v49 = vpop.permute.xlu1 %4041 }
 0xb68   : > { %v4057_v56 = vshrl.u32 %v4042_v49, 16 }
 0xb69   : > { %v4040_v50 = vpop.permute.xlu0 %4039 }
 0xb6a   : > { %v4050_v51 = vshrl.u32 %v4040_v50, 16  ;;  %v7708_v18 = vpack.i.b16 %v4040_v50, %v4038_v45 }
 0xb6b   : > { %v4044_v16 = vpop.permute.xlu1 %4043 }
 0xb6c   : > { %v7710_v48 = vpack.i.b16 %v4044_v16, %v4042_v49  ;;  %v4058_v59 = vshrl.u32 %v4044_v16, 16  ;;  %v7712_v61 = vpack.i.b16 %v4050_v51, %v4049_v15  ;;  %v4068_v63 = vrot.slane %v7708_v18, %v7073_v32 }
 0xb6e   : > { %v4059_v1 = vpack.i.b16 %v4058_v59, %v4057_v56  ;;  %v4083_v52 = vrot.slane %v7710_v48, %v7073_v32  ;;  %v4134_v4 = vrot.slane %v7712_v61, %v7073_v32  ;;  %v6718_v2 = vpop.eup %6717  ;;  %v4127_v16 = vcombine.high %v7712_v61, %v7090_v44 }
 0xb6f   : > { %v4775_v27 = vmul.f32 %v6718_v2, %v7668_v60  ;;  %v4061_v59 = vcombine.high %v7708_v18, %v7090_v44 }
 0xb70   : > { %v4091_v55 = vcombine.low %v4068_v63, %v4083_v52  ;;  %v4092_v17 = vcombine.high %v4068_v63, %v4083_v52  ;;  %v4149_v58 = vrot.slane %v4059_v1, %v7073_v32  ;;  %v6720_v25 = vpop.eup %6719  ;;  %v4142_v49 = vcombine.high %v4059_v1, %v7090_v44 }
 0xb71   : > { %v4776_v39 = vmul.f32 %v6720_v25, %v7672_v12  ;;  %v4783_v51 = vpack.c.bf16 %v4775_v27, %v4775_v27  ;;  %v4076_v12 = vcombine.high %v7710_v48, %v7090_v44  ;;  %v4141_v61 = vrot.slane %v4127_v16, %v7073_v32 }
 0xb72   : > { %v4099_v6 = vrot.slane %v4091_v55, %v7092_v46  ;;  %v4106_v7 = vrot.slane %v4092_v17, %v7092_v46  ;;  %v4157_v10 = vcombine.low %v4134_v4, %v4149_v58  ;;  %v4158_v37 = vcombine.high %v4134_v4, %v4149_v58 }
 0xb73   : > { %v4784_v56 = vpack.c.bf16 %v4776_v39, %v4776_v39  ;;  %v4156_v63 = vrot.slane %v4142_v49, %v7073_v32  ;;  %v4090_v1 = vrot.slane %v4076_v12, %v7073_v32  ;;  %v4075_v44 = vrot.slane %v4061_v59, %v7073_v32 }
 0xb74   : > { %v4193_v13 = vcombine.low %v4099_v6, %v4106_v7  ;;  %v6180_v11 = vcombine.high %v4099_v6, %v4106_v7  ;;  %v4165_v9 = vrot.slane %v4157_v10, %v7092_v46  ;;  %v4172_v53 = vrot.slane %v4158_v37, %v7092_v46 }
 0xb75   : > { %v4173_v18 = vcombine.low %v4141_v61, %v4156_v63  ;;  %v4174_v52 = vcombine.high %v4141_v61, %v4156_v63  ;;  %v4107_v55 = vcombine.low %v4075_v44, %v4090_v1  ;;  %v4108_v17 = vcombine.high %v4075_v44, %v4090_v1 }
 0xb76   : > { %v4200_v40 = vrot.slane %v4193_v13, %v7073_v32  ;;  %v4208_v57 = vrot.slane %v6180_v11, %v7073_v32  ;;  %v4218_v19 = vcombine.low %v4165_v9, %v4172_v53  ;;  %v6181_v20 = vcombine.high %v4165_v9, %v4172_v53 }
 0xb77   : > { %v4181_v4 = vrot.slane %v4173_v18, %v7092_v46  ;;  %v4188_v58 = vrot.slane %v4174_v52, %v7092_v46  ;;  %v4115_v6 = vrot.slane %v4107_v55, %v7092_v46  ;;  %v4122_v7 = vrot.slane %v4108_v17, %v7092_v46 }
 0xb78   : > { %v4209_v0 = vcombine.low %v4200_v40, %v4208_v57  ;;  %v4225_v8 = vrot.slane %v4218_v19, %v7073_v32  ;;  %v4233_v22 = vrot.slane %v6181_v20, %v7073_v32 }
 0xb79   : > { %v4268_v10 = vcombine.low %v4181_v4, %v4188_v58  ;;  %v6183_v37 = vcombine.high %v4181_v4, %v4188_v58  ;;  %v4243_v13 = vcombine.low %v4115_v6, %v4122_v7  ;;  %v6182_v11 = vcombine.high %v4115_v6, %v4122_v7 }
 0xb7a   : > { %v4216_v62 = vrot.slane %v4209_v0, %v7092_v46  ;;  %v4234_v5 = vcombine.low %v4225_v8, %v4233_v22 }
 0xb7b   : > { %v4275_v9 = vrot.slane %v4268_v10, %v7073_v32  ;;  %v4283_v53 = vrot.slane %v6183_v37, %v7073_v32  ;;  %v4250_v40 = vrot.slane %v4243_v13, %v7073_v32  ;;  %v4258_v57 = vrot.slane %v6182_v11, %v7073_v32 }
 0xb7c   : > { %v4217_v33 = vcombine.high %v4216_v62, %v6775_v43  ;;  %v4241_v26 = vrot.slane %v4234_v5, %v7092_v46  ;;  %v4296_v29 = vshrl.u32 %v4216_v62, 16 }
 0xb7d   : > { %v4284_v0 = vcombine.low %v4275_v9, %v4283_v53  ;;  %v4259_v22 = vcombine.low %v4250_v40, %v4258_v57 }
 0xb7e   : > { %v4295_v21 = vpack.i.b16 %v4241_v26, %v4216_v62  ;;  %v4297_v31 = vshrl.u32 %v4241_v26, 16  ;;  %v4242_v35 = vcombine.high %v4241_v26, %v6775_v43  ;;  %v4302_v42 = vshrl.u32 %v4217_v33, 16 }
 0xb7f   : > { %v4291_v62 = vrot.slane %v4284_v0, %v7092_v46  ;;  %v4266_v5 = vrot.slane %v4259_v22, %v7092_v46 }
 0xb80   : > { %v4795_v41 = vsel %vm2552_vm4, %v4295_v21, 0  ;;  %v4298_v45 = vpack.i.b16 %v4297_v31, %v4296_v29  ;;  %v4301_v47 = vpack.i.b16 %v4242_v35, %v4217_v33  ;;  %v4303_v54 = vshrl.u32 %v4242_v35, 16 }
 0xb81   : > { %6506 = vmatpush3.bf16.msra.mxu0 %v4795_v41  ;;  %v4309_v25 = vshrl.u32 %v4291_v62, 16  ;;  %v4307_v29 = vpack.i.b16 %v4291_v62, %v4266_v5  ;;  %v4308_v31 = vshrl.u32 %v4266_v5, 16 }
 0xb82   : > { %v4841_v50 = vsel %vm2552_vm4, %v4298_v45, 0  ;;  %6517 = vmatprep.subr.bf16.mxu0 %v6767_v3  ;;  %v4304_v60 = vpack.i.b16 %v4303_v54, %v4302_v42  ;;  %v4887_v15 = vsel %vm2552_vm4, %v4301_v47, 0  ;;  %v4292_v45 = vcombine.high %v4291_v62, %v6775_v43 }
 0xb83   : > { %6512 = vmatpush3.bf16.msra.mxu1 %v4841_v50  ;;  %v4310_v41 = vpack.i.b16 %v4309_v25, %v4308_v31  ;;  %v4979_v54 = vsel %vm2552_vm4, %v4307_v29, 0 }
 0xb84   : > { %6508 = vmatmul.mubr.msk.bf16.vlgmr.msra.gmra.mrb[52].mxu0 %vm2074_vm3, %v4783_v51  ;;  %6523 = vmatprep.subr.bf16.mxu1 %v6767_v3  ;;  %v4933_v48 = vsel %vm2552_vm4, %v4304_v60, 0  ;;  %v4315_v51 = vshrl.u32 %v4292_v45, 16 }
 0xb85   : > { %6518 = vmatpush3.bf16.msra.mxu0 %v4887_v15  ;;  %6519 = vmatprep.mubr.msk.bf16.mxu0 %vm6768_vm1, %v6767_v3 }
 0xb86   : > { %6514 = vmatmul.mubr.msk.bf16.vlgmr.msra.gmra.mrb[60].mxu1 %vm2074_vm3, %v4784_v56  ;;  %6529 = vmatprep.subr.bf16.mxu0 %v6767_v3 }
 0xb87   : > { %6524 = vmatpush3.bf16.msra.mxu1 %v4933_v48  ;;  %6525 = vmatprep.mubr.msk.bf16.mxu1 %vm6768_vm1, %v6767_v3 }
 0xb88   : > { %6535 = vmatprep.subr.bf16.mxu1 %v6767_v3 }
 0xb9a   : > { %v4751_v19 = vpop.xlane.xlu0 %4750 }
 0xb9b   : > { %6721 = vrcp.f32 %v4751_v19 }
 0xb9c   : > { %v4754_v20 = vpop.xlane.xlu1 %4753 }
 0xb9d   : > { %6723 = vrcp.f32 %v4754_v20 }
 0xb9e   : > { %v4757_v8 = vpop.xlane.xlu0 %4756 }
 0xb9f   : > { %6725 = vrcp.f32 %v4757_v8 }
 0xba0   : > { %v4763_v33 = vpop.xlane.xlu1 %4762 }
 0xba2   : > { %v4760_v2 = vpop.xlane.xlu0 %4759 }
 0xba3   : > { %6727 = vrcp.f32 %v4760_v2 }
 0xba4   : > { %6729 = vrcp.f32 %v4763_v33 }
 0xba5   : > { %v6722_v26 = vpop.eup %6721 }
 0xba6   : > { %v4777_v27 = vmul.f32 %v6722_v26, %v7684_v28  ;;  %v4766_v21 = vpop.xlane.xlu0 %4765  ;;  %v4267_v28 = vcombine.high %v4266_v5, %v6775_v43 }
 0xba7   : > { %v6724_v35 = vpop.eup %6723  ;;  %6731 = vrcp.f32 %v4766_v21 }
 0xba8   : > { %v4778_v39 = vmul.f32 %v6724_v35, %v7686_v23  ;;  %v4785_v42 = vpack.c.bf16 %v4777_v27, %v4777_v27  ;;  %v5025_v23 = vsel %vm2552_vm4, %v4310_v41, 0  ;;  %v4313_v16 = vpack.i.b16 %v4292_v45, %v4267_v28 }
 0xba9   : > { %v6726_v47 = vpop.eup %6725  ;;  %v4314_v12 = vshrl.u32 %v4267_v28, 16 }
 0xbaa   : > { %6520 = vmatmul.mubr.msk.bf16.vlgmr.msra.gmra.mrb[56].mxu0 %vm2074_vm3, %v4785_v42  ;;  %v4786_v49 = vpack.c.bf16 %v4778_v39, %v4778_v39  ;;  %v4779_v50 = vmul.f32 %v6726_v47, %v7690_v30  ;;  %v5071_v59 = vsel %vm2552_vm4, %v4313_v16, 0 }
 0xbab   : > { %6530 = vmatpush3.bf16.msra.mxu0 %v4979_v54  ;;  %6531 = vmatprep.mubr.msk.bf16.mxu0 %vm6768_vm1, %v6767_v3  ;;  %v4316_v30 = vpack.i.b16 %v4315_v51, %v4314_v12 }
 0xbac   : > { %6526 = vmatmul.mubr.msk.bf16.vlgmr.msra.gmra.mrb[64].mxu1 %vm2074_vm3, %v4786_v49  ;;  %6541 = vmatprep.subr.bf16.mxu0 %v6767_v3  ;;  %v4787_v15 = vpack.c.bf16 %v4779_v50, %v4779_v50 }
 0xbad   : > { %v6728_v60 = vpop.eup %6727  ;;  %6536 = vmatpush3.bf16.msra.mxu1 %v5025_v23  ;;  %6537 = vmatprep.mubr.msk.bf16.mxu1 %vm6768_vm1, %v6767_v3 }
 0xbae   : > { %v4780_v43 = vmul.f32 %v6728_v60, %v7698_v36  ;;  %6547 = vmatprep.subr.bf16.mxu1 %v6767_v3  ;;  %v6730_v56 = vpop.eup %6729  ;;  %v5117_v36 = vsel %vm2552_vm4, %v4316_v30, 0 }
 0xbaf   : > { %v4781_v61 = vmul.f32 %v6730_v56, %v7694_v34 }
 0xbb0   : > { %v4788_v63 = vpack.c.bf16 %v4780_v43, %v4780_v43 }
 0xbb1   : > { %v6732_v48 = vpop.eup %6731  ;;  %v4789_v44 = vpack.c.bf16 %v4781_v61, %v4781_v61 }
 0xbb2   : > { %6532 = vmatmul.mubr.msk.bf16.vlgmr.msra.gmra.mrb[60].mxu0 %vm2074_vm3, %v4787_v15  ;;  %v4782_v1 = vmul.f32 %v6732_v48, %v7704_v38 }
 0xbb3   : > { %6542 = vmatpush3.bf16.msra.mxu0 %v5071_v59  ;;  %6543 = vmatprep.mubr.msk.bf16.mxu0 %vm6768_vm1, %v6767_v3 }
 0xbb4   : > { %6538 = vmatmul.mubr.msk.bf16.vlgmr.msra.gmra.mrb[68].mxu1 %vm2074_vm3, %v4788_v63  ;;  %6553 = vmatprep.subr.bf16.mxu0 %v6767_v3  ;;  %v4790_v18 = vpack.c.bf16 %v4782_v1, %v4782_v1 }
 0xbb5   : > { %6548 = vmatpush3.bf16.msra.mxu1 %v5117_v36  ;;  %6549 = vmatprep.mubr.msk.bf16.mxu1 %vm6768_vm1, %v6767_v3 }
 0xbb6   : > { %6561 = vmatprep.subr.bf16.mxu1 %v6767_v3 }
 0xbba   : > { %6544 = vmatmul.mubr.msk.bf16.vlgmr.msra.gmra.mrb[64].mxu0 %vm2074_vm3, %v4789_v44 }
 0xbbb   : > { %6557 = vmatprep.mubr.msk.bf16.mxu0 %vm6768_vm1, %v6767_v3 }
 0xbbc   : > { %6550 = vmatmul.mubr.msk.bf16.vlgmr.msra.gmra.mrb[72].mxu1 %vm2074_vm3, %v4790_v18 }
 0xbbd   : > { %6565 = vmatprep.mubr.msk.bf16.mxu1 %vm6768_vm1, %v6767_v3 }
 0xc57   : > { %v4831_v34 = vpop.f32.mrb[52].mxu0 }
 0xc58   : > { %v6509_v52 = vpop.f32.mrb[53].mxu0 }
 0xc59   : > { %v4834_v55 = vpop.f32.mrb[54].mxu0  ;;  %v4877_v17 = vpop.f32.mrb[60].mxu1 }
 0xc5a   : > { %v6510_v4 = vpop.f32.mrb[55].mxu0  ;;  %v6515_v38 = vpop.f32.mrb[61].mxu1 }
 0xc5b   : > { %v4880_v58 = vpop.f32.mrb[62].mxu1 }
 0xc5c   : > { %v6516_v6 = vpop.f32.mrb[63].mxu1 }
 0xc7d   : > { %v4923_v7 = vpop.f32.mrb[56].mxu0 }
 0xc7e   : > { %v5159_v10 = vcombine.low %v4831_v34, %v4923_v7  ;;  %v5160_v37 = vcombine.high %v4831_v34, %v4923_v7  ;;  %v6521_v13 = vpop.f32.mrb[57].mxu0 }
 0xc7f   : > { %v4926_v11 = vpop.f32.mrb[58].mxu0  ;;  %v4969_v9 = vpop.f32.mrb[64].mxu1 }
 0xc80   : > { %v5175_v53 = vcombine.low %v4877_v17, %v4969_v9  ;;  %v5176_v40 = vcombine.high %v4877_v17, %v4969_v9  ;;  %v6522_v57 = vpop.f32.mrb[59].mxu0  ;;  %v6527_v19 = vpop.f32.mrb[65].mxu1  ;;  %v5167_v0 = vrot.slane %v5159_v10, %v7073_v32  ;;  %v5174_v8 = vrot.slane %v5160_v37, %v7073_v32 }
 0xc81   : > { %v4972_v20 = vpop.f32.mrb[66].mxu1 }
 0xc82   : > { %v5183_v22 = vrot.slane %v5175_v53, %v7073_v32  ;;  %v5190_v62 = vrot.slane %v5176_v40, %v7073_v32  ;;  %v6528_v2 = vpop.f32.mrb[67].mxu1 }
 0xc84   : > { %v5191_v5 = vcombine.low %v5167_v0, %v5183_v22  ;;  %v5192_v33 = vcombine.high %v5167_v0, %v5183_v22  ;;  %v5207_v25 = vcombine.low %v5174_v8, %v5190_v62  ;;  %v5208_v26 = vcombine.high %v5174_v8, %v5190_v62 }
 0xc85   : > { %v5015_v27 = vpop.f32.mrb[60].mxu0 }
 0xc86   : > { %v5199_v21 = vrot.slane %v5191_v5, %v7092_v46  ;;  %v5206_v29 = vrot.slane %v5192_v33, %v7092_v46  ;;  %v5215_v31 = vrot.slane %v5207_v25, %v7092_v46  ;;  %v5222_v35 = vrot.slane %v5208_v26, %v7092_v46  ;;  %v6533_v39 = vpop.f32.mrb[61].mxu0 }
 0xc87   : > { %v5018_v42 = vpop.f32.mrb[62].mxu0  ;;  %v5061_v41 = vpop.f32.mrb[68].mxu1 }
 0xc88   : > { %v5295_v45 = vcombine.low %v5199_v21, %v5206_v29  ;;  %v6200_v47 = vcombine.high %v5199_v21, %v5206_v29  ;;  %v5311_v54 = vcombine.low %v5215_v31, %v5222_v35  ;;  %v6201_v49 = vcombine.high %v5215_v31, %v5222_v35  ;;  %v6534_v28 = vpop.f32.mrb[63].mxu0  ;;  %v6539_v50 = vpop.f32.mrb[69].mxu1  ;;  %v6657_v21 = vld [vmem:[%s6977_s7] sm:$0xff]  }
 0xc89   : > { %v5064_v23 = vpop.f32.mrb[70].mxu1  ;;  %6554 = vmatpush3.bf16.msra.mxu0 %v6657_v21 }
 0xc8a   : > { %v5302_v51 = vrot.slane %v5295_v45, %v7073_v32  ;;  %v5310_v60 = vrot.slane %v6200_v47, %v7073_v32  ;;  %v5318_v43 = vrot.slane %v5311_v54, %v7073_v32  ;;  %v5326_v16 = vrot.slane %v6201_v49, %v7073_v32  ;;  %v6540_v12 = vpop.f32.mrb[71].mxu1  ;;  %6555 = vmatprep.subr.bf16.mxu0 %v6767_v3  ;;  %v6658_v23 = vld [vmem:[%s6977_s7 + $0x8] sm:$0xff]  }
 0xc8c   : > { %v5328_v15 = vcombine.high %v5302_v51, %v5310_v60  ;;  %v5344_v30 = vcombine.high %v5318_v43, %v5326_v16  ;;  %v5327_v56 = vcombine.low %v5302_v51, %v5310_v60  ;;  %v5343_v59 = vcombine.low %v5318_v43, %v5326_v16 }
 0xc8d   : > { %v5107_v63 = vpop.f32.mrb[64].mxu0  ;;  %6556 = vmatpush3.bf16.msra.mxu0 %v6658_v23 }
 0xc8e   : > { %v5227_v48 = vcombine.low %v5015_v27, %v5107_v63  ;;  %v5228_v61 = vcombine.high %v5015_v27, %v5107_v63  ;;  %v6545_v36 = vpop.f32.mrb[65].mxu0  ;;  %v5342_v1 = vrot.slane %v5328_v15, %v7092_v46  ;;  %v5358_v44 = vrot.slane %v5344_v30, %v7092_v46  ;;  %6569 = vmatprep.subr.bf16.mxu0 %v6767_v3 }
 0xc8f   : > { %v5110_v18 = vpop.f32.mrb[66].mxu0  ;;  %v5153_v34 = vpop.f32.mrb[72].mxu1  ;;  %v7819_v52 = vrot.slane %v5327_v56, %v7092_v46  ;;  %v7822_v55 = vrot.slane %v5343_v59, %v7092_v46 }
 0xc90   : > { %v5243_v17 = vcombine.low %v5061_v41, %v5153_v34  ;;  %v5244_v4 = vcombine.high %v5061_v41, %v5153_v34  ;;  %v6546_v38 = vpop.f32.mrb[67].mxu0  ;;  %v6551_v58 = vpop.f32.mrb[73].mxu1  ;;  %v5361_v7 = vcombine.low %v5342_v1, %v5358_v44  ;;  %v5362_v13 = vcombine.high %v5342_v1, %v5358_v44 }
 0xc91   : > { %v5156_v6 = vpop.f32.mrb[74].mxu1  ;;  %v5359_v10 = vcombine.low %v7819_v52, %v7822_v55  ;;  %v5360_v37 = vcombine.high %v7819_v52, %v7822_v55  ;;  %v5235_v11 = vrot.slane %v5227_v48, %v7073_v32  ;;  %v5242_v9 = vrot.slane %v5228_v61, %v7073_v32 }
 0xc92   : > { %v5251_v53 = vrot.slane %v5243_v17, %v7073_v32  ;;  %v5258_v40 = vrot.slane %v5244_v4, %v7073_v32  ;;  %v6552_v57 = vpop.f32.mrb[75].mxu1 }
 0xc94   : > { %v5259_v19 = vcombine.low %v5235_v11, %v5251_v53  ;;  %v5260_v20 = vcombine.high %v5235_v11, %v5251_v53  ;;  %v5275_v0 = vcombine.low %v5242_v9, %v5258_v40  ;;  %v5276_v8 = vcombine.high %v5242_v9, %v5258_v40 }
 0xc96   : > { %v5267_v22 = vrot.slane %v5259_v19, %v7092_v46  ;;  %v5274_v62 = vrot.slane %v5260_v20, %v7092_v46  ;;  %v5283_v2 = vrot.slane %v5275_v0, %v7092_v46  ;;  %v5290_v5 = vrot.slane %v5276_v8, %v7092_v46 }
 0xc98   : > { %v5363_v33 = vcombine.low %v5267_v22, %v5274_v62  ;;  %v6202_v25 = vcombine.high %v5267_v22, %v5274_v62  ;;  %v5379_v26 = vcombine.low %v5283_v2, %v5290_v5  ;;  %v6203_v27 = vcombine.high %v5283_v2, %v5290_v5  ;;  %v6659_v5 = vld [vmem:[%s6994_s0] sm:$0xff]  }
 0xc99   : > { %6562 = vmatpush3.bf16.msra.mxu1 %v6659_v5  ;;  %v6221_v5 = vld [vmem:[%s1134_s16] ss:$0 sm:$0xff] }
 0xc9a   : > { %v5370_v29 = vrot.slane %v5363_v33, %v7073_v32  ;;  %v5378_v31 = vrot.slane %v6202_v25, %v7073_v32  ;;  %v5386_v35 = vrot.slane %v5379_v26, %v7073_v32  ;;  %v5394_v39 = vrot.slane %v6203_v27, %v7073_v32  ;;  %v6660_v33 = vld [vmem:[%s6994_s0 + $0x8] sm:$0xff]   ;;  %6563 = vmatprep.subr.bf16.mxu1 %v6767_v3  ;;  %v6661_v25 = vld [vmem:[%s7004_s22] sm:$0xff]  }
 0xc9b   : > { %v6662_v26 = vld [vmem:[%s7004_s22 + $0x8] sm:$0xff]  }
 0xc9c   : > { %v5396_v42 = vcombine.high %v5370_v29, %v5378_v31  ;;  %v5412_v41 = vcombine.high %v5386_v35, %v5394_v39  ;;  %v5395_v45 = vcombine.low %v5370_v29, %v5378_v31  ;;  %v5411_v47 = vcombine.low %v5386_v35, %v5394_v39 }
 0xc9d   : > { %6564 = vmatpush3.bf16.msra.mxu1 %v6660_v33 }
 0xc9e   : > { %v5410_v54 = vrot.slane %v5396_v42, %v7092_v46  ;;  %v5426_v49 = vrot.slane %v5412_v41, %v7092_v46  ;;  %v5403_v28 = vrot.slane %v5395_v45, %v7092_v46  ;;  %v5419_v50 = vrot.slane %v5411_v47, %v7092_v46 }
 0xca0   : > { %v5429_v51 = vcombine.low %v5410_v54, %v5426_v49  ;;  %v5428_v60 = vcombine.high %v5403_v28, %v5419_v50  ;;  %v5427_v43 = vcombine.low %v5403_v28, %v5419_v50  ;;  %v5430_v32 = vcombine.high %v5410_v54, %v5426_v49  ;;  %v6209_v28 = vld [vmem:[%s8022_s29] ss:$0 sm:$0xff] }
 0xca2   : > { %v6638_v16 = vpack.i.bf16 %v5429_v51, %v5361_v7  ;;  %v6633_v12 = vpack.i.bf16 %v5428_v60, %v5360_v37  ;;  %v6643_v15 = vpack.i.bf16 %v5430_v32, %v5362_v13  ;;  %v6664_v32 = vld [vmem:[%s7004_s22 + $0x18] sm:$0xff]  }
 0xca4   : > { %6639 = vrot.lane.b32.xlu0 %v6638_v16, %s6777_s8  ;;  %6634 = vrot.lane.b32.xlu1 %v6633_v12, %s6778_s10  ;;  %s8018_s8 = scalar_lea.vmem %s7949_s15, %s6927_s6  ;;  %v6210_v16 = vld [vmem:[%s8023_s21] ss:$0 sm:$0xff] }
 0xca5   : > { %v6204_v38 = vld [vmem:[%s8018_s8] ss:$0 sm:$0xff]  ;;  %s8027_s8 = sld [smem:[#allocation3_spill]] }
 0xca8   : > { %6644 = vrot.lane.b32.xlu1 %v6643_v15, %s6779_s17  ;;  %s8019_s17 = sld [smem:[#allocation20_spill]] }
 0xcab   : > { %p6222_p6 = scmp.ne.s32.totalorder %s8027_s8, 1 }
 0xcac   : > { %vm5784_vm8 = vcmask (!%p6222_p6), 257024   ;;  %s8028_s10 = sld [smem:[#allocation26_spill]] (!%p6222_p6) }
 0xcae   : > { %s8020_s26 = scalar_lea.vmem %s8019_s17, %s6927_s6 }
 0xcaf   : > { %v6208_v41 = vld [vmem:[%s8020_s26] ss:$0 sm:$0xff] }
 0xd16   : > { %v6640_v30 = vpop.permute.xlu0 %6639  ;;  %v6635_v56 = vpop.permute.xlu1 %6634 }
 0xd17   : > { %v6637_v46 = vunpack.i.h.bf16 %v6635_v56  ;;  %v6636_v59 = vunpack.i.l.bf16 %v6635_v56  ;;  %v6642_v63 = vunpack.i.h.bf16 %v6640_v30  ;;  %v6641_v48 = vunpack.i.l.bf16 %v6640_v30 }
 0xd19   : > { %v5455_v61 = vsel %vm2074_vm3, %v5359_v10, %v6636_v59  ;;  %v5456_v36 = vsel %vm2074_vm3, %v5427_v43, %v6637_v46  ;;  %v6663_v43 = vld [vmem:[%s7004_s22 + $0x10] sm:$0xff]  }
 0xd1a   : > { %v6645_v1 = vpop.permute.xlu1 %6644  ;;  %v5457_v34 = vsel %vm3216_vm5, %v5455_v61, %v6641_v48  ;;  %v5458_v52 = vsel %vm3216_vm5, %v5456_v36, %v6642_v63 }
 0xd1b   : > { %v6647_v44 = vunpack.i.h.bf16 %v6645_v1  ;;  %v6646_v18 = vunpack.i.l.bf16 %v6645_v1 }
 0xd1d   : > { %v5459_v55 = vsel %vm3219_vm6, %v5457_v34, %v6646_v18  ;;  %v5460_v17 = vsel %vm3219_vm6, %v5458_v52, %v6647_v44 }
 0xd1e   : > { %v5465_v4 = vpack.c.bf16 %v5460_v17, %v5459_v55 }
 0xd20   : > { %6558 = vmatmul.mubr.msk.bf16.vlgmr.msra.gmra.mrb[68].mxu0 %vm1183_vm2, %v5465_v4 }
 0xd21   : > { %6577 = vmatprep.mubr.msk.bf16.mxu0 %vm6768_vm1, %v6767_v3  ;;  %6570 = vmatpush3.bf16.msra.mxu0 %v6661_v25 }
 0xd22   : > { %6571 = vmatprep.subr.bf16.mxu0 %v6767_v3 }
 0xd25   : > { %6572 = vmatpush3.bf16.msra.mxu0 %v6662_v26 }
 0xd26   : > { %6573 = vmatprep.subr.bf16.mxu0 %v6767_v3 }
 0xd29   : > { %6574 = vmatpush3.bf16.msra.mxu0 %v6663_v43 }
 0xd2a   : > { %6575 = vmatprep.subr.bf16.mxu0 %v6767_v3  ;;  %v6214_v3 = vld [vmem:[%s1128_s23] ss:$0 sm:$0xff] }
 0xd2d   : > { %6576 = vmatpush3.bf16.msra.mxu0 %v6664_v32 }
 0xdf3   : > { %v5522_v58 = vpop.f32.mrb[68].mxu0 }
 0xdf4   : > { %v5523_v6 = vadd.f32 %v6204_v38, %v5522_v58  ;;  %v6559_v7 = vpop.f32.mrb[69].mxu0 }
 0xdf5   : > { %v5525_v10 = vpop.f32.mrb[70].mxu0 }
 0xdf6   : > { %v5526_v37 = vadd.f32 %v6204_v38, %v5525_v10  ;;  %v6560_v13 = vpop.f32.mrb[71].mxu0  ;;  %v5529_v11 = vadd.f32 %v5523_v6, %v7462_v14 }
 0xdf8   : > { %v5533_v9 = vsel %vm1183_vm2, %v5529_v11, 0.0  ;;  %v5530_v53 = vadd.f32 %v5526_v37, %v7464_v24 }
 0xdf9   : > { %5534 = vadd.xlane.f32.xlu1 %v5533_v9 }
 0xdfa   : > { %v5536_v40 = vsel %vm1183_vm2, %v5530_v53, 0.0 }
 0xdfb   : > { %5537 = vadd.xlane.f32.xlu0 %v5536_v40 }
 0xe86   : > { %v5535_v57 = vpop.xlane.xlu1 %5534 }
 0xe87   : > { %v5539_v19 = vmul.f32 0.03125, %v5535_v57 }
 0xe88   : > { %v5538_v20 = vpop.xlane.xlu0 %5537 }
 0xe89   : > { %v5541_v0 = vsub.f32 %v5529_v11, %v5539_v19  ;;  %v5540_v8 = vmul.f32 0.03125, %v5538_v20 }
 0xe8b   : > { %v5542_v22 = vsub.f32 %v5530_v53, %v5540_v8  ;;  %v5543_v62 = vmul.f32 %v5541_v0, %v5541_v0 }
 0xe8d   : > { %v5545_v14 = vsel %vm1183_vm2, %v5543_v62, 0.0  ;;  %v5544_v2 = vmul.f32 %v5542_v22, %v5542_v22 }
 0xe8e   : > { %5546 = vadd.xlane.f32.xlu0 %v5545_v14  ;;  %v6220_v14 = vld [vmem:[%s1131_s12] ss:$0 sm:$0xff] }
 0xe8f   : > { %v5548_v24 = vsel %vm1183_vm2, %v5544_v2, 0.0 }
 0xe90   : > { %5549 = vadd.xlane.f32.xlu1 %v5548_v24 }
 0xf1b   : > { %v5547_v27 = vpop.xlane.xlu0 %5546 }
 0xf1c   : > { %v5551_v21 = vmul.f32 0.03125, %v5547_v27 }
 0xf1d   : > { %v5550_v29 = vpop.xlane.xlu1 %5549 }
 0xf1e   : > { %v5553_v31 = vadd.f32 1e-06, %v5551_v21  ;;  %v5552_v35 = vmul.f32 0.03125, %v5550_v29 }
 0xf20   : > { %6733 = vrsqrt.f32 %v5553_v31  ;;  %v5554_v39 = vadd.f32 1e-06, %v5552_v35 }
 0xf22   : > { %6735 = vrsqrt.f32 %v5554_v39 }
 0xf2a   : > { %v6734_v42 = vpop.eup %6733 }
 0xf2b   : > { %v5557_v45 = vmul.f32 %v6734_v42, %v5541_v0 }
 0xf2c   : > { %v6736_v47 = vpop.eup %6735 }
 0xf2d   : > { %v5565_v54 = vmul.f32 %v6208_v41, %v5557_v45  ;;  %v5558_v49 = vmul.f32 %v6736_v47, %v5542_v22 }
 0xf2f   : > { %v5566_v50 = vmul.f32 %v6208_v41, %v5558_v49  ;;  %v5573_v23 = vadd.f32 %v6209_v28, %v5565_v54 }
 0xf31   : > { %v5574_v51 = vadd.f32 %v6209_v28, %v5566_v50 }
 0xf33   : > { %v5579_v60 = vpack.c.bf16 %v5574_v51, %v5573_v23 }
 0xf35   : > { %6566 = vmatmul.mubr.msk.bf16.vlgmr.msra.gmra.mrb[76].mxu1 %vm1183_vm2, %v5579_v60 }
0x1008   : > { %v5636_v12 = vpop.f32.mrb[76].mxu1 }
0x1009   : > { %v5637_v15 = vadd.f32 %v6210_v16, %v5636_v12  ;;  %v6567_v30 = vpop.f32.mrb[77].mxu1 }
0x100a   : > { %v5639_v56 = vpop.f32.mrb[78].mxu1 }
0x100b   : > { %v5640_v46 = vadd.f32 %v6210_v16, %v5639_v56  ;;  %v6568_v59 = vpop.f32.mrb[79].mxu1  ;;  %v5643_v63 = vmax.f32 %v5637_v15, 0.0 }
0x100d   : > { %v5644_v48 = vmax.f32 %v5640_v46, 0.0 }
0x100f   : > { %v5653_v61 = vpack.c.bf16 %v5644_v48, %v5643_v63 }
0x1011   : > { %6578 = vmatmul.mubr.msk.bf16.vlgmr.msra.gmra.mrb[72].mxu0 %vm5685_vm7, %v5653_v61 }
0x10e4   : > { %v5723_v36 = vpop.f32.mrb[72].mxu0 }
0x10e5   : > { %v5724_v1 = vadd.f32 %v6214_v3, %v5723_v36  ;;  %v6579_v44 = vpop.f32.mrb[73].mxu0 }
0x10e6   : > { %v5726_v18 = vpop.f32.mrb[74].mxu0 }
0x10e7   : > { %v5727_v34 = vadd.f32 %v6214_v3, %v5726_v18  ;;  %v6580_v52 = vpop.f32.mrb[75].mxu0  ;;  %v5730_v55 = vadd.f32 %v5724_v1, %v5573_v23 }
0x10e9   : > { %v5734_v17 = vsel %vm1183_vm2, %v5730_v55, 0.0  ;;  %v5731_v4 = vadd.f32 %v5727_v34, %v5574_v51 }
0x10ea   : > { %5735 = vadd.xlane.f32.xlu0 %v5734_v17 }
0x10eb   : > { %v5737_v38 = vsel %vm1183_vm2, %v5731_v4, 0.0 }
0x10ec   : > { %5738 = vadd.xlane.f32.xlu1 %v5737_v38 }
0x1177   : > { %v5736_v58 = vpop.xlane.xlu0 %5735 }
0x1178   : > { %v5740_v6 = vmul.f32 0.03125, %v5736_v58 }
0x1179   : > { %v5739_v7 = vpop.xlane.xlu1 %5738 }
0x117a   : > { %v5742_v10 = vsub.f32 %v5730_v55, %v5740_v6  ;;  %v5741_v37 = vmul.f32 0.03125, %v5739_v7 }
0x117c   : > { %v5743_v13 = vsub.f32 %v5731_v4, %v5741_v37  ;;  %v5744_v11 = vmul.f32 %v5742_v10, %v5742_v10 }
0x117e   : > { %v5746_v9 = vsel %vm1183_vm2, %v5744_v11, 0.0  ;;  %v5745_v53 = vmul.f32 %v5743_v13, %v5743_v13 }
0x117f   : > { %5747 = vadd.xlane.f32.xlu0 %v5746_v9 }
0x1180   : > { %v5749_v40 = vsel %vm1183_vm2, %v5745_v53, 0.0 }
0x1181   : > { %5750 = vadd.xlane.f32.xlu1 %v5749_v40 }
0x120c   : > { %v5748_v57 = vpop.xlane.xlu0 %5747 }
0x120d   : > { %v5752_v19 = vmul.f32 0.03125, %v5748_v57 }
0x120e   : > { %v5751_v20 = vpop.xlane.xlu1 %5750 }
0x120f   : > { %v5754_v0 = vadd.f32 1e-06, %v5752_v19  ;;  %v5753_v8 = vmul.f32 0.03125, %v5751_v20 }
0x1211   : > { %6737 = vrsqrt.f32 %v5754_v0  ;;  %v5755_v22 = vadd.f32 1e-06, %v5753_v8 }
0x1213   : > { %6739 = vrsqrt.f32 %v5755_v22 }
0x121b   : > { %v6738_v62 = vpop.eup %6737 }
0x121c   : > { %v5758_v2 = vmul.f32 %v6738_v62, %v5742_v10 }
0x121d   : > { %v6740_v24 = vpop.eup %6739 }
0x121e   : > { %v5766_v33 = vmul.f32 %v6220_v14, %v5758_v2  ;;  %v5759_v25 = vmul.f32 %v6740_v24, %v5743_v13  ;;  %5781 = sbr.rel (%p6222_p6) target bundleno = 4647 (0x1227), region = 124 }
0x1220   : > { %v5774_v26 = vadd.f32 %v6221_v5, %v5766_v33  ;;  %v5767_v27 = vmul.f32 %v6220_v14, %v5759_v25 }
0x1222   : > { %5776 = vst.msk [vmem:[#allocation2] sm:$0xff] %vm1183_vm2, %v5774_v26  ;;  %v5775_v21 = vadd.f32 %v6221_v5, %v5767_v27  ;;  %v5782_v29 = vpack.c.bf16 (!%p6222_p6), %v5774_v26, %v5774_v26 }
0x1224   : > { %5777 = vst.msk [vmem:[#allocation2 + $0x8] sm:$0xff] %vm1183_vm2, %v5775_v21  ;;  %v5783_v31 = vpack.c.bf16 (!%p6222_p6), %v5775_v21, %v5775_v21 }
0x1225   : > { %5785 = vst.msk [vmem:[%s8028_s10] sm:$0xf] %vm5784_vm8, %v5782_v29 }
0x1226   : > { %5786 = vst.msk [vmem:[%s8028_s10 + $0x4] sm:$0xf] %vm5784_vm8, %v5783_v31 }
0x1227 PF: > { %s8029_s17 = sld [smem:[#allocation5_spill]]  ;;  %s8030_s5 = sld [smem:[#allocation4_spill]] }
0x1228   : > { %s8031_s26 = sld [smem:[#allocation6_spill]] }
0x122d   : > { %s34_s27 = sadd.s32 1, %s8029_s17  }
0x122e   : > { %p31_p7 = scmp.ge.s32.totalorder %s34_s27, 4  }
0x1230   :  { %33 = sbr.rel (!%p31_p7) target bundleno = 20 (0x14), region = 223 }

</bundles_post_ra>
